<compile_context>
chip_gen: v5e
topology: v5e:2x2
jax: 0.10.0
libtpu: 0.0.40
codegen_flags: <defaults>
</compile_context>

<pallas_src>
import jax
import jax.numpy as jnp
import numpy as np
from jax.experimental import pallas as pl
from jax.experimental.pallas import tpu as pltpu

HIDDEN_DIM = 64
INPUT_DIM = 3
NUM_LAYERS = 2
OUTPUT_DIM = 1


def lstm_kernel(xs_ref, wih0_ref, b0_ref, wr_ref, b1_ref, wfct_ref, bfc_ref,
                out_ref, xp_ref):
    H = HIDDEN_DIM
    G = 4 * H                        # fused gate width per layer (256)
    Bp = out_ref.shape[0]            # padded batch (multiple of 8)
    SB = xs_ref.shape[0]             # S * Bp
    S = SB // Bp

    # ---- Precompute layer-0 input projection for ALL timesteps (one matmul,
    #      off the recurrent critical path); summed bias b0 folded in.
    xp_ref[...] = (
        jnp.dot(xs_ref[...], wih0_ref[...], preferred_element_type=jnp.float32)
        + b0_ref[...])

    # ---- Hoisted constants: bias broadcast + g-lane fixup for tanh = 2*sigmoid(2x)-1
    #      (the x2 on the g pre-activations is folded into the weights/bias in the wrapper).
    b1 = jnp.broadcast_to(b1_ref[...], (Bp, G))
    lane = jax.lax.broadcasted_iota(jnp.int32, (Bp, G), 1)
    is_g = (lane >= 2 * H) & (lane < 3 * H)
    g_scale = jnp.where(is_g, 2.0, 1.0).astype(jnp.float32)
    g_off = jnp.where(is_g, -1.0, 0.0).astype(jnp.float32)

    def cell_update(z, c):
        # one sigmoid pass over the whole (Bp, 4H) gate vector; g lanes fixed up
        # with a single FMA (i, f, o = sigmoid; g = 2*sigmoid(2x)-1 = tanh).
        a = jax.nn.sigmoid(z) * g_scale + g_off
        i, f, g, o = a[:, :H], a[:, H:2 * H], a[:, 2 * H:3 * H], a[:, 3 * H:]
        c_new = f * c + i * g
        h_new = o * jnp.tanh(c_new)
        return h_new, c_new

    zeros = jnp.zeros((Bp, H), jnp.float32)

    # ---- Prologue: layer-0 cell at t=0 (h1_{-1} = c1_{-1} = 0  =>  z = xp[0]).
    h1, c1 = cell_update(xp_ref[pl.ds(0, Bp), :], zeros)
    h2, c2 = zeros, zeros

    # ---- Wavefront loop: iteration t does layer-0 step t AND layer-1 step t-1
    #      with ONE fused (Bp,128)x(128,512) matmul on [h1_{t-1} | h2_{t-2}].
    def step(t, carry):
        h1, c1, h2, c2 = carry
        lhs = jnp.concatenate([h1, h2], axis=1)                         # (Bp, 2H)
        zz = jnp.dot(lhs, wr_ref[...],
                     preferred_element_type=jnp.float32)                # (Bp, 8H)
        r = pl.multiple_of(t * Bp, Bp)
        z0 = zz[:, :G] + xp_ref[pl.ds(r, Bp), :]     # layer-0 gates @ step t
        z1 = zz[:, G:] + b1                          # layer-1 gates @ step t-1
        h1n, c1n = cell_update(z0, c1)
        h2n, c2n = cell_update(z1, c2)
        return h1n, c1n, h2n, c2n

    h1, c1, h2, c2 = jax.lax.fori_loop(1, S, step, (h1, c1, h2, c2),
                                       unroll=True)

    # ---- Epilogue: layer-1 cell at the final step t = S-1.
    lhs = jnp.concatenate([h1, h2], axis=1)
    zz = jnp.dot(lhs, wr_ref[...], preferred_element_type=jnp.float32)
    h2, c2 = cell_update(zz[:, G:] + b1, c2)

    # ---- fc: (Bp, H) -> (Bp, 1) lane reduction (runs once).
    out_ref[...] = (jnp.sum(h2 * wfct_ref[...], axis=1, keepdims=True)
                    + bfc_ref[...]).astype(out_ref.dtype)


def lstm_forward(x, params):
    """x: (B, S, input_dim) float32 -> (B, output_dim) float32 (eval mode)."""
    B, S, Din = x.shape
    H = HIDDEN_DIM
    G = 4 * H
    assert Din <= H
    Bp = ((B + 7) // 8) * 8                         # pad batch to a sublane group

    # time-major, zero-pad features Din->H and batch B->Bp, flatten (time x batch)
    xs = jnp.transpose(x, (1, 0, 2))                                   # (S, B, Din)
    xs = jnp.pad(xs, ((0, 0), (0, Bp - B), (0, H - Din)))              # (S, Bp, H)
    xs = xs.reshape(S * Bp, H)

    # tanh(x) = 2*sigmoid(2x) - 1 rewrite: fold the x2 into the g-gate columns of
    # EVERY weight and of the summed biases (gate column order is [i | f | g | o]).
    gcols = jnp.ones((G,), jnp.float32).at[2 * H:3 * H].set(2.0)

    wih0 = jnp.zeros((H, G), jnp.float32).at[:Din, :].set(params["wih0"]) * gcols
    b0 = params["b0"] * gcols                                          # (1, G)
    b1 = params["b1"] * gcols                                          # (1, G)

    # fused recurrent weight for the wavefront matmul, (2H, 8H) = (128, 512):
    #   [h1 | h2] @ [[Whh0 | Wih1],
    #                [  0  | Whh1]]  =  [h1@Whh0 | h1@Wih1 + h2@Whh1]
    whh0 = params["whh0"] * gcols
    wih1 = params["wih1"] * gcols
    whh1 = params["whh1"] * gcols
    wr = jnp.concatenate(
        [jnp.concatenate([whh0, wih1], axis=1),
         jnp.concatenate([jnp.zeros((H, G), jnp.float32), whh1], axis=1)],
        axis=0)                                                         # (128, 512)

    wfct = params["wfc"].T                                              # (1, H)

    out = pl.pallas_call(
        lstm_kernel,
        out_shape=jax.ShapeDtypeStruct((Bp, OUTPUT_DIM), jnp.float32),
        in_specs=[pl.BlockSpec(memory_space=pltpu.MemorySpace.VMEM)] * 7,
        out_specs=pl.BlockSpec(memory_space=pltpu.MemorySpace.VMEM),
        scratch_shapes=[pltpu.VMEM((S * Bp, G), jnp.float32)],
    )(xs, wih0, b0, wr, b1, wfct, params["bfc"])
    return out[:B]


def init_params(key):
    """Deterministic init matching PyTorch LSTM/Linear shapes (uniform +-1/sqrt(H))."""
    H = HIDDEN_DIM
    k = 1.0 / np.sqrt(H)
    keys = jax.random.split(key, 10)

    def u(kk, shape):
        return jax.random.uniform(kk, shape, jnp.float32, -k, k)

    # PyTorch shapes: weight_ih_l0 (4H, Din), weight_hh_l0 (4H, H), biases (4H,)
    # stored here pre-transposed and with the two biases summed; gate order [i,f,g,o].
    wih0 = u(keys[0], (INPUT_DIM, 4 * H))
    whh0 = u(keys[1], (H, 4 * H))
    b0 = u(keys[2], (1, 4 * H)) + u(keys[3], (1, 4 * H))
    wih1 = u(keys[4], (H, 4 * H))
    whh1 = u(keys[5], (H, 4 * H))
    b1 = u(keys[6], (1, 4 * H)) + u(keys[7], (1, 4 * H))
    kf = 1.0 / np.sqrt(H)
    wfc = jax.random.uniform(keys[8], (H, OUTPUT_DIM), jnp.float32, -kf, kf)
    bfc = jax.random.uniform(keys[9], (1, OUTPUT_DIM), jnp.float32, -kf, kf)
    return dict(wih0=wih0, whh0=whh0, b0=b0,
                wih1=wih1, whh1=whh1, b1=b1, wfc=wfc, bfc=bfc)


def ref_forward(x, p):
    """Pure-JAX reference (eval-mode 2-layer LSTM + Linear on h_n[-1])."""
    H = HIDDEN_DIM
    B = x.shape[0]
    xs = jnp.transpose(x, (1, 0, 2))  # (S, B, Din)

    def layer(xs_in, wih, whh, b):
        def step(carry, x_t):
            h, c = carry
            z = x_t @ wih + h @ whh + b
            i = jax.nn.sigmoid(z[:, :H])
            f = jax.nn.sigmoid(z[:, H:2 * H])
            g = jnp.tanh(z[:, 2 * H:3 * H])
            o = jax.nn.sigmoid(z[:, 3 * H:])
            c = f * c + i * g
            h = o * jnp.tanh(c)
            return (h, c), h
        init = (jnp.zeros((B, H), jnp.float32), jnp.zeros((B, H), jnp.float32))
        (h_last, _), hs = jax.lax.scan(step, init, xs_in)
        return hs, h_last

    hs1, _ = layer(xs, p["wih0"], p["whh0"], p["b0"])
    _, h2 = layer(hs1, p["wih1"], p["whh1"], p["b1"])
    return h2 @ p["wfc"] + p["bfc"]


if __name__ == "__main__":
    key = jax.random.PRNGKey(0)
    pkey, xkey = jax.random.split(key)
    params = init_params(pkey)

    B, S = 4, 8
    x = jax.random.normal(xkey, (B, S, INPUT_DIM), jnp.float32)

    out = lstm_forward(x, params)
    out = jax.block_until_ready(out)

    ref = jax.block_until_ready(ref_forward(x, params))
    assert out.shape == (B, OUTPUT_DIM)
    # slightly looser than 1e-5: the tanh(x)=2*sigmoid(2x)-1 rewrite and the fused
    # matmul ordering differ from the reference by a few f32 ulps per step.
    np.testing.assert_allclose(np.asarray(out), np.asarray(ref),
                               rtol=1e-4, atol=5e-5)
    print("KERNEL_OK")
</pallas_src>

<mosaic_0001>
module attributes {stable_mosaic.version = 11 : i64} {
  func.func @lstm_kernel(%arg0: memref<64x64xf32, #tpu.memory_space<vmem>>, %arg1: memref<64x256xf32, #tpu.memory_space<vmem>>, %arg2: memref<1x256xf32, #tpu.memory_space<vmem>>, %arg3: memref<128x512xf32, #tpu.memory_space<vmem>>, %arg4: memref<1x256xf32, #tpu.memory_space<vmem>>, %arg5: memref<1x64xf32, #tpu.memory_space<vmem>>, %arg6: memref<1x1xf32, #tpu.memory_space<vmem>>, %arg7: memref<8x1xf32, #tpu.memory_space<vmem>>, %arg8: memref<64x256xf32, #tpu.memory_space<vmem>>) attributes {dimension_semantics = [], scalar_prefetch = 0 : i64, scratch_operands = 1 : i64, tpu.core_type = #tpu.core_type<tc>} {
    %c0 = arith.constant 0 : index
    %c0_0 = arith.constant 0 : index
    %0 = vector.load %arg0[%c0, %c0_0] : memref<64x64xf32, #tpu.memory_space<vmem>>, vector<64x64xf32>
    %c0_1 = arith.constant 0 : index
    %c0_2 = arith.constant 0 : index
    %1 = vector.load %arg1[%c0_1, %c0_2] : memref<64x256xf32, #tpu.memory_space<vmem>>, vector<64x256xf32>
    %cst = arith.constant dense<0.000000e+00> : vector<64x256xf32>
    %2 = tpu.matmul %0, %1, %cst {dimension_numbers = #tpu.dot_dimension_numbers<[1], [0], [0], [1], [0, 0, 1, 1], [], []>} : vector<64x64xf32>, vector<64x256xf32>, vector<64x256xf32> -> vector<64x256xf32>
    %c0_3 = arith.constant 0 : index
    %c0_4 = arith.constant 0 : index
    %3 = vector.load %arg2[%c0_3, %c0_4] : memref<1x256xf32, #tpu.memory_space<vmem>>, vector<1x256xf32>
    %4 = vector.broadcast %3 : vector<1x256xf32> to vector<64x256xf32>
    %5 = arith.addf %2, %4 : vector<64x256xf32>
    %c0_5 = arith.constant 0 : index
    %c0_6 = arith.constant 0 : index
    %6 = vector.load %arg8[%c0_5, %c0_6] : memref<64x256xf32, #tpu.memory_space<vmem>>, vector<64x256xf32>
    tpu.vector_store %arg8[%c0_5, %c0_6], %5 {strides = array<i32>} : memref<64x256xf32, #tpu.memory_space<vmem>>, vector<64x256xf32>,
    %c0_7 = arith.constant 0 : index
    %c0_8 = arith.constant 0 : index
    %7 = vector.load %arg4[%c0_7, %c0_8] : memref<1x256xf32, #tpu.memory_space<vmem>>, vector<1x256xf32>
    %8 = vector.shape_cast %7 : vector<1x256xf32> to vector<1x256xf32>
    %9 = vector.broadcast %8 : vector<1x256xf32> to vector<8x256xf32>
    %10 = tpu.iota {dimensions = array<i32: 1>} : vector<8x256xi32>
    %c128_i32 = arith.constant 128 : i32
    %11 = vector.broadcast %c128_i32 : i32 to vector<8x256xi32>
    %12 = arith.cmpi sge, %10, %11 : vector<8x256xi32>
    %c192_i32 = arith.constant 192 : i32
    %13 = vector.broadcast %c192_i32 : i32 to vector<8x256xi32>
    %14 = arith.cmpi slt, %10, %13 : vector<8x256xi32>
    %15 = arith.andi %12, %14 : vector<8x256xi1>
    %cst_9 = arith.constant 2.000000e+00 : f32
    %cst_10 = arith.constant 1.000000e+00 : f32
    %16 = vector.broadcast %cst_9 : f32 to vector<8x256xf32>
    %17 = vector.broadcast %cst_10 : f32 to vector<8x256xf32>
    %18 = arith.select %15, %16, %17 : vector<8x256xi1>, vector<8x256xf32>
    %cst_11 = arith.constant -1.000000e+00 : f32
    %cst_12 = arith.constant 0.000000e+00 : f32
    %19 = vector.broadcast %cst_11 : f32 to vector<8x256xf32>
    %20 = vector.broadcast %cst_12 : f32 to vector<8x256xf32>
    %21 = arith.select %15, %19, %20 : vector<8x256xi1>, vector<8x256xf32>
    %cst_13 = arith.constant 0.000000e+00 : f32
    %22 = vector.broadcast %cst_13 : f32 to vector<8x64xf32>
    %c0_14 = arith.constant 0 : index
    %c0_15 = arith.constant 0 : index
    %23 = vector.load %arg8[%c0_14, %c0_15] : memref<64x256xf32, #tpu.memory_space<vmem>>, vector<8x256xf32>
    %24 = arith.negf %23 : vector<8x256xf32>
    %25 = math.exp %24 : vector<8x256xf32>
    %cst_16 = arith.constant 1.000000e+00 : f32
    %26 = vector.broadcast %cst_16 : f32 to vector<8x256xf32>
    %27 = arith.addf %26, %25 : vector<8x256xf32>
    %28 = arith.divf %26, %27 : vector<8x256xf32>
    %29 = arith.mulf %28, %18 : vector<8x256xf32>
    %30 = arith.addf %29, %21 : vector<8x256xf32>
    %31 = vector.extract_strided_slice %30 {offsets = [0, 0], sizes = [8, 64], strides = [1, 1]} : vector<8x256xf32> to vector<8x64xf32>
    %32 = vector.extract_strided_slice %30 {offsets = [0, 64], sizes = [8, 64], strides = [1, 1]} : vector<8x256xf32> to vector<8x64xf32>
    %33 = vector.extract_strided_slice %30 {offsets = [0, 128], sizes = [8, 64], strides = [1, 1]} : vector<8x256xf32> to vector<8x64xf32>
    %34 = vector.extract_strided_slice %30 {offsets = [0, 192], sizes = [8, 64], strides = [1, 1]} : vector<8x256xf32> to vector<8x64xf32>
    %35 = arith.mulf %32, %22 : vector<8x64xf32>
    %36 = arith.mulf %31, %33 : vector<8x64xf32>
    %37 = arith.addf %35, %36 : vector<8x64xf32>
    %38 = math.tanh %37 : vector<8x64xf32>
    %39 = arith.mulf %34, %38 : vector<8x64xf32>
    %c1_i32 = arith.constant 1 : i32
    %40 = tpu.concatenate %39, %22 in 1 : vector<8x64xf32>, vector<8x64xf32> -> vector<8x128xf32>
    %c0_17 = arith.constant 0 : index
    %c0_18 = arith.constant 0 : index
    %41 = vector.load %arg3[%c0_17, %c0_18] : memref<128x512xf32, #tpu.memory_space<vmem>>, vector<128x512xf32>
    %cst_19 = arith.constant dense<0.000000e+00> : vector<8x512xf32>
    %42 = tpu.matmul %40, %41, %cst_19 {dimension_numbers = #tpu.dot_dimension_numbers<[1], [0], [0], [1], [0, 0, 1, 1], [], []>} : vector<8x128xf32>, vector<128x512xf32>, vector<8x512xf32> -> vector<8x512xf32>
    %c8_i32 = arith.constant 8 : i32
    %43 = arith.muli %c1_i32, %c8_i32 : i32
    %44 = tpu.assume_multiple %43, 8 : i32
    %45 = vector.extract_strided_slice %42 {offsets = [0, 0], sizes = [8, 256], strides = [1, 1]} : vector<8x512xf32> to vector<8x256xf32>
    %46 = arith.index_cast %44 : i32 to index
    %c0_20 = arith.constant 0 : index
    %47 = vector.load %arg8[%46, %c0_20] : memref<64x256xf32, #tpu.memory_space<vmem>>, vector<8x256xf32>
    %48 = arith.addf %45, %47 : vector<8x256xf32>
    %49 = vector.extract_strided_slice %42 {offsets = [0, 256], sizes = [8, 256], strides = [1, 1]} : vector<8x512xf32> to vector<8x256xf32>
    %50 = arith.addf %49, %9 : vector<8x256xf32>
    %51 = arith.negf %48 : vector<8x256xf32>
    %52 = math.exp %51 : vector<8x256xf32>
    %cst_21 = arith.constant 1.000000e+00 : f32
    %53 = vector.broadcast %cst_21 : f32 to vector<8x256xf32>
    %54 = arith.addf %53, %52 : vector<8x256xf32>
    %55 = arith.divf %53, %54 : vector<8x256xf32>
    %56 = arith.mulf %55, %18 : vector<8x256xf32>
    %57 = arith.addf %56, %21 : vector<8x256xf32>
    %58 = vector.extract_strided_slice %57 {offsets = [0, 0], sizes = [8, 64], strides = [1, 1]} : vector<8x256xf32> to vector<8x64xf32>
    %59 = vector.extract_strided_slice %57 {offsets = [0, 64], sizes = [8, 64], strides = [1, 1]} : vector<8x256xf32> to vector<8x64xf32>
    %60 = vector.extract_strided_slice %57 {offsets = [0, 128], sizes = [8, 64], strides = [1, 1]} : vector<8x256xf32> to vector<8x64xf32>
    %61 = vector.extract_strided_slice %57 {offsets = [0, 192], sizes = [8, 64], strides = [1, 1]} : vector<8x256xf32> to vector<8x64xf32>
    %62 = arith.mulf %59, %37 : vector<8x64xf32>
    %63 = arith.mulf %58, %60 : vector<8x64xf32>
    %64 = arith.addf %62, %63 : vector<8x64xf32>
    %65 = math.tanh %64 : vector<8x64xf32>
    %66 = arith.mulf %61, %65 : vector<8x64xf32>
    %67 = arith.negf %50 : vector<8x256xf32>
    %68 = math.exp %67 : vector<8x256xf32>
    %cst_22 = arith.constant 1.000000e+00 : f32
    %69 = vector.broadcast %cst_22 : f32 to vector<8x256xf32>
    %70 = arith.addf %69, %68 : vector<8x256xf32>
    %71 = arith.divf %69, %70 : vector<8x256xf32>
    %72 = arith.mulf %71, %18 : vector<8x256xf32>
    %73 = arith.addf %72, %21 : vector<8x256xf32>
    %74 = vector.extract_strided_slice %73 {offsets = [0, 0], sizes = [8, 64], strides = [1, 1]} : vector<8x256xf32> to vector<8x64xf32>
    %75 = vector.extract_strided_slice %73 {offsets = [0, 64], sizes = [8, 64], strides = [1, 1]} : vector<8x256xf32> to vector<8x64xf32>
    %76 = vector.extract_strided_slice %73 {offsets = [0, 128], sizes = [8, 64], strides = [1, 1]} : vector<8x256xf32> to vector<8x64xf32>
    %77 = vector.extract_strided_slice %73 {offsets = [0, 192], sizes = [8, 64], strides = [1, 1]} : vector<8x256xf32> to vector<8x64xf32>
    %78 = arith.mulf %75, %22 : vector<8x64xf32>
    %79 = arith.mulf %74, %76 : vector<8x64xf32>
    %80 = arith.addf %78, %79 : vector<8x64xf32>
    %81 = math.tanh %80 : vector<8x64xf32>
    %82 = arith.mulf %77, %81 : vector<8x64xf32>
    %c2_i32 = arith.constant 2 : i32
    %83 = tpu.concatenate %66, %82 in 1 : vector<8x64xf32>, vector<8x64xf32> -> vector<8x128xf32>
    %c0_23 = arith.constant 0 : index
    %c0_24 = arith.constant 0 : index
    %84 = vector.load %arg3[%c0_23, %c0_24] : memref<128x512xf32, #tpu.memory_space<vmem>>, vector<128x512xf32>
    %cst_25 = arith.constant dense<0.000000e+00> : vector<8x512xf32>
    %85 = tpu.matmul %83, %84, %cst_25 {dimension_numbers = #tpu.dot_dimension_numbers<[1], [0], [0], [1], [0, 0, 1, 1], [], []>} : vector<8x128xf32>, vector<128x512xf32>, vector<8x512xf32> -> vector<8x512xf32>
    %c8_i32_26 = arith.constant 8 : i32
    %86 = arith.muli %c2_i32, %c8_i32_26 : i32
    %87 = tpu.assume_multiple %86, 8 : i32
    %88 = vector.extract_strided_slice %85 {offsets = [0, 0], sizes = [8, 256], strides = [1, 1]} : vector<8x512xf32> to vector<8x256xf32>
    %89 = arith.index_cast %87 : i32 to index
    %c0_27 = arith.constant 0 : index
    %90 = vector.load %arg8[%89, %c0_27] : memref<64x256xf32, #tpu.memory_space<vmem>>, vector<8x256xf32>
    %91 = arith.addf %88, %90 : vector<8x256xf32>
    %92 = vector.extract_strided_slice %85 {offsets = [0, 256], sizes = [8, 256], strides = [1, 1]} : vector<8x512xf32> to vector<8x256xf32>
    %93 = arith.addf %92, %9 : vector<8x256xf32>
    %94 = arith.negf %91 : vector<8x256xf32>
    %95 = math.exp %94 : vector<8x256xf32>
    %cst_28 = arith.constant 1.000000e+00 : f32
    %96 = vector.broadcast %cst_28 : f32 to vector<8x256xf32>
    %97 = arith.addf %96, %95 : vector<8x256xf32>
    %98 = arith.divf %96, %97 : vector<8x256xf32>
    %99 = arith.mulf %98, %18 : vector<8x256xf32>
    %100 = arith.addf %99, %21 : vector<8x256xf32>
    %101 = vector.extract_strided_slice %100 {offsets = [0, 0], sizes = [8, 64], strides = [1, 1]} : vector<8x256xf32> to vector<8x64xf32>
    %102 = vector.extract_strided_slice %100 {offsets = [0, 64], sizes = [8, 64], strides = [1, 1]} : vector<8x256xf32> to vector<8x64xf32>
    %103 = vector.extract_strided_slice %100 {offsets = [0, 128], sizes = [8, 64], strides = [1, 1]} : vector<8x256xf32> to vector<8x64xf32>
    %104 = vector.extract_strided_slice %100 {offsets = [0, 192], sizes = [8, 64], strides = [1, 1]} : vector<8x256xf32> to vector<8x64xf32>
    %105 = arith.mulf %102, %64 : vector<8x64xf32>
    %106 = arith.mulf %101, %103 : vector<8x64xf32>
    %107 = arith.addf %105, %106 : vector<8x64xf32>
    %108 = math.tanh %107 : vector<8x64xf32>
    %109 = arith.mulf %104, %108 : vector<8x64xf32>
    %110 = arith.negf %93 : vector<8x256xf32>
    %111 = math.exp %110 : vector<8x256xf32>
    %cst_29 = arith.constant 1.000000e+00 : f32
    %112 = vector.broadcast %cst_29 : f32 to vector<8x256xf32>
    %113 = arith.addf %112, %111 : vector<8x256xf32>
    %114 = arith.divf %112, %113 : vector<8x256xf32>
    %115 = arith.mulf %114, %18 : vector<8x256xf32>
    %116 = arith.addf %115, %21 : vector<8x256xf32>
    %117 = vector.extract_strided_slice %116 {offsets = [0, 0], sizes = [8, 64], strides = [1, 1]} : vector<8x256xf32> to vector<8x64xf32>
    %118 = vector.extract_strided_slice %116 {offsets = [0, 64], sizes = [8, 64], strides = [1, 1]} : vector<8x256xf32> to vector<8x64xf32>
    %119 = vector.extract_strided_slice %116 {offsets = [0, 128], sizes = [8, 64], strides = [1, 1]} : vector<8x256xf32> to vector<8x64xf32>
    %120 = vector.extract_strided_slice %116 {offsets = [0, 192], sizes = [8, 64], strides = [1, 1]} : vector<8x256xf32> to vector<8x64xf32>
    %121 = arith.mulf %118, %80 : vector<8x64xf32>
    %122 = arith.mulf %117, %119 : vector<8x64xf32>
    %123 = arith.addf %121, %122 : vector<8x64xf32>
    %124 = math.tanh %123 : vector<8x64xf32>
    %125 = arith.mulf %120, %124 : vector<8x64xf32>
    %c3_i32 = arith.constant 3 : i32
    %126 = tpu.concatenate %109, %125 in 1 : vector<8x64xf32>, vector<8x64xf32> -> vector<8x128xf32>
    %c0_30 = arith.constant 0 : index
    %c0_31 = arith.constant 0 : index
    %127 = vector.load %arg3[%c0_30, %c0_31] : memref<128x512xf32, #tpu.memory_space<vmem>>, vector<128x512xf32>
    %cst_32 = arith.constant dense<0.000000e+00> : vector<8x512xf32>
    %128 = tpu.matmul %126, %127, %cst_32 {dimension_numbers = #tpu.dot_dimension_numbers<[1], [0], [0], [1], [0, 0, 1, 1], [], []>} : vector<8x128xf32>, vector<128x512xf32>, vector<8x512xf32> -> vector<8x512xf32>
    %c8_i32_33 = arith.constant 8 : i32
    %129 = arith.muli %c3_i32, %c8_i32_33 : i32
    %130 = tpu.assume_multiple %129, 8 : i32
    %131 = vector.extract_strided_slice %128 {offsets = [0, 0], sizes = [8, 256], strides = [1, 1]} : vector<8x512xf32> to vector<8x256xf32>
    %132 = arith.index_cast %130 : i32 to index
    %c0_34 = arith.constant 0 : index
    %133 = vector.load %arg8[%132, %c0_34] : memref<64x256xf32, #tpu.memory_space<vmem>>, vector<8x256xf32>
    %134 = arith.addf %131, %133 : vector<8x256xf32>
    %135 = vector.extract_strided_slice %128 {offsets = [0, 256], sizes = [8, 256], strides = [1, 1]} : vector<8x512xf32> to vector<8x256xf32>
    %136 = arith.addf %135, %9 : vector<8x256xf32>
    %137 = arith.negf %134 : vector<8x256xf32>
    %138 = math.exp %137 : vector<8x256xf32>
    %cst_35 = arith.constant 1.000000e+00 : f32
    %139 = vector.broadcast %cst_35 : f32 to vector<8x256xf32>
    %140 = arith.addf %139, %138 : vector<8x256xf32>
    %141 = arith.divf %139, %140 : vector<8x256xf32>
    %142 = arith.mulf %141, %18 : vector<8x256xf32>
    %143 = arith.addf %142, %21 : vector<8x256xf32>
    %144 = vector.extract_strided_slice %143 {offsets = [0, 0], sizes = [8, 64], strides = [1, 1]} : vector<8x256xf32> to vector<8x64xf32>
    %145 = vector.extract_strided_slice %143 {offsets = [0, 64], sizes = [8, 64], strides = [1, 1]} : vector<8x256xf32> to vector<8x64xf32>
    %146 = vector.extract_strided_slice %143 {offsets = [0, 128], sizes = [8, 64], strides = [1, 1]} : vector<8x256xf32> to vector<8x64xf32>
    %147 = vector.extract_strided_slice %143 {offsets = [0, 192], sizes = [8, 64], strides = [1, 1]} : vector<8x256xf32> to vector<8x64xf32>
    %148 = arith.mulf %145, %107 : vector<8x64xf32>
    %149 = arith.mulf %144, %146 : vector<8x64xf32>
    %150 = arith.addf %148, %149 : vector<8x64xf32>
    %151 = math.tanh %150 : vector<8x64xf32>
    %152 = arith.mulf %147, %151 : vector<8x64xf32>
    %153 = arith.negf %136 : vector<8x256xf32>
    %154 = math.exp %153 : vector<8x256xf32>
    %cst_36 = arith.constant 1.000000e+00 : f32
    %155 = vector.broadcast %cst_36 : f32 to vector<8x256xf32>
    %156 = arith.addf %155, %154 : vector<8x256xf32>
    %157 = arith.divf %155, %156 : vector<8x256xf32>
    %158 = arith.mulf %157, %18 : vector<8x256xf32>
    %159 = arith.addf %158, %21 : vector<8x256xf32>
    %160 = vector.extract_strided_slice %159 {offsets = [0, 0], sizes = [8, 64], strides = [1, 1]} : vector<8x256xf32> to vector<8x64xf32>
    %161 = vector.extract_strided_slice %159 {offsets = [0, 64], sizes = [8, 64], strides = [1, 1]} : vector<8x256xf32> to vector<8x64xf32>
    %162 = vector.extract_strided_slice %159 {offsets = [0, 128], sizes = [8, 64], strides = [1, 1]} : vector<8x256xf32> to vector<8x64xf32>
    %163 = vector.extract_strided_slice %159 {offsets = [0, 192], sizes = [8, 64], strides = [1, 1]} : vector<8x256xf32> to vector<8x64xf32>
    %164 = arith.mulf %161, %123 : vector<8x64xf32>
    %165 = arith.mulf %160, %162 : vector<8x64xf32>
    %166 = arith.addf %164, %165 : vector<8x64xf32>
    %167 = math.tanh %166 : vector<8x64xf32>
    %168 = arith.mulf %163, %167 : vector<8x64xf32>
    %c4_i32 = arith.constant 4 : i32
    %169 = tpu.concatenate %152, %168 in 1 : vector<8x64xf32>, vector<8x64xf32> -> vector<8x128xf32>
    %c0_37 = arith.constant 0 : index
    %c0_38 = arith.constant 0 : index
    %170 = vector.load %arg3[%c0_37, %c0_38] : memref<128x512xf32, #tpu.memory_space<vmem>>, vector<128x512xf32>
    %cst_39 = arith.constant dense<0.000000e+00> : vector<8x512xf32>
    %171 = tpu.matmul %169, %170, %cst_39 {dimension_numbers = #tpu.dot_dimension_numbers<[1], [0], [0], [1], [0, 0, 1, 1], [], []>} : vector<8x128xf32>, vector<128x512xf32>, vector<8x512xf32> -> vector<8x512xf32>
    %c8_i32_40 = arith.constant 8 : i32
    %172 = arith.muli %c4_i32, %c8_i32_40 : i32
    %173 = tpu.assume_multiple %172, 8 : i32
    %174 = vector.extract_strided_slice %171 {offsets = [0, 0], sizes = [8, 256], strides = [1, 1]} : vector<8x512xf32> to vector<8x256xf32>
    %175 = arith.index_cast %173 : i32 to index
    %c0_41 = arith.constant 0 : index
    %176 = vector.load %arg8[%175, %c0_41] : memref<64x256xf32, #tpu.memory_space<vmem>>, vector<8x256xf32>
    %177 = arith.addf %174, %176 : vector<8x256xf32>
    %178 = vector.extract_strided_slice %171 {offsets = [0, 256], sizes = [8, 256], strides = [1, 1]} : vector<8x512xf32> to vector<8x256xf32>
    %179 = arith.addf %178, %9 : vector<8x256xf32>
    %180 = arith.negf %177 : vector<8x256xf32>
    %181 = math.exp %180 : vector<8x256xf32>
    %cst_42 = arith.constant 1.000000e+00 : f32
    %182 = vector.broadcast %cst_42 : f32 to vector<8x256xf32>
    %183 = arith.addf %182, %181 : vector<8x256xf32>
    %184 = arith.divf %182, %183 : vector<8x256xf32>
    %185 = arith.mulf %184, %18 : vector<8x256xf32>
    %186 = arith.addf %185, %21 : vector<8x256xf32>
    %187 = vector.extract_strided_slice %186 {offsets = [0, 0], sizes = [8, 64], strides = [1, 1]} : vector<8x256xf32> to vector<8x64xf32>
    %188 = vector.extract_strided_slice %186 {offsets = [0, 64], sizes = [8, 64], strides = [1, 1]} : vector<8x256xf32> to vector<8x64xf32>
    %189 = vector.extract_strided_slice %186 {offsets = [0, 128], sizes = [8, 64], strides = [1, 1]} : vector<8x256xf32> to vector<8x64xf32>
    %190 = vector.extract_strided_slice %186 {offsets = [0, 192], sizes = [8, 64], strides = [1, 1]} : vector<8x256xf32> to vector<8x64xf32>
    %191 = arith.mulf %188, %150 : vector<8x64xf32>
    %192 = arith.mulf %187, %189 : vector<8x64xf32>
    %193 = arith.addf %191, %192 : vector<8x64xf32>
    %194 = math.tanh %193 : vector<8x64xf32>
    %195 = arith.mulf %190, %194 : vector<8x64xf32>
    %196 = arith.negf %179 : vector<8x256xf32>
    %197 = math.exp %196 : vector<8x256xf32>
    %cst_43 = arith.constant 1.000000e+00 : f32
    %198 = vector.broadcast %cst_43 : f32 to vector<8x256xf32>
    %199 = arith.addf %198, %197 : vector<8x256xf32>
    %200 = arith.divf %198, %199 : vector<8x256xf32>
    %201 = arith.mulf %200, %18 : vector<8x256xf32>
    %202 = arith.addf %201, %21 : vector<8x256xf32>
    %203 = vector.extract_strided_slice %202 {offsets = [0, 0], sizes = [8, 64], strides = [1, 1]} : vector<8x256xf32> to vector<8x64xf32>
    %204 = vector.extract_strided_slice %202 {offsets = [0, 64], sizes = [8, 64], strides = [1, 1]} : vector<8x256xf32> to vector<8x64xf32>
    %205 = vector.extract_strided_slice %202 {offsets = [0, 128], sizes = [8, 64], strides = [1, 1]} : vector<8x256xf32> to vector<8x64xf32>
    %206 = vector.extract_strided_slice %202 {offsets = [0, 192], sizes = [8, 64], strides = [1, 1]} : vector<8x256xf32> to vector<8x64xf32>
    %207 = arith.mulf %204, %166 : vector<8x64xf32>
    %208 = arith.mulf %203, %205 : vector<8x64xf32>
    %209 = arith.addf %207, %208 : vector<8x64xf32>
    %210 = math.tanh %209 : vector<8x64xf32>
    %211 = arith.mulf %206, %210 : vector<8x64xf32>
    %c5_i32 = arith.constant 5 : i32
    %212 = tpu.concatenate %195, %211 in 1 : vector<8x64xf32>, vector<8x64xf32> -> vector<8x128xf32>
    %c0_44 = arith.constant 0 : index
    %c0_45 = arith.constant 0 : index
    %213 = vector.load %arg3[%c0_44, %c0_45] : memref<128x512xf32, #tpu.memory_space<vmem>>, vector<128x512xf32>
    %cst_46 = arith.constant dense<0.000000e+00> : vector<8x512xf32>
    %214 = tpu.matmul %212, %213, %cst_46 {dimension_numbers = #tpu.dot_dimension_numbers<[1], [0], [0], [1], [0, 0, 1, 1], [], []>} : vector<8x128xf32>, vector<128x512xf32>, vector<8x512xf32> -> vector<8x512xf32>
    %c8_i32_47 = arith.constant 8 : i32
    %215 = arith.muli %c5_i32, %c8_i32_47 : i32
    %216 = tpu.assume_multiple %215, 8 : i32
    %217 = vector.extract_strided_slice %214 {offsets = [0, 0], sizes = [8, 256], strides = [1, 1]} : vector<8x512xf32> to vector<8x256xf32>
    %218 = arith.index_cast %216 : i32 to index
    %c0_48 = arith.constant 0 : index
    %219 = vector.load %arg8[%218, %c0_48] : memref<64x256xf32, #tpu.memory_space<vmem>>, vector<8x256xf32>
    %220 = arith.addf %217, %219 : vector<8x256xf32>
    %221 = vector.extract_strided_slice %214 {offsets = [0, 256], sizes = [8, 256], strides = [1, 1]} : vector<8x512xf32> to vector<8x256xf32>
    %222 = arith.addf %221, %9 : vector<8x256xf32>
    %223 = arith.negf %220 : vector<8x256xf32>
    %224 = math.exp %223 : vector<8x256xf32>
    %cst_49 = arith.constant 1.000000e+00 : f32
    %225 = vector.broadcast %cst_49 : f32 to vector<8x256xf32>
    %226 = arith.addf %225, %224 : vector<8x256xf32>
    %227 = arith.divf %225, %226 : vector<8x256xf32>
    %228 = arith.mulf %227, %18 : vector<8x256xf32>
    %229 = arith.addf %228, %21 : vector<8x256xf32>
    %230 = vector.extract_strided_slice %229 {offsets = [0, 0], sizes = [8, 64], strides = [1, 1]} : vector<8x256xf32> to vector<8x64xf32>
    %231 = vector.extract_strided_slice %229 {offsets = [0, 64], sizes = [8, 64], strides = [1, 1]} : vector<8x256xf32> to vector<8x64xf32>
    %232 = vector.extract_strided_slice %229 {offsets = [0, 128], sizes = [8, 64], strides = [1, 1]} : vector<8x256xf32> to vector<8x64xf32>
    %233 = vector.extract_strided_slice %229 {offsets = [0, 192], sizes = [8, 64], strides = [1, 1]} : vector<8x256xf32> to vector<8x64xf32>
    %234 = arith.mulf %231, %193 : vector<8x64xf32>
    %235 = arith.mulf %230, %232 : vector<8x64xf32>
    %236 = arith.addf %234, %235 : vector<8x64xf32>
    %237 = math.tanh %236 : vector<8x64xf32>
    %238 = arith.mulf %233, %237 : vector<8x64xf32>
    %239 = arith.negf %222 : vector<8x256xf32>
    %240 = math.exp %239 : vector<8x256xf32>
    %cst_50 = arith.constant 1.000000e+00 : f32
    %241 = vector.broadcast %cst_50 : f32 to vector<8x256xf32>
    %242 = arith.addf %241, %240 : vector<8x256xf32>
    %243 = arith.divf %241, %242 : vector<8x256xf32>
    %244 = arith.mulf %243, %18 : vector<8x256xf32>
    %245 = arith.addf %244, %21 : vector<8x256xf32>
    %246 = vector.extract_strided_slice %245 {offsets = [0, 0], sizes = [8, 64], strides = [1, 1]} : vector<8x256xf32> to vector<8x64xf32>
    %247 = vector.extract_strided_slice %245 {offsets = [0, 64], sizes = [8, 64], strides = [1, 1]} : vector<8x256xf32> to vector<8x64xf32>
    %248 = vector.extract_strided_slice %245 {offsets = [0, 128], sizes = [8, 64], strides = [1, 1]} : vector<8x256xf32> to vector<8x64xf32>
    %249 = vector.extract_strided_slice %245 {offsets = [0, 192], sizes = [8, 64], strides = [1, 1]} : vector<8x256xf32> to vector<8x64xf32>
    %250 = arith.mulf %247, %209 : vector<8x64xf32>
    %251 = arith.mulf %246, %248 : vector<8x64xf32>
    %252 = arith.addf %250, %251 : vector<8x64xf32>
    %253 = math.tanh %252 : vector<8x64xf32>
    %254 = arith.mulf %249, %253 : vector<8x64xf32>
    %c6_i32 = arith.constant 6 : i32
    %255 = tpu.concatenate %238, %254 in 1 : vector<8x64xf32>, vector<8x64xf32> -> vector<8x128xf32>
    %c0_51 = arith.constant 0 : index
    %c0_52 = arith.constant 0 : index
    %256 = vector.load %arg3[%c0_51, %c0_52] : memref<128x512xf32, #tpu.memory_space<vmem>>, vector<128x512xf32>
    %cst_53 = arith.constant dense<0.000000e+00> : vector<8x512xf32>
    %257 = tpu.matmul %255, %256, %cst_53 {dimension_numbers = #tpu.dot_dimension_numbers<[1], [0], [0], [1], [0, 0, 1, 1], [], []>} : vector<8x128xf32>, vector<128x512xf32>, vector<8x512xf32> -> vector<8x512xf32>
    %c8_i32_54 = arith.constant 8 : i32
    %258 = arith.muli %c6_i32, %c8_i32_54 : i32
    %259 = tpu.assume_multiple %258, 8 : i32
    %260 = vector.extract_strided_slice %257 {offsets = [0, 0], sizes = [8, 256], strides = [1, 1]} : vector<8x512xf32> to vector<8x256xf32>
    %261 = arith.index_cast %259 : i32 to index
    %c0_55 = arith.constant 0 : index
    %262 = vector.load %arg8[%261, %c0_55] : memref<64x256xf32, #tpu.memory_space<vmem>>, vector<8x256xf32>
    %263 = arith.addf %260, %262 : vector<8x256xf32>
    %264 = vector.extract_strided_slice %257 {offsets = [0, 256], sizes = [8, 256], strides = [1, 1]} : vector<8x512xf32> to vector<8x256xf32>
    %265 = arith.addf %264, %9 : vector<8x256xf32>
    %266 = arith.negf %263 : vector<8x256xf32>
    %267 = math.exp %266 : vector<8x256xf32>
    %cst_56 = arith.constant 1.000000e+00 : f32
    %268 = vector.broadcast %cst_56 : f32 to vector<8x256xf32>
    %269 = arith.addf %268, %267 : vector<8x256xf32>
    %270 = arith.divf %268, %269 : vector<8x256xf32>
    %271 = arith.mulf %270, %18 : vector<8x256xf32>
    %272 = arith.addf %271, %21 : vector<8x256xf32>
    %273 = vector.extract_strided_slice %272 {offsets = [0, 0], sizes = [8, 64], strides = [1, 1]} : vector<8x256xf32> to vector<8x64xf32>
    %274 = vector.extract_strided_slice %272 {offsets = [0, 64], sizes = [8, 64], strides = [1, 1]} : vector<8x256xf32> to vector<8x64xf32>
    %275 = vector.extract_strided_slice %272 {offsets = [0, 128], sizes = [8, 64], strides = [1, 1]} : vector<8x256xf32> to vector<8x64xf32>
    %276 = vector.extract_strided_slice %272 {offsets = [0, 192], sizes = [8, 64], strides = [1, 1]} : vector<8x256xf32> to vector<8x64xf32>
    %277 = arith.mulf %274, %236 : vector<8x64xf32>
    %278 = arith.mulf %273, %275 : vector<8x64xf32>
    %279 = arith.addf %277, %278 : vector<8x64xf32>
    %280 = math.tanh %279 : vector<8x64xf32>
    %281 = arith.mulf %276, %280 : vector<8x64xf32>
    %282 = arith.negf %265 : vector<8x256xf32>
    %283 = math.exp %282 : vector<8x256xf32>
    %cst_57 = arith.constant 1.000000e+00 : f32
    %284 = vector.broadcast %cst_57 : f32 to vector<8x256xf32>
    %285 = arith.addf %284, %283 : vector<8x256xf32>
    %286 = arith.divf %284, %285 : vector<8x256xf32>
    %287 = arith.mulf %286, %18 : vector<8x256xf32>
    %288 = arith.addf %287, %21 : vector<8x256xf32>
    %289 = vector.extract_strided_slice %288 {offsets = [0, 0], sizes = [8, 64], strides = [1, 1]} : vector<8x256xf32> to vector<8x64xf32>
    %290 = vector.extract_strided_slice %288 {offsets = [0, 64], sizes = [8, 64], strides = [1, 1]} : vector<8x256xf32> to vector<8x64xf32>
    %291 = vector.extract_strided_slice %288 {offsets = [0, 128], sizes = [8, 64], strides = [1, 1]} : vector<8x256xf32> to vector<8x64xf32>
    %292 = vector.extract_strided_slice %288 {offsets = [0, 192], sizes = [8, 64], strides = [1, 1]} : vector<8x256xf32> to vector<8x64xf32>
    %293 = arith.mulf %290, %252 : vector<8x64xf32>
    %294 = arith.mulf %289, %291 : vector<8x64xf32>
    %295 = arith.addf %293, %294 : vector<8x64xf32>
    %296 = math.tanh %295 : vector<8x64xf32>
    %297 = arith.mulf %292, %296 : vector<8x64xf32>
    %c7_i32 = arith.constant 7 : i32
    %298 = tpu.concatenate %281, %297 in 1 : vector<8x64xf32>, vector<8x64xf32> -> vector<8x128xf32>
    %c0_58 = arith.constant 0 : index
    %c0_59 = arith.constant 0 : index
    %299 = vector.load %arg3[%c0_58, %c0_59] : memref<128x512xf32, #tpu.memory_space<vmem>>, vector<128x512xf32>
    %cst_60 = arith.constant dense<0.000000e+00> : vector<8x512xf32>
    %300 = tpu.matmul %298, %299, %cst_60 {dimension_numbers = #tpu.dot_dimension_numbers<[1], [0], [0], [1], [0, 0, 1, 1], [], []>} : vector<8x128xf32>, vector<128x512xf32>, vector<8x512xf32> -> vector<8x512xf32>
    %c8_i32_61 = arith.constant 8 : i32
    %301 = arith.muli %c7_i32, %c8_i32_61 : i32
    %302 = tpu.assume_multiple %301, 8 : i32
    %303 = vector.extract_strided_slice %300 {offsets = [0, 0], sizes = [8, 256], strides = [1, 1]} : vector<8x512xf32> to vector<8x256xf32>
    %304 = arith.index_cast %302 : i32 to index
    %c0_62 = arith.constant 0 : index
    %305 = vector.load %arg8[%304, %c0_62] : memref<64x256xf32, #tpu.memory_space<vmem>>, vector<8x256xf32>
    %306 = arith.addf %303, %305 : vector<8x256xf32>
    %307 = vector.extract_strided_slice %300 {offsets = [0, 256], sizes = [8, 256], strides = [1, 1]} : vector<8x512xf32> to vector<8x256xf32>
    %308 = arith.addf %307, %9 : vector<8x256xf32>
    %309 = arith.negf %306 : vector<8x256xf32>
    %310 = math.exp %309 : vector<8x256xf32>
    %cst_63 = arith.constant 1.000000e+00 : f32
    %311 = vector.broadcast %cst_63 : f32 to vector<8x256xf32>
    %312 = arith.addf %311, %310 : vector<8x256xf32>
    %313 = arith.divf %311, %312 : vector<8x256xf32>
    %314 = arith.mulf %313, %18 : vector<8x256xf32>
    %315 = arith.addf %314, %21 : vector<8x256xf32>
    %316 = vector.extract_strided_slice %315 {offsets = [0, 0], sizes = [8, 64], strides = [1, 1]} : vector<8x256xf32> to vector<8x64xf32>
    %317 = vector.extract_strided_slice %315 {offsets = [0, 64], sizes = [8, 64], strides = [1, 1]} : vector<8x256xf32> to vector<8x64xf32>
    %318 = vector.extract_strided_slice %315 {offsets = [0, 128], sizes = [8, 64], strides = [1, 1]} : vector<8x256xf32> to vector<8x64xf32>
    %319 = vector.extract_strided_slice %315 {offsets = [0, 192], sizes = [8, 64], strides = [1, 1]} : vector<8x256xf32> to vector<8x64xf32>
    %320 = arith.mulf %317, %279 : vector<8x64xf32>
    %321 = arith.mulf %316, %318 : vector<8x64xf32>
    %322 = arith.addf %320, %321 : vector<8x64xf32>
    %323 = math.tanh %322 : vector<8x64xf32>
    %324 = arith.mulf %319, %323 : vector<8x64xf32>
    %325 = arith.negf %308 : vector<8x256xf32>
    %326 = math.exp %325 : vector<8x256xf32>
    %cst_64 = arith.constant 1.000000e+00 : f32
    %327 = vector.broadcast %cst_64 : f32 to vector<8x256xf32>
    %328 = arith.addf %327, %326 : vector<8x256xf32>
    %329 = arith.divf %327, %328 : vector<8x256xf32>
    %330 = arith.mulf %329, %18 : vector<8x256xf32>
    %331 = arith.addf %330, %21 : vector<8x256xf32>
    %332 = vector.extract_strided_slice %331 {offsets = [0, 0], sizes = [8, 64], strides = [1, 1]} : vector<8x256xf32> to vector<8x64xf32>
    %333 = vector.extract_strided_slice %331 {offsets = [0, 64], sizes = [8, 64], strides = [1, 1]} : vector<8x256xf32> to vector<8x64xf32>
    %334 = vector.extract_strided_slice %331 {offsets = [0, 128], sizes = [8, 64], strides = [1, 1]} : vector<8x256xf32> to vector<8x64xf32>
    %335 = vector.extract_strided_slice %331 {offsets = [0, 192], sizes = [8, 64], strides = [1, 1]} : vector<8x256xf32> to vector<8x64xf32>
    %336 = arith.mulf %333, %295 : vector<8x64xf32>
    %337 = arith.mulf %332, %334 : vector<8x64xf32>
    %338 = arith.addf %336, %337 : vector<8x64xf32>
    %339 = math.tanh %338 : vector<8x64xf32>
    %340 = arith.mulf %335, %339 : vector<8x64xf32>
    %c7_i32_65 = arith.constant 7 : i32
    %341 = tpu.concatenate %324, %340 in 1 : vector<8x64xf32>, vector<8x64xf32> -> vector<8x128xf32>
    %c0_66 = arith.constant 0 : index
    %c0_67 = arith.constant 0 : index
    %342 = vector.load %arg3[%c0_66, %c0_67] : memref<128x512xf32, #tpu.memory_space<vmem>>, vector<128x512xf32>
    %cst_68 = arith.constant dense<0.000000e+00> : vector<8x512xf32>
    %343 = tpu.matmul %341, %342, %cst_68 {dimension_numbers = #tpu.dot_dimension_numbers<[1], [0], [0], [1], [0, 0, 1, 1], [], []>} : vector<8x128xf32>, vector<128x512xf32>, vector<8x512xf32> -> vector<8x512xf32>
    %344 = vector.extract_strided_slice %343 {offsets = [0, 256], sizes = [8, 256], strides = [1, 1]} : vector<8x512xf32> to vector<8x256xf32>
    %345 = arith.addf %344, %9 : vector<8x256xf32>
    %346 = arith.negf %345 : vector<8x256xf32>
    %347 = math.exp %346 : vector<8x256xf32>
    %cst_69 = arith.constant 1.000000e+00 : f32
    %348 = vector.broadcast %cst_69 : f32 to vector<8x256xf32>
    %349 = arith.addf %348, %347 : vector<8x256xf32>
    %350 = arith.divf %348, %349 : vector<8x256xf32>
    %351 = arith.mulf %350, %18 : vector<8x256xf32>
    %352 = arith.addf %351, %21 : vector<8x256xf32>
    %353 = vector.extract_strided_slice %352 {offsets = [0, 0], sizes = [8, 64], strides = [1, 1]} : vector<8x256xf32> to vector<8x64xf32>
    %354 = vector.extract_strided_slice %352 {offsets = [0, 64], sizes = [8, 64], strides = [1, 1]} : vector<8x256xf32> to vector<8x64xf32>
    %355 = vector.extract_strided_slice %352 {offsets = [0, 128], sizes = [8, 64], strides = [1, 1]} : vector<8x256xf32> to vector<8x64xf32>
    %356 = vector.extract_strided_slice %352 {offsets = [0, 192], sizes = [8, 64], strides = [1, 1]} : vector<8x256xf32> to vector<8x64xf32>
    %357 = arith.mulf %354, %338 : vector<8x64xf32>
    %358 = arith.mulf %353, %355 : vector<8x64xf32>
    %359 = arith.addf %357, %358 : vector<8x64xf32>
    %360 = math.tanh %359 : vector<8x64xf32>
    %361 = arith.mulf %356, %360 : vector<8x64xf32>
    %c0_70 = arith.constant 0 : index
    %c0_71 = arith.constant 0 : index
    %362 = vector.load %arg5[%c0_70, %c0_71] : memref<1x64xf32, #tpu.memory_space<vmem>>, vector<1x64xf32>
    %363 = vector.broadcast %362 : vector<1x64xf32> to vector<8x64xf32>
    %364 = arith.mulf %361, %363 : vector<8x64xf32>
    %cst_72 = arith.constant dense<0.000000e+00> : vector<8xf32>
    %365 = vector.multi_reduction <add>, %364, %cst_72 [1] : vector<8x64xf32> to vector<8xf32>
    %366 = vector.shape_cast %365 : vector<8xf32> to vector<8x1xf32>
    %c0_73 = arith.constant 0 : index
    %c0_74 = arith.constant 0 : index
    %367 = vector.load %arg6[%c0_73, %c0_74] : memref<1x1xf32, #tpu.memory_space<vmem>>, vector<1x1xf32>
    %368 = vector.broadcast %367 : vector<1x1xf32> to vector<8x1xf32>
    %369 = arith.addf %366, %368 : vector<8x1xf32>
    %c0_75 = arith.constant 0 : index
    %c0_76 = arith.constant 0 : index
    %370 = vector.load %arg7[%c0_75, %c0_76] : memref<8x1xf32, #tpu.memory_space<vmem>>, vector<8x1xf32>
    tpu.vector_store %arg7[%c0_75, %c0_76], %369 {strides = array<i32>} : memref<8x1xf32, #tpu.memory_space<vmem>>, vector<8x1xf32>,
    return
  }
}

</mosaic_0001>

<bundles_post_ra>
// kernel: tpu_custom_call.1
= control target key start
LH: loop header
LB: loop body
LE: loop exit
PB: predicated region body
PF: predicated region fallthrough
CT: control target
= control target key end

     0   :  { %s3313_s0 = inlined_call_operand.hbm [shape: f32[64,64], index: 0, kind: input, shape index: {}]   ;;  %s3314_s1 = inlined_call_operand.hbm [shape: f32[64,256], index: 1, kind: input, shape index: {}]   ;;  %s3315_s2 = inlined_call_operand.vmem [shape: f32[1,256], index: 2, kind: input, shape index: {}]   ;;  %s3316_s3 = inlined_call_operand.hbm [shape: f32[128,512], index: 3, kind: input, shape index: {}]   ;;  %s3317_s4 = inlined_call_operand.vmem [shape: f32[1,256], index: 4, kind: input, shape index: {}]   ;;  %s3318_s5 = inlined_call_operand.vmem [shape: f32[1,64], index: 5, kind: input, shape index: {}]   ;;  %s3319_s6 = inlined_call_operand.<no memory space> [shape: f32[1,1], index: 6, kind: input, shape index: {}]   ;;  %s3320_s7 = inlined_call_operand.vmem [shape: f32[8,1], index: 7, kind: output, shape index: {}]  }
   0x1   :  { %v12_v0 = vstv %s3319_s6 }
   0x2   :  { %13 = vst [vmem:[#allocation3] sm:$0x1] %v12_v0 }
   0x3   :  { %14 = vsyncpa [#allocation5], 0 }
   0x4   :  { %15 = vsyncpa [#allocation7], 0  ;;  %s33_s28 = sshll.u32 %s3314_s1, 4  ;;  %s2234_s29 = smov [#allocation6]   ;;  %s34_s28 = int_to_ptr.hbm [resolvable:$true] %s33_s28 }
   0x5   :  { %s35_s30 = sshll.u32 %s2234_s29, 4  ;;  %s20_s10 = sshll.u32 %s3313_s0, 4  ;;  %s36_s30 = int_to_ptr.vmem [resolvable:$true] %s35_s30  ;;  %s21_s10 = int_to_ptr.hbm [resolvable:$true] %s20_s10 }
   0x6   :  { %s2235_s11 = smov 256   ;;  %s2236_s12 = smov 16  }
   0x7   :  { %41 = dma.hbm_to_vmem [thread:$0]  %s34_s28, 2048, %s36_s30, [#allocation7], %s2235_s11, %s2235_s11, %s2236_s12  }
   0x8   :  { %s2237_s6 = smov [#allocation4]   ;;  %s2238_s14 = smov 128  }
   0x9   :  { %s22_s13 = sshll.u32 %s2237_s6, 4  ;;  %s2239_s15 = smov 8   ;;  %s23_s13 = int_to_ptr.vmem [resolvable:$true] %s22_s13 }
   0xa   :  { %28 = dma.hbm_to_vmem [thread:$0]  %s21_s10, 1024, %s23_s13, [#allocation5], %s2238_s14, %s2238_s14, %s2239_s15  }
   0xb   :  { %s48_s17 = sshll.u32 %s3316_s3, 4  ;;  %s2240_s18 = smov [#allocation8]   ;;  %s49_s17 = int_to_ptr.hbm [resolvable:$true] %s48_s17 }
   0xc   :  { %s50_s19 = sshll.u32 %s2240_s18, 4  ;;  %s2241_s20 = smov 512   ;;  %s51_s19 = int_to_ptr.vmem [resolvable:$true] %s50_s19 }
   0xd   :  { %s2242_s0 = smov 32  }
   0xe   :  { %56 = dma.hbm_to_vmem [thread:$0]  %s49_s17, 8192, %s51_s19, [#allocation7], %s2241_s20, %s2241_s20, %s2242_s0  }
   0xf   :  { %2230 = dma.done.wait [#allocation5], 1024  }
  0x10   :  { %2231 = vsyncadd [#allocation5], 4294966272 }
  0x11   :  { %2232 = dma.done.wait [#allocation7], 10240  }
  0x12   :  { %2233 = vsyncadd [#allocation7], 4294957056  ;;  %v97_v1 = vld [vmem:[#allocation6 + $0x70] sm:$0xff]  ;;  %v98_v2 = vld [vmem:[#allocation6 + $0x78] sm:$0xff]  ;;  %vm105_vm0 = vcmask 523264   ;;  %v234_v31 = vlaneseq  ;;  %v2243_v46 = vmov 1.0  }
  0x13   :  { %v95_v3 = vld [vmem:[#allocation6 + $0x60] sm:$0xff]  ;;  %138 = vmatpush.msra.mxu0 %v97_v1  ;;  %179 = vmatpush.msra.mxu1 %v98_v2  ;;  %v96_v4 = vld [vmem:[#allocation6 + $0x68] sm:$0xff]  ;;  %v93_v5 = vld [vmem:[#allocation6 + $0x50] sm:$0xff]  ;;  %v2244_v52 = vmov 0.0  }
  0x14   :  { %v94_v6 = vld [vmem:[#allocation6 + $0x58] sm:$0xff]  ;;  %v91_v7 = vld [vmem:[#allocation6 + $0x40] sm:$0xff]  ;;  %v92_v8 = vld [vmem:[#allocation6 + $0x48] sm:$0xff]  ;;  %v235_v32 = vand.u32 127, %v234_v31 }
  0x15   :  { %139 = vmatpush.msra.mxu0 %v95_v3  ;;  %180 = vmatpush.msra.mxu1 %v96_v4  ;;  %v89_v9 = vld [vmem:[#allocation6 + $0x30] sm:$0xff]  ;;  %v90_v10 = vld [vmem:[#allocation6 + $0x38] sm:$0xff]  ;;  %v87_v11 = vld [vmem:[#allocation6 + $0x20] sm:$0xff] }
  0x16   :  { %v88_v12 = vld [vmem:[#allocation6 + $0x28] sm:$0xff]  ;;  %v85_v13 = vld [vmem:[#allocation6 + $0x10] sm:$0xff]  ;;  %v86_v14 = vld [vmem:[#allocation6 + $0x18] sm:$0xff]  ;;  %v236_v37 = vadd.s32 128, %v235_v32 }
  0x17   :  { %140 = vmatpush.msra.mxu0 %v93_v5  ;;  %181 = vmatpush.msra.mxu1 %v94_v6  ;;  %v83_v15 = vld [vmem:[#allocation6] sm:$0xff]  ;;  %v84_v16 = vld [vmem:[#allocation6 + $0x8] sm:$0xff] }
  0x18   :  { %v75_v17 = vld [vmem:[#allocation4] sm:$0xff]  ;;  %vm240_vm1 = vcmp.lt.s32.totalorder %v236_v37, 192  ;;  %v2323_v62 = vld [vmem:[#allocation8 + $0x1e8] sm:$0xff]  ;;  %v2449_v37 = vld [vmem:[#allocation8 + $0x1f8] sm:$0xff] }
  0x19   :  { %141 = vmatpush.msra.mxu0 %v91_v7  ;;  %182 = vmatpush.msra.mxu1 %v92_v8  ;;  %v99_v18 = vld [vmem:[%s3315_s2] sm:$0x3]  ;;  %v2310_v47 = vsel %vm240_vm1, 2.0, %v2243_v46  ;;  %v2313_v53 = vsel %vm240_vm1, -1.0, %v2244_v52  ;;  %s2245_s2 = smov 64   ;;  %v2329_v0 = vld [vmem:[#allocation8 + $0x1c8] sm:$0xff] }
  0x1a   :  { %v2303_v19 = vperm.slane %v99_v18, 0  ;;  %v2305_v20 = vperm.slane %v99_v18, 1  ;;  %v2321_v61 = vld [vmem:[#allocation8 + $0x1e0] sm:$0xff]  ;;  %389 = vmatpush.msra.mxu3 %v2323_v62  ;;  %v2333_v2 = vld [vmem:[#allocation8 + $0x1a8] sm:$0xff]  ;;  %v2486_v46 = vld [vmem:[#allocation8 + $0x150] sm:$0xff] }
  0x1b   :  { %142 = vmatpush.msra.mxu0 %v89_v9  ;;  %183 = vmatpush.msra.mxu1 %v90_v10  ;;  %v2325_v63 = vld [vmem:[#allocation8 + $0x1c0] sm:$0xff]  ;;  %v2341_v4 = vld [vmem:[#allocation8 + $0x188] sm:$0xff]  ;;  %v2506_v52 = vld [vmem:[#allocation8 + $0x118] sm:$0xff] }
  0x1c   :  { %3423 = vst [vmem:[#allocation11_spill] sm:$0xff] %v2303_v19  ;;  %369 = vmatpush.msra.mxu2 %v2321_v61  ;;  %v2331_v1 = vld [vmem:[#allocation8 + $0x1a0] sm:$0xff]  ;;  %390 = vmatpush.msra.mxu3 %v2329_v0  ;;  %v2349_v6 = vld [vmem:[#allocation8 + $0x168] sm:$0xff] }
  0x1d   :  { %143 = vmatpush.msra.mxu0 %v87_v11  ;;  %184 = vmatpush.msra.mxu1 %v88_v12  ;;  %3424 = vst [vmem:[#allocation12_spill] sm:$0xff] %v2305_v20  ;;  %v2339_v3 = vld [vmem:[#allocation8 + $0x180] sm:$0xff]  ;;  %v2357_v8 = vld [vmem:[#allocation8 + $0x148] sm:$0xff] }
  0x1e   :  { %370 = vmatpush.msra.mxu2 %v2325_v63  ;;  %391 = vmatpush.msra.mxu3 %v2333_v2  ;;  %v2347_v5 = vld [vmem:[#allocation8 + $0x160] sm:$0xff]  ;;  %v2365_v10 = vld [vmem:[#allocation8 + $0x128] sm:$0xff] }
  0x1f   :  { %144 = vmatpush.msra.mxu0 %v85_v13  ;;  %185 = vmatpush.msra.mxu1 %v86_v14  ;;  %v2355_v7 = vld [vmem:[#allocation8 + $0x140] sm:$0xff]  ;;  %v2373_v12 = vld [vmem:[#allocation8 + $0x108] sm:$0xff] }
  0x20   :  { %371 = vmatpush.msra.mxu2 %v2331_v1  ;;  %392 = vmatpush.msra.mxu3 %v2341_v4  ;;  %v2363_v9 = vld [vmem:[#allocation8 + $0x120] sm:$0xff]  ;;  %v2381_v14 = vld [vmem:[#allocation8 + $0xe8] sm:$0xff] }
  0x21   :  { %145 = vmatpush.msra.mxu0 %v83_v15  ;;  %186 = vmatpush.msra.mxu1 %v84_v16  ;;  %v2371_v11 = vld [vmem:[#allocation8 + $0x100] sm:$0xff]  ;;  %v2389_v16 = vld [vmem:[#allocation8 + $0xc8] sm:$0xff] }
  0x22   :  { %1868 = vmatmul.msk.f32.vlgmr.msra.gmra.mxu0 %vm105_vm0, %v75_v17  ;;  %1876 = vmatmul.msk.f32.vlgmr.msra.gmra.mxu1 %vm105_vm0, %v75_v17  ;;  %v2379_v13 = vld [vmem:[#allocation8 + $0xe0] sm:$0xff]  ;;  %3426 = vst [vmem:[#allocation14_spill] sm:$0xff] %v2389_v16  ;;  %v2397_v18 = vld [vmem:[#allocation8 + $0xa8] sm:$0xff] }
  0x23   :  { %585 = vmatpush.msrb.mxu1 %v2323_v62  ;;  %565 = vmatpush.msrb.mxu0 %v2321_v61  ;;  %v2387_v15 = vld [vmem:[#allocation8 + $0xc0] sm:$0xff]  ;;  %3428 = vst [vmem:[#allocation16_spill] sm:$0xff] %v2397_v18  ;;  %v2432_v31 = vld [vmem:[#allocation8 + $0x28] sm:$0xff] }
  0x24   :  { %372 = vmatpush.msra.mxu2 %v2339_v3  ;;  %393 = vmatpush.msra.mxu3 %v2349_v6  ;;  %3425 = vst [vmem:[#allocation13_spill] sm:$0xff] %v2387_v15  ;;  %v2395_v17 = vld [vmem:[#allocation8 + $0xa0] sm:$0xff] }
  0x25   :  { %586 = vmatpush.msrb.mxu1 %v2329_v0  ;;  %566 = vmatpush.msrb.mxu0 %v2325_v63  ;;  %3427 = vst [vmem:[#allocation15_spill] sm:$0xff] %v2395_v17  ;;  %v2438_v32 = vld [vmem:[#allocation8] sm:$0xff] }
  0x26   :  { %373 = vmatpush.msra.mxu2 %v2347_v5  ;;  %394 = vmatpush.msra.mxu3 %v2357_v8  ;;  %3436 = vst [vmem:[#allocation24_spill] sm:$0xff] %v2432_v31 }
  0x27   :  { %587 = vmatpush.msrb.mxu1 %v2333_v2  ;;  %567 = vmatpush.msrb.mxu0 %v2331_v1  ;;  %3437 = vst [vmem:[#allocation25_spill] sm:$0xff] %v2438_v32 }
  0x28   :  { %374 = vmatpush.msra.mxu2 %v2355_v7  ;;  %395 = vmatpush.msra.mxu3 %v2365_v10 }
  0x29   :  { %588 = vmatpush.msrb.mxu1 %v2341_v4  ;;  %568 = vmatpush.msrb.mxu0 %v2339_v3 }
  0x2a   :  { %375 = vmatpush.msra.mxu2 %v2363_v9  ;;  %396 = vmatpush.msra.mxu3 %v2373_v12 }
  0x2b   :  { %589 = vmatpush.msrb.mxu1 %v2349_v6  ;;  %569 = vmatpush.msrb.mxu0 %v2347_v5 }
  0x2c   :  { %376 = vmatpush.msra.mxu2 %v2371_v11  ;;  %397 = vmatpush.msra.mxu3 %v2381_v14 }
  0x2d   :  { %590 = vmatpush.msrb.mxu1 %v2357_v8  ;;  %570 = vmatpush.msrb.mxu0 %v2355_v7 }
  0x2e   :  { %377 = vmatpush.msra.mxu2 %v2379_v13  ;;  %398 = vmatpush.msra.mxu3 %v2389_v16 }
  0x2f   :  { %591 = vmatpush.msrb.mxu1 %v2365_v10  ;;  %571 = vmatpush.msrb.mxu0 %v2363_v9 }
  0x30   :  { %378 = vmatpush.msra.mxu2 %v2387_v15  ;;  %399 = vmatpush.msra.mxu3 %v2397_v18 }
  0x31   :  { %592 = vmatpush.msrb.mxu1 %v2373_v12  ;;  %572 = vmatpush.msrb.mxu0 %v2371_v11 }
  0x32   :  { %379 = vmatpush.msra.mxu2 %v2395_v17 }
  0x33   :  { %593 = vmatpush.msrb.mxu1 %v2381_v14  ;;  %573 = vmatpush.msrb.mxu0 %v2379_v13 }
  0x35   :  { %594 = vmatpush.msrb.mxu1 %v2389_v16  ;;  %574 = vmatpush.msrb.mxu0 %v2387_v15 }
  0x37   :  { %595 = vmatpush.msrb.mxu1 %v2397_v18  ;;  %575 = vmatpush.msrb.mxu0 %v2395_v17 }
  0x9f   :  { %v147_v21 = vpop.f32.mrf.mxu0  ;;  %v188_v22 = vpop.f32.mrf.mxu1 }
  0xa0   :  { %v148_v23 = vadd.f32 %v147_v21, %v2303_v19  ;;  %v189_v24 = vadd.f32 %v188_v22, %v2305_v20 }
  0xa2   :  { %v1884_v25 = vmul.f32 -1.442695, %v148_v23  ;;  %v1885_v26 = vmul.f32 -1.442695, %v189_v24  ;;  %v2403_v23 = vld [vmem:[#allocation8 + $0x80] sm:$0xff]  ;;  %v2405_v24 = vld [vmem:[#allocation8 + $0x88] sm:$0xff] }
  0xa3   :  { %3429 = vst [vmem:[#allocation17_spill] sm:$0xff] %v2403_v23  ;;  %380 = vmatpush.msra.mxu2 %v2403_v23  ;;  %400 = vmatpush.msra.mxu3 %v2405_v24 }
  0xa4   :  { %1934 = vpow2.f32 %v1884_v25  ;;  %3430 = vst [vmem:[#allocation18_spill] sm:$0xff] %v2405_v24  ;;  %596 = vmatpush.msrb.mxu1 %v2405_v24  ;;  %576 = vmatpush.msrb.mxu0 %v2403_v23 }
  0xa5   :  { %1936 = vpow2.f32 %v1885_v26  ;;  %v2413_v26 = vld [vmem:[#allocation8 + $0x60] sm:$0xff] }
  0xa6   :  { %3431 = vst [vmem:[#allocation19_spill] sm:$0xff] %v2413_v26  ;;  %381 = vmatpush.msra.mxu2 %v2413_v26  ;;  %577 = vmatpush.msrb.mxu0 %v2413_v26 }
  0xaa   :  { %v1935_v27 = vpop.eup %1934 }
  0xab   :  { %v1937_v28 = vpop.eup %1936  ;;  %v255_v29 = vadd.f32 1.0, %v1935_v27  ;;  %v2415_v27 = vld [vmem:[#allocation8 + $0x68] sm:$0xff] }
  0xac   :  { %v256_v30 = vadd.f32 1.0, %v1937_v28  ;;  %3432 = vst [vmem:[#allocation20_spill] sm:$0xff] %v2415_v27  ;;  %v2422_v28 = vld [vmem:[#allocation8 + $0x40] sm:$0xff]  ;;  %401 = vmatpush.msra.mxu3 %v2415_v27  ;;  %597 = vmatpush.msrb.mxu1 %v2415_v27 }
  0xad   :  { %1938 = vrcp.f32 %v255_v29  ;;  %v268_v48 = vand.u32 2147483648, %v255_v29  ;;  %vm262_vm6 = vweird.f32 %v255_v29  ;;  %v266_v50 = vand.u32 2147483647, %v255_v29  ;;  %3433 = vst [vmem:[#allocation21_spill] sm:$0xff] %v2422_v28  ;;  %382 = vmatpush.msra.mxu2 %v2422_v28  ;;  %578 = vmatpush.msrb.mxu0 %v2422_v28 }
  0xae   :  { %1940 = vrcp.f32 %v256_v30  ;;  %v283_v41 = vand.u32 2147483648, %v256_v30  ;;  %v281_v43 = vand.u32 2147483647, %v256_v30  ;;  %vm277_vm4 = vweird.f32 %v256_v30 }
  0xaf   :  { %v269_v57 = vor.u32 1.1754944e-38, %v268_v48  ;;  %vm267_vm9 = vcmp.eq.f32.partialorder %v266_v50, 8.507059e+37  ;;  %v2490_v48 = vld [vmem:[#allocation8 + $0x158] sm:$0xff] }
  0xb0   :  { %v284_v49 = vor.u32 1.1754944e-38, %v283_v41  ;;  %vm282_vm7 = vcmp.eq.f32.partialorder %v281_v43, 8.507059e+37  ;;  %v2466_v41 = vld [vmem:[#allocation8 + $0x1b8] sm:$0xff] }
  0xb1   :  { %v2474_v43 = vld [vmem:[#allocation8 + $0x198] sm:$0xff] }
  0xb2   :  { %v2498_v50 = vld [vmem:[#allocation8 + $0x138] sm:$0xff] }
  0xb3   :  { %v1939_v33 = vpop.eup %1938 }
  0xb4   :  { %v1941_v34 = vpop.eup %1940  ;;  %v258_v35 = vmul.f32 %v1939_v33, %v255_v29  ;;  %vm263_vm3 = vweird.f32 %v1939_v33  ;;  %v2424_v29 = vld [vmem:[#allocation8 + $0x48] sm:$0xff] }
  0xb5   :  { %v273_v36 = vmul.f32 %v1941_v34, %v256_v30  ;;  %vm278_vm2 = vweird.f32 %v1941_v34  ;;  %vm264_vm8 = vmor %vm262_vm6, %vm263_vm3  ;;  %3434 = vst [vmem:[#allocation22_spill] sm:$0xff] %v2424_v29  ;;  %v2430_v30 = vld [vmem:[#allocation8 + $0x20] sm:$0xff]  ;;  %402 = vmatpush.msra.mxu3 %v2424_v29  ;;  %598 = vmatpush.msrb.mxu1 %v2424_v29 }
  0xb6   :  { %v259_v38 = vsub.f32 1.0, %v258_v35  ;;  %vm279_vm5 = vmor %vm277_vm4, %vm278_vm2  ;;  %3435 = vst [vmem:[#allocation23_spill] sm:$0xff] %v2430_v30  ;;  %383 = vmatpush.msra.mxu2 %v2430_v30  ;;  %v2446_v35 = vld [vmem:[#allocation8 + $0x1f0] sm:$0xff]  ;;  %579 = vmatpush.msrb.mxu0 %v2430_v30 }
  0xb7   :  { %v274_v39 = vsub.f32 1.0, %v273_v36  ;;  %403 = vmatpush.msra.mxu3 %v2432_v31  ;;  %599 = vmatpush.msrb.mxu1 %v2432_v31 }
  0xb8   :  { %v260_v40 = vmul.f32 %v1939_v33, %v259_v38  ;;  %384 = vmatpush.msra.mxu2 %v2438_v32  ;;  %v2455_v38 = vld [vmem:[#allocation8 + $0x1d0] sm:$0xff]  ;;  %580 = vmatpush.msrb.mxu0 %v2438_v32 }
  0xb9   :  { %v275_v42 = vmul.f32 %v1941_v34, %v274_v39  ;;  %v2459_v39 = vld [vmem:[#allocation8 + $0x1d8] sm:$0xff] }
  0xba   :  { %v261_v44 = vadd.f32 %v1939_v33, %v260_v40  ;;  %409 = vmatpush.msrb.mxu2 %v2446_v35  ;;  %v2462_v40 = vld [vmem:[#allocation8 + $0x1b0] sm:$0xff]  ;;  %761 = vmatpush.msra.mxu0 %v2321_v61 }
  0xbb   :  { %v276_v45 = vadd.f32 %v1941_v34, %v275_v42  ;;  %v2470_v42 = vld [vmem:[#allocation8 + $0x190] sm:$0xff] }
  0xbc   :  { %v265_v55 = vsel %vm264_vm8, %v1939_v33, %v261_v44  ;;  %v2440_v33 = vld [vmem:[#allocation8 + $0x8] sm:$0xff]  ;;  %410 = vmatpush.msrb.mxu2 %v2455_v38  ;;  %v2478_v44 = vld [vmem:[#allocation8 + $0x170] sm:$0xff]  ;;  %762 = vmatpush.msra.mxu0 %v2325_v63 }
  0xbd   :  { %v280_v51 = vsel %vm279_vm5, %v1941_v34, %v276_v45  ;;  %v270_v59 = vsel %vm267_vm9, %v269_v57, %v265_v55  ;;  %3438 = vst [vmem:[#allocation26_spill] sm:$0xff] %v2440_v33  ;;  %404 = vmatpush.msra.mxu3 %v2440_v33  ;;  %600 = vmatpush.msrb.mxu1 %v2440_v33  ;;  %v2482_v45 = vld [vmem:[#allocation8 + $0x178] sm:$0xff] }
  0xbe   :  { %v285_v54 = vsel %vm282_vm7, %v284_v49, %v280_v51  ;;  %v291_v21 = vmul.f32 0.0, %v270_v59  ;;  %411 = vmatpush.msrb.mxu2 %v2462_v40  ;;  %763 = vmatpush.msra.mxu0 %v2331_v1  ;;  %v2494_v49 = vld [vmem:[#allocation8 + $0x130] sm:$0xff]  ;;  %v2514_v55 = vld [vmem:[#allocation8 + $0xf8] sm:$0xff] }
  0xbf   :  { %v288_v56 = vmul.f32 %v285_v54, %v2310_v47  ;;  %429 = vmatpush.msrb.mxu3 %v2449_v37  ;;  %781 = vmatpush.msra.mxu1 %v2323_v62  ;;  %v2502_v51 = vld [vmem:[#allocation8 + $0x110] sm:$0xff]  ;;  %3440 = vst [vmem:[#allocation28_spill] sm:$0xff] %v2514_v55  ;;  %v2522_v57 = vld [vmem:[#allocation8 + $0xd8] sm:$0xff] }
  0xc0   :  { %412 = vmatpush.msrb.mxu2 %v2470_v42  ;;  %764 = vmatpush.msra.mxu0 %v2339_v3  ;;  %v2510_v54 = vld [vmem:[#allocation8 + $0xf0] sm:$0xff]  ;;  %3442 = vst [vmem:[#allocation30_spill] sm:$0xff] %v2522_v57 }
  0xc1   :  { %v2317_v58 = vadd.f32 %v288_v56, %v2313_v53  ;;  %430 = vmatpush.msrb.mxu3 %v2459_v39  ;;  %782 = vmatpush.msra.mxu1 %v2329_v0  ;;  %3439 = vst [vmem:[#allocation27_spill] sm:$0xff] %v2510_v54  ;;  %v2518_v56 = vld [vmem:[#allocation8 + $0xd0] sm:$0xff] }
  0xc2   :  { %413 = vmatpush.msrb.mxu2 %v2478_v44  ;;  %765 = vmatpush.msra.mxu0 %v2347_v5  ;;  %3441 = vst [vmem:[#allocation29_spill] sm:$0xff] %v2518_v56 }
  0xc3   :  { %v292_v60 = vmul.f32 %v2317_v58, %v270_v59  ;;  %431 = vmatpush.msrb.mxu3 %v2466_v41  ;;  %783 = vmatpush.msra.mxu1 %v2333_v2  ;;  %v2530_v59 = vld [vmem:[#allocation8 + $0xb8] sm:$0xff] }
  0xc4   :  { %414 = vmatpush.msrb.mxu2 %v2486_v46  ;;  %766 = vmatpush.msra.mxu0 %v2355_v7  ;;  %3444 = vst [vmem:[#allocation32_spill] sm:$0xff] %v2530_v59 }
  0xc5   :  { %294 = vrot.lane.b32.xlu0 %v292_v60, %s2245_s2  ;;  %432 = vmatpush.msrb.mxu3 %v2474_v43  ;;  %v2534_v60 = vld [vmem:[#allocation8 + $0x90] sm:$0xff] }
  0xc6   :  { %784 = vmatpush.msra.mxu1 %v2341_v4  ;;  %415 = vmatpush.msrb.mxu2 %v2494_v49  ;;  %3445 = vst [vmem:[#allocation33_spill] sm:$0xff] %v2534_v60 }
  0xc7   :  { %433 = vmatpush.msrb.mxu3 %v2482_v45  ;;  %767 = vmatpush.msra.mxu0 %v2363_v9 }
  0xc8   :  { %785 = vmatpush.msra.mxu1 %v2349_v6  ;;  %416 = vmatpush.msrb.mxu2 %v2502_v51 }
  0xc9   :  { %434 = vmatpush.msrb.mxu3 %v2490_v48  ;;  %768 = vmatpush.msra.mxu0 %v2371_v11 }
  0xca   :  { %786 = vmatpush.msra.mxu1 %v2357_v8  ;;  %417 = vmatpush.msrb.mxu2 %v2510_v54 }
  0xcb   :  { %435 = vmatpush.msrb.mxu3 %v2498_v50  ;;  %769 = vmatpush.msra.mxu0 %v2379_v13 }
  0xcc   :  { %787 = vmatpush.msra.mxu1 %v2365_v10  ;;  %418 = vmatpush.msrb.mxu2 %v2518_v56 }
  0xcd   :  { %436 = vmatpush.msrb.mxu3 %v2506_v52  ;;  %770 = vmatpush.msra.mxu0 %v2387_v15 }
  0xce   :  { %788 = vmatpush.msra.mxu1 %v2373_v12 }
  0xcf   :  { %437 = vmatpush.msrb.mxu3 %v2514_v55  ;;  %771 = vmatpush.msra.mxu0 %v2395_v17 }
  0xd0   :  { %789 = vmatpush.msra.mxu1 %v2381_v14 }
  0xd1   :  { %438 = vmatpush.msrb.mxu3 %v2522_v57  ;;  %772 = vmatpush.msra.mxu0 %v2403_v23 }
  0xd2   :  { %790 = vmatpush.msra.mxu1 %v2389_v16 }
  0xd3   :  { %439 = vmatpush.msrb.mxu3 %v2530_v59  ;;  %773 = vmatpush.msra.mxu0 %v2413_v26 }
  0xd4   :  { %791 = vmatpush.msra.mxu1 %v2397_v18 }
  0xd5   :  { %774 = vmatpush.msra.mxu0 %v2422_v28  ;;  %v2566_v28 = vld [vmem:[#allocation8 + $0x58] sm:$0xff] }
  0xd6   :  { %792 = vmatpush.msra.mxu1 %v2405_v24  ;;  %3450 = vst [vmem:[#allocation38_spill] sm:$0xff] %v2566_v28 }
  0xd7   :  { %775 = vmatpush.msra.mxu0 %v2430_v30  ;;  %v2578_v30 = vld [vmem:[#allocation8 + $0x18] sm:$0xff] }
  0xd8   :  { %793 = vmatpush.msra.mxu1 %v2415_v27  ;;  %3454 = vst [vmem:[#allocation42_spill] sm:$0xff] %v2578_v30 }
  0xd9   :  { %776 = vmatpush.msra.mxu0 %v2438_v32  ;;  %v2570_v32 = vld [vmem:[#allocation8 + $0x30] sm:$0xff] }
  0xda   :  { %794 = vmatpush.msra.mxu1 %v2424_v29  ;;  %v76_v29 = vld [vmem:[#allocation4 + $0x8] sm:$0xff]  ;;  %3451 = vst [vmem:[#allocation39_spill] sm:$0xff] %v2570_v32 }
  0xdb   :  { %1869 = vmatmul.msk.f32.gmra.mxu0 %vm105_vm0, %v76_v29  ;;  %1877 = vmatmul.msk.f32.gmra.mxu1 %vm105_vm0, %v76_v29 }
  0xdc   :  { %795 = vmatpush.msra.mxu1 %v2432_v31  ;;  %v2576_v31 = vld [vmem:[#allocation8 + $0x10] sm:$0xff] }
  0xdd   :  { %3453 = vst [vmem:[#allocation41_spill] sm:$0xff] %v2576_v31 }
  0xde   :  { %796 = vmatpush.msra.mxu1 %v2440_v33  ;;  %v2572_v33 = vld [vmem:[#allocation8 + $0x38] sm:$0xff] }
  0xdf   :  { %3452 = vst [vmem:[#allocation40_spill] sm:$0xff] %v2572_v33 }
 0x137   :  { %v295_v22 = vpop.permute.xlu0 %294 }
 0x138   :  { %v2409_v25 = vadd.f32 %v295_v22, %v291_v21  ;;  %v2538_v21 = vld [vmem:[#allocation8 + $0x98] sm:$0xff]  ;;  %v2558_v22 = vld [vmem:[#allocation8 + $0x70] sm:$0xff] }
 0x139   :  { %3446 = vst [vmem:[#allocation34_spill] sm:$0xff] %v2538_v21  ;;  %440 = vmatpush.msrb.mxu3 %v2538_v21 }
 0x13a   :  { %1942 = vtanh.f32 %v2409_v25  ;;  %3447 = vst [vmem:[#allocation35_spill] sm:$0xff] %v2558_v22 }
 0x140   :  { %v1943_v34 = vpop.eup %1942 }
 0x141   :  { %v299_v36 = vmul.f32 %v1943_v34, %v2317_v58  ;;  %v2526_v58 = vld [vmem:[#allocation8 + $0xb0] sm:$0xff]  ;;  %v2560_v34 = vld [vmem:[#allocation8 + $0x78] sm:$0xff] }
 0x142   :  { %3443 = vst [vmem:[#allocation31_spill] sm:$0xff] %v2526_v58  ;;  %419 = vmatpush.msrb.mxu2 %v2526_v58  ;;  %441 = vmatpush.msrb.mxu3 %v2560_v34 }
 0x143   :  { %301 = vrot.lane.b32.xlu0 %v299_v36, %s2245_s2  ;;  %3448 = vst [vmem:[#allocation36_spill] sm:$0xff] %v2560_v34  ;;  %v2562_v36 = vld [vmem:[#allocation8 + $0x50] sm:$0xff] }
 0x144   :  { %420 = vmatpush.msrb.mxu2 %v2534_v60  ;;  %3449 = vst [vmem:[#allocation37_spill] sm:$0xff] %v2562_v36  ;;  %442 = vmatpush.msrb.mxu3 %v2566_v28 }
 0x146   :  { %421 = vmatpush.msrb.mxu2 %v2558_v22  ;;  %443 = vmatpush.msrb.mxu3 %v2572_v33 }
 0x148   :  { %422 = vmatpush.msrb.mxu2 %v2562_v36  ;;  %444 = vmatpush.msrb.mxu3 %v2578_v30 }
 0x14a   :  { %423 = vmatpush.msrb.mxu2 %v2570_v32 }
 0x14c   :  { %424 = vmatpush.msrb.mxu2 %v2576_v31 }
 0x158   :  { %v191_v27 = vpop.f32.mrf.mxu1 }
 0x1b5   :  { %v302_v29 = vpop.permute.xlu0 %301 }
 0x1b6   :  { %1886 = vmatmul.msk.f32.vlgmr.msra.gmra.mxu2 %vm105_vm0, %v302_v29  ;;  %1887 = vmatmul.msk.f32.vlgmr.msra.gmra.mxu3 %vm105_vm0, %v302_v29 }
 0x1b7   :  { %605 = vmatpush.msra.mxu2 %v2446_v35  ;;  %625 = vmatpush.msra.mxu3 %v2449_v37 }
 0x1b9   :  { %606 = vmatpush.msra.mxu2 %v2455_v38  ;;  %626 = vmatpush.msra.mxu3 %v2459_v39 }
 0x1bb   :  { %607 = vmatpush.msra.mxu2 %v2462_v40  ;;  %627 = vmatpush.msra.mxu3 %v2466_v41 }
 0x1bd   :  { %608 = vmatpush.msra.mxu2 %v2470_v42  ;;  %628 = vmatpush.msra.mxu3 %v2474_v43 }
 0x1be   :  { %1888 = vmatmul.msk.f32.vlgmr.msrb.gmra.mxu2 %vm105_vm0, %v302_v29  ;;  %1889 = vmatmul.msk.f32.vlgmr.msrb.gmra.mxu3 %vm105_vm0, %v302_v29  ;;  %v150_v29 = vpop.f32.mrf.mxu0 }
 0x1bf   :  { %609 = vmatpush.msra.mxu2 %v2478_v44  ;;  %629 = vmatpush.msra.mxu3 %v2482_v45  ;;  %v151_v26 = vadd.f32 %v150_v29, %v2303_v19 }
 0x1c1   :  { %610 = vmatpush.msra.mxu2 %v2486_v46  ;;  %630 = vmatpush.msra.mxu3 %v2490_v48 }
 0x1c3   :  { %611 = vmatpush.msra.mxu2 %v2494_v49  ;;  %631 = vmatpush.msra.mxu3 %v2498_v50 }
 0x1c5   :  { %612 = vmatpush.msra.mxu2 %v2502_v51  ;;  %632 = vmatpush.msra.mxu3 %v2506_v52 }
 0x1c7   :  { %613 = vmatpush.msra.mxu2 %v2510_v54  ;;  %633 = vmatpush.msra.mxu3 %v2514_v55 }
 0x1c9   :  { %614 = vmatpush.msra.mxu2 %v2518_v56  ;;  %634 = vmatpush.msra.mxu3 %v2522_v57 }
 0x1cb   :  { %615 = vmatpush.msra.mxu2 %v2526_v58  ;;  %635 = vmatpush.msra.mxu3 %v2530_v59 }
 0x1cd   :  { %616 = vmatpush.msra.mxu2 %v2534_v60  ;;  %636 = vmatpush.msra.mxu3 %v2538_v21 }
 0x1cf   :  { %617 = vmatpush.msra.mxu2 %v2558_v22  ;;  %637 = vmatpush.msra.mxu3 %v2560_v34 }
 0x1d1   :  { %618 = vmatpush.msra.mxu2 %v2562_v36  ;;  %638 = vmatpush.msra.mxu3 %v2566_v28 }
 0x1d3   :  { %619 = vmatpush.msra.mxu2 %v2570_v32  ;;  %639 = vmatpush.msra.mxu3 %v2572_v33 }
 0x1d5   :  { %620 = vmatpush.msra.mxu2 %v2576_v31  ;;  %640 = vmatpush.msra.mxu3 %v2578_v30 }
 0x1d7   :  { %801 = vmatpush.msrb.mxu2 %v2446_v35  ;;  %821 = vmatpush.msrb.mxu3 %v2449_v37 }
 0x1d9   :  { %802 = vmatpush.msrb.mxu2 %v2455_v38  ;;  %822 = vmatpush.msrb.mxu3 %v2459_v39 }
 0x1db   :  { %803 = vmatpush.msrb.mxu2 %v2462_v40  ;;  %823 = vmatpush.msrb.mxu3 %v2466_v41 }
 0x1dd   :  { %804 = vmatpush.msrb.mxu2 %v2470_v42  ;;  %824 = vmatpush.msrb.mxu3 %v2474_v43 }
 0x1df   :  { %805 = vmatpush.msrb.mxu2 %v2478_v44  ;;  %825 = vmatpush.msrb.mxu3 %v2482_v45 }
 0x1e1   :  { %806 = vmatpush.msrb.mxu2 %v2486_v46  ;;  %826 = vmatpush.msrb.mxu3 %v2490_v48 }
 0x1e3   :  { %807 = vmatpush.msrb.mxu2 %v2494_v49  ;;  %827 = vmatpush.msrb.mxu3 %v2498_v50 }
 0x1e5   :  { %808 = vmatpush.msrb.mxu2 %v2502_v51  ;;  %828 = vmatpush.msrb.mxu3 %v2506_v52 }
 0x1e7   :  { %809 = vmatpush.msrb.mxu2 %v2510_v54  ;;  %829 = vmatpush.msrb.mxu3 %v2514_v55 }
 0x1e9   :  { %810 = vmatpush.msrb.mxu2 %v2518_v56  ;;  %830 = vmatpush.msrb.mxu3 %v2522_v57 }
 0x1eb   :  { %811 = vmatpush.msrb.mxu2 %v2526_v58  ;;  %831 = vmatpush.msrb.mxu3 %v2530_v59 }
 0x1ed   :  { %812 = vmatpush.msrb.mxu2 %v2534_v60  ;;  %832 = vmatpush.msrb.mxu3 %v2538_v21 }
 0x1ef   :  { %813 = vmatpush.msrb.mxu2 %v2558_v22  ;;  %833 = vmatpush.msrb.mxu3 %v2560_v34  ;;  %v192_v22 = vadd.f32 %v191_v27, %v2305_v20 }
 0x1f1   :  { %814 = vmatpush.msrb.mxu2 %v2562_v36  ;;  %834 = vmatpush.msrb.mxu3 %v2566_v28 }
 0x1f3   :  { %815 = vmatpush.msrb.mxu2 %v2570_v32  ;;  %835 = vmatpush.msrb.mxu3 %v2572_v33  ;;  %v228_v32 = vld [vmem:[%s3317_s4] sm:$0x3] }
 0x1f5   :  { %816 = vmatpush.msrb.mxu2 %v2576_v31  ;;  %836 = vmatpush.msrb.mxu3 %v2578_v30  ;;  %v2657_v31 = vperm.slane %v228_v32, 0  ;;  %v2659_v30 = vperm.slane %v228_v32, 1 }
 0x1f7   :  { %3455 = vst [vmem:[#allocation43_spill] sm:$0xff] %v2657_v31 }
 0x1f8   :  { %3456 = vst [vmem:[#allocation44_spill] sm:$0xff] %v2659_v30 }
 0x239   :  { %v386_v21 = vpop.f32.mrf.mxu2  ;;  %v406_v34 = vpop.f32.mrf.mxu3 }
 0x23a   :  { %v454_v60 = vadd.f32 %v386_v21, %v151_v26  ;;  %v455_v36 = vadd.f32 %v406_v34, %v192_v22 }
 0x23c   :  { %v1890_v28 = vmul.f32 -1.442695, %v454_v60  ;;  %v1891_v33 = vmul.f32 -1.442695, %v455_v36 }
 0x23e   :  { %1944 = vpow2.f32 %v1890_v28 }
 0x23f   :  { %1946 = vpow2.f32 %v1891_v33 }
 0x241   :  { %v426_v24 = vpop.f32.mrf.mxu2  ;;  %v446_v29 = vpop.f32.mrf.mxu3 }
 0x242   :  { %v456_v27 = vadd.f32 %v426_v24, %v2657_v31  ;;  %v457_v20 = vadd.f32 %v446_v29, %v2659_v30 }
 0x244   :  { %v1945_v26 = vpop.eup %1944  ;;  %v1892_v21 = vmul.f32 -1.442695, %v456_v27  ;;  %v1893_v19 = vmul.f32 -1.442695, %v457_v20 }
 0x245   :  { %v1947_v22 = vpop.eup %1946  ;;  %v464_v34 = vadd.f32 1.0, %v1945_v26 }
 0x246   :  { %v465_v23 = vadd.f32 1.0, %v1947_v22  ;;  %1948 = vpow2.f32 %v1892_v21 }
 0x247   :  { %1950 = vrcp.f32 %v464_v34  ;;  %v477_v18 = vand.u32 2147483648, %v464_v34  ;;  %vm471_vm14 = vweird.f32 %v464_v34 }
 0x248   :  { %1952 = vrcp.f32 %v465_v23  ;;  %v492_v26 = vand.u32 2147483648, %v465_v23  ;;  %v490_v22 = vand.u32 2147483647, %v465_v23  ;;  %vm486_vm12 = vweird.f32 %v465_v23 }
 0x249   :  { %1954 = vpow2.f32 %v1893_v19  ;;  %v478_v16 = vor.u32 1.1754944e-38, %v477_v18 }
 0x24a   :  { %v493_v17 = vor.u32 1.1754944e-38, %v492_v26  ;;  %vm491_vm15 = vcmp.eq.f32.partialorder %v490_v22, 8.507059e+37 }
 0x24c   :  { %v1949_v28 = vpop.eup %1948 }
 0x24d   :  { %v1951_v32 = vpop.eup %1950  ;;  %v2663_v60 = vadd.f32 1.0, %v1949_v28 }
 0x24e   :  { %v1953_v33 = vpop.eup %1952  ;;  %v467_v36 = vmul.f32 %v1951_v32, %v464_v34  ;;  %vm472_vm11 = vweird.f32 %v1951_v32 }
 0x24f   :  { %v1955_v59 = vpop.eup %1954  ;;  %v482_v24 = vmul.f32 %v1953_v33, %v465_v23  ;;  %1956 = vrcp.f32 %v2663_v60  ;;  %vm487_vm10 = vweird.f32 %v1953_v33  ;;  %vm473_vm1 = vmor %vm471_vm14, %vm472_vm11  ;;  %vm522_vm7 = vweird.f32 %v2663_v60 }
 0x250   :  { %v516_v29 = vadd.f32 1.0, %v1955_v59  ;;  %v468_v27 = vsub.f32 1.0, %v467_v36  ;;  %vm488_vm13 = vmor %vm486_vm12, %vm487_vm10  ;;  %v475_v59 = vand.u32 2147483647, %v464_v34 }
 0x251   :  { %v483_v30 = vsub.f32 1.0, %v482_v24 }
 0x252   :  { %1958 = vrcp.f32 %v516_v29  ;;  %v469_v20 = vmul.f32 %v1951_v32, %v468_v27  ;;  %vm476_vm2 = vcmp.eq.f32.partialorder %v475_v59, 8.507059e+37  ;;  %v543_v26 = vand.u32 2147483648, %v516_v29  ;;  %v77_v59 = vld [vmem:[#allocation4 + $0x10] sm:$0xff] }
 0x253   :  { %v484_v21 = vmul.f32 %v1953_v33, %v483_v30  ;;  %vm537_vm5 = vweird.f32 %v516_v29  ;;  %1870 = vmatmul.msk.f32.gmra.mxu0 %vm105_vm0, %v77_v59  ;;  %1878 = vmatmul.msk.f32.gmra.mxu1 %vm105_vm0, %v77_v59  ;;  %v3485_v59 = vld [vmem:[#allocation41_spill] sm:$0xff] }
 0x254   :  { %v470_v31 = vadd.f32 %v1951_v32, %v469_v20  ;;  %v544_v18 = vor.u32 1.1754944e-38, %v543_v26  ;;  %v81_v26 = vld [vmem:[#allocation4 + $0x30] sm:$0xff] }
 0x255   :  { %v1957_v19 = vpop.eup %1956  ;;  %v485_v28 = vadd.f32 %v1953_v33, %v484_v21 }
 0x256   :  { %v518_v58 = vmul.f32 %v1957_v19, %v2663_v60  ;;  %v474_v56 = vsel %vm473_vm1, %v1951_v32, %v470_v31  ;;  %vm523_vm4 = vweird.f32 %v1957_v19  ;;  %v528_v31 = vand.u32 2147483648, %v2663_v60 }
 0x257   :  { %v489_v36 = vsel %vm488_vm13, %v1953_v33, %v485_v28  ;;  %v479_v55 = vsel %vm476_vm2, %v478_v16, %v474_v56  ;;  %v541_v33 = vand.u32 2147483647, %v516_v29  ;;  %vm524_vm9 = vmor %vm522_vm7, %vm523_vm4 }
 0x258   :  { %v1959_v24 = vpop.eup %1958  ;;  %v494_v27 = vsel %vm491_vm15, %v493_v17, %v489_v36  ;;  %v519_v30 = vsub.f32 1.0, %v518_v58  ;;  %v500_v36 = vmul.f32 %v479_v55, %v2409_v25  ;;  %v82_v25 = vld [vmem:[#allocation4 + $0x38] sm:$0xff] }
 0x259   :  { %v533_v57 = vmul.f32 %v1959_v24, %v516_v29  ;;  %v497_v20 = vmul.f32 %v494_v27, %v2310_v47  ;;  %vm538_vm3 = vweird.f32 %v1959_v24  ;;  %vm542_vm8 = vcmp.eq.f32.partialorder %v541_v33, 8.507059e+37 }
 0x25a   :  { %v520_v15 = vmul.f32 %v1957_v19, %v519_v30  ;;  %vm539_vm6 = vmor %vm537_vm5, %vm538_vm3  ;;  %v80_v30 = vld [vmem:[#allocation4 + $0x28] sm:$0xff] }
 0x25b   :  { %v534_v21 = vsub.f32 1.0, %v533_v57  ;;  %v499_v23 = vadd.f32 %v497_v20, %v2313_v53  ;;  %v526_v57 = vand.u32 2147483647, %v2663_v60  ;;  %v78_v60 = vld [vmem:[#allocation4 + $0x18] sm:$0xff] }
 0x25c   :  { %v521_v17 = vadd.f32 %v1957_v19, %v520_v15  ;;  %1871 = vmatmul.msk.f32.gmra.mxu0 %vm105_vm0, %v78_v60  ;;  %1879 = vmatmul.msk.f32.gmra.mxu1 %vm105_vm0, %v78_v60  ;;  %v3486_v60 = vld [vmem:[#allocation42_spill] sm:$0xff] }
 0x25d   :  { %v501_v54 = vmul.f32 %v499_v23, %v479_v55  ;;  %v535_v34 = vmul.f32 %v1959_v24, %v534_v21  ;;  %vm527_vm10 = vcmp.eq.f32.partialorder %v526_v57, 8.507059e+37  ;;  %v3476_v57 = vld [vmem:[#allocation22_spill] sm:$0xff] }
 0x25e   :  { %v525_v32 = vsel %vm524_vm9, %v1957_v19, %v521_v17  ;;  %v79_v19 = vld [vmem:[#allocation4 + $0x20] sm:$0xff] }
 0x25f   :  { %503 = vrot.lane.b32.xlu1 %v501_v54, %s2245_s2  ;;  %v536_v58 = vadd.f32 %v1959_v24, %v535_v34  ;;  %v529_v54 = vor.u32 1.1754944e-38, %v528_v31 }
 0x261   :  { %v540_v16 = vsel %vm539_vm6, %v1959_v24, %v536_v58  ;;  %v530_v29 = vsel %vm527_vm10, %v529_v54, %v525_v32  ;;  %v3479_v32 = vld [vmem:[#allocation23_spill] sm:$0xff] }
 0x262   :  { %v545_v56 = vsel %vm542_vm8, %v544_v18, %v540_v16  ;;  %v551_v34 = vmul.f32 0.0, %v530_v29  ;;  %v3475_v18 = vld [vmem:[#allocation21_spill] sm:$0xff]  ;;  %v3481_v54 = vld [vmem:[#allocation39_spill] sm:$0xff] }
 0x263   :  { %v548_v22 = vmul.f32 %v545_v56, %v2310_v47  ;;  %v3477_v16 = vld [vmem:[#allocation37_spill] sm:$0xff]  ;;  %v3478_v56 = vld [vmem:[#allocation38_spill] sm:$0xff] }
 0x264   :  { %1872 = vmatmul.msk.f32.gmra.mxu0 %vm105_vm0, %v79_v19  ;;  %1880 = vmatmul.msk.f32.gmra.mxu1 %vm105_vm0, %v79_v19 }
 0x265   :  { %v550_v15 = vadd.f32 %v548_v22, %v2313_v53  ;;  %v3480_v22 = vld [vmem:[#allocation24_spill] sm:$0xff] }
 0x267   :  { %v552_v28 = vmul.f32 %v550_v15, %v530_v29  ;;  %v3483_v29 = vld [vmem:[#allocation25_spill] sm:$0xff] }
 0x269   :  { %554 = vrot.lane.b32.xlu1 %v552_v28, %s2245_s2  ;;  %v3484_v28 = vld [vmem:[#allocation26_spill] sm:$0xff] }
 0x26c   :  { %1873 = vmatmul.msk.f32.gmra.mxu0 %vm105_vm0, %v80_v30  ;;  %1881 = vmatmul.msk.f32.gmra.mxu1 %vm105_vm0, %v80_v30 }
 0x274   :  { %1874 = vmatmul.msk.f32.gmra.mxu0 %vm105_vm0, %v81_v26  ;;  %1882 = vmatmul.msk.f32.gmra.mxu1 %vm105_vm0, %v81_v26 }
 0x27c   :  { %1875 = vmatmul.msk.f32.gmra.mxu0 %vm105_vm0, %v82_v25  ;;  %1883 = vmatmul.msk.f32.gmra.mxu1 %vm105_vm0, %v82_v25 }
 0x2d0   :  { %v153_v19 = vpop.f32.mrf.mxu0 }
 0x2d1   :  { %v504_v24 = vpop.permute.xlu1 %503 }
 0x2d2   :  { %v2683_v27 = vadd.f32 %v504_v24, %v500_v36  ;;  %v194_v36 = vpop.f32.mrf.mxu1 }
 0x2d4   :  { %1960 = vtanh.f32 %v2683_v27 }
 0x2d9   :  { %v2761_v24 = vpop.f32.mrf.mxu0 }
 0x2da   :  { %v1961_v20 = vpop.eup %1960  ;;  %v2763_v30 = vpop.f32.mrf.mxu1 }
 0x2db   :  { %v508_v21 = vmul.f32 %v1961_v20, %v499_v23  ;;  %v555_v55 = vpop.permute.xlu1 %554 }
 0x2dc   :  { %v2693_v33 = vadd.f32 %v555_v55, %v551_v34 }
 0x2dd   :  { %561 = vrot.lane.b32.xlu2 %v508_v21, %s2245_s2 }
 0x2de   :  { %1962 = vtanh.f32 %v2693_v33 }
 0x2e1   :  { %v2765_v20 = vpop.f32.mrf.mxu0 }
 0x2e2   :  { %v2767_v21 = vpop.f32.mrf.mxu1 }
 0x2e4   :  { %v1963_v17 = vpop.eup %1962 }
 0x2e5   :  { %v559_v23 = vmul.f32 %v1963_v17, %v550_v15  ;;  %v3482_v15 = vld [vmem:[#allocation40_spill] sm:$0xff] }
 0x2e9   :  { %v2769_v26 = vpop.f32.mrf.mxu0 }
 0x2ea   :  { %v2771_v25 = vpop.f32.mrf.mxu1 }
 0x2f1   :  { %v2773_v55 = vpop.f32.mrf.mxu0 }
 0x2f2   :  { %v2775_v34 = vpop.f32.mrf.mxu1 }
 0x2f9   :  { %v2777_v17 = vpop.f32.mrf.mxu0 }
 0x337   :  { %v562_v58 = vpop.permute.xlu2 %561 }
 0x338   :  { %v564_v31 = vsel %vm105_vm0, %v562_v58, %v559_v23  ;;  %v2779_v23 = vpop.f32.mrf.mxu1  ;;  %v3497_v58 = vld [vmem:[#allocation11_spill] sm:$0xff] }
 0x339   :  { %581 = vmatmul.f32.vlgmr.msrb.gmra.mxu0 %v564_v31  ;;  %601 = vmatmul.f32.vlgmr.msrb.gmra.mxu1 %v564_v31 }
 0x33a   :  { %621 = vmatmul.f32.vlgmr.msra.gmra.mxu2 %v564_v31  ;;  %641 = vmatmul.f32.vlgmr.msra.gmra.mxu3 %v564_v31  ;;  %v154_v31 = vadd.f32 %v153_v19, %v3497_v58 }
 0x33b   :  { %957 = vmatpush.msrb.mxu0 %v2321_v61  ;;  %977 = vmatpush.msrb.mxu1 %v2323_v62  ;;  %v3457_v61 = vld [vmem:[#allocation27_spill] sm:$0xff]  ;;  %v3458_v62 = vld [vmem:[#allocation28_spill] sm:$0xff] }
 0x33c   :  { %997 = vmatpush.msra.mxu2 %v2446_v35  ;;  %1017 = vmatpush.msra.mxu3 %v2449_v37  ;;  %3487 = vst [vmem:[#allocation27_spill] sm:$0xff] %v2761_v24 }
 0x33d   :  { %958 = vmatpush.msrb.mxu0 %v2325_v63  ;;  %978 = vmatpush.msrb.mxu1 %v2329_v0  ;;  %v3459_v63 = vld [vmem:[#allocation13_spill] sm:$0xff]  ;;  %v3460_v0 = vld [vmem:[#allocation14_spill] sm:$0xff]  ;;  %3488 = vst [vmem:[#allocation28_spill] sm:$0xff] %v2763_v30 }
 0x33e   :  { %998 = vmatpush.msra.mxu2 %v2455_v38  ;;  %1018 = vmatpush.msra.mxu3 %v2459_v39  ;;  %3489 = vst [vmem:[#allocation13_spill] sm:$0xff] %v2765_v20 }
 0x33f   :  { %959 = vmatpush.msrb.mxu0 %v2331_v1  ;;  %979 = vmatpush.msrb.mxu1 %v2333_v2  ;;  %v3461_v1 = vld [vmem:[#allocation29_spill] sm:$0xff]  ;;  %v3462_v2 = vld [vmem:[#allocation30_spill] sm:$0xff]  ;;  %3490 = vst [vmem:[#allocation14_spill] sm:$0xff] %v2767_v21 }
 0x340   :  { %999 = vmatpush.msra.mxu2 %v2462_v40  ;;  %1019 = vmatpush.msra.mxu3 %v2466_v41  ;;  %3491 = vst [vmem:[#allocation29_spill] sm:$0xff] %v2769_v26 }
 0x341   :  { %960 = vmatpush.msrb.mxu0 %v2339_v3  ;;  %980 = vmatpush.msrb.mxu1 %v2341_v4  ;;  %v3463_v3 = vld [vmem:[#allocation15_spill] sm:$0xff]  ;;  %v3464_v4 = vld [vmem:[#allocation16_spill] sm:$0xff]  ;;  %3492 = vst [vmem:[#allocation30_spill] sm:$0xff] %v2771_v25 }
 0x342   :  { %1000 = vmatpush.msra.mxu2 %v2470_v42  ;;  %1020 = vmatpush.msra.mxu3 %v2474_v43  ;;  %3493 = vst [vmem:[#allocation15_spill] sm:$0xff] %v2773_v55 }
 0x343   :  { %961 = vmatpush.msrb.mxu0 %v2347_v5  ;;  %981 = vmatpush.msrb.mxu1 %v2349_v6  ;;  %v3465_v5 = vld [vmem:[#allocation31_spill] sm:$0xff]  ;;  %v3466_v6 = vld [vmem:[#allocation32_spill] sm:$0xff]  ;;  %3494 = vst [vmem:[#allocation16_spill] sm:$0xff] %v2775_v34 }
 0x344   :  { %1001 = vmatpush.msra.mxu2 %v2478_v44  ;;  %1021 = vmatpush.msra.mxu3 %v2482_v45  ;;  %3495 = vst [vmem:[#allocation31_spill] sm:$0xff] %v2777_v17 }
 0x345   :  { %962 = vmatpush.msrb.mxu0 %v2355_v7  ;;  %982 = vmatpush.msrb.mxu1 %v2357_v8  ;;  %v3467_v7 = vld [vmem:[#allocation17_spill] sm:$0xff]  ;;  %v3468_v8 = vld [vmem:[#allocation18_spill] sm:$0xff]  ;;  %3496 = vst [vmem:[#allocation32_spill] sm:$0xff] %v2779_v23 }
 0x346   :  { %1002 = vmatpush.msra.mxu2 %v2486_v46  ;;  %1022 = vmatpush.msra.mxu3 %v2490_v48 }
 0x347   :  { %963 = vmatpush.msrb.mxu0 %v2363_v9  ;;  %983 = vmatpush.msrb.mxu1 %v2365_v10  ;;  %v3469_v9 = vld [vmem:[#allocation33_spill] sm:$0xff]  ;;  %v3470_v10 = vld [vmem:[#allocation34_spill] sm:$0xff] }
 0x348   :  { %1003 = vmatpush.msra.mxu2 %v2494_v49  ;;  %1023 = vmatpush.msra.mxu3 %v2498_v50 }
 0x349   :  { %964 = vmatpush.msrb.mxu0 %v2371_v11  ;;  %984 = vmatpush.msrb.mxu1 %v2373_v12  ;;  %v3471_v11 = vld [vmem:[#allocation19_spill] sm:$0xff]  ;;  %v3472_v12 = vld [vmem:[#allocation20_spill] sm:$0xff] }
 0x34a   :  { %1004 = vmatpush.msra.mxu2 %v2502_v51  ;;  %1024 = vmatpush.msra.mxu3 %v2506_v52 }
 0x34b   :  { %965 = vmatpush.msrb.mxu0 %v2379_v13  ;;  %985 = vmatpush.msrb.mxu1 %v2381_v14  ;;  %v3473_v13 = vld [vmem:[#allocation35_spill] sm:$0xff]  ;;  %v3474_v14 = vld [vmem:[#allocation36_spill] sm:$0xff] }
 0x34c   :  { %1005 = vmatpush.msra.mxu2 %v3457_v61  ;;  %1025 = vmatpush.msra.mxu3 %v3458_v62 }
 0x34d   :  { %966 = vmatpush.msrb.mxu0 %v3459_v63  ;;  %986 = vmatpush.msrb.mxu1 %v3460_v0  ;;  %v3498_v63 = vld [vmem:[#allocation12_spill] sm:$0xff] }
 0x34e   :  { %1006 = vmatpush.msra.mxu2 %v3461_v1  ;;  %1026 = vmatpush.msra.mxu3 %v3462_v2  ;;  %v195_v0 = vadd.f32 %v194_v36, %v3498_v63 }
 0x34f   :  { %967 = vmatpush.msrb.mxu0 %v3463_v3  ;;  %987 = vmatpush.msrb.mxu1 %v3464_v4 }
 0x350   :  { %1007 = vmatpush.msra.mxu2 %v3465_v5  ;;  %1027 = vmatpush.msra.mxu3 %v3466_v6 }
 0x351   :  { %968 = vmatpush.msrb.mxu0 %v3467_v7  ;;  %988 = vmatpush.msrb.mxu1 %v3468_v8 }
 0x352   :  { %1008 = vmatpush.msra.mxu2 %v3469_v9  ;;  %1028 = vmatpush.msra.mxu3 %v3470_v10 }
 0x353   :  { %969 = vmatpush.msrb.mxu0 %v3471_v11  ;;  %989 = vmatpush.msrb.mxu1 %v3472_v12 }
 0x354   :  { %1009 = vmatpush.msra.mxu2 %v3473_v13  ;;  %1029 = vmatpush.msra.mxu3 %v3474_v14 }
 0x355   :  { %970 = vmatpush.msrb.mxu0 %v3475_v18  ;;  %990 = vmatpush.msrb.mxu1 %v3476_v57 }
 0x356   :  { %1010 = vmatpush.msra.mxu2 %v3477_v16  ;;  %1030 = vmatpush.msra.mxu3 %v3478_v56 }
 0x357   :  { %971 = vmatpush.msrb.mxu0 %v3479_v32  ;;  %991 = vmatpush.msrb.mxu1 %v3480_v22  ;;  %v3499_v32 = vld [vmem:[#allocation43_spill] sm:$0xff] }
 0x358   :  { %1011 = vmatpush.msra.mxu2 %v3481_v54  ;;  %1031 = vmatpush.msra.mxu3 %v3482_v15 }
 0x359   :  { %972 = vmatpush.msrb.mxu0 %v3483_v29  ;;  %992 = vmatpush.msrb.mxu1 %v3484_v28  ;;  %v3500_v29 = vld [vmem:[#allocation44_spill] sm:$0xff] }
 0x35a   :  { %1012 = vmatpush.msra.mxu2 %v3485_v59  ;;  %1032 = vmatpush.msra.mxu3 %v3486_v60 }
 0x3b6   :  { %v582_v3 = vpop.f32.mrf.mxu0  ;;  %v602_v4 = vpop.f32.mrf.mxu1 }
 0x3b7   :  { %v650_v7 = vadd.f32 %v582_v3, %v154_v31  ;;  %v651_v8 = vadd.f32 %v602_v4, %v195_v0 }
 0x3b9   :  { %v1894_v11 = vmul.f32 -1.442695, %v650_v7  ;;  %v1895_v12 = vmul.f32 -1.442695, %v651_v8 }
 0x3bb   :  { %1964 = vpow2.f32 %v1894_v11 }
 0x3bc   :  { %1966 = vpow2.f32 %v1895_v12 }
 0x3bd   :  { %v622_v18 = vpop.f32.mrf.mxu2  ;;  %v642_v57 = vpop.f32.mrf.mxu3 }
 0x3be   :  { %v652_v22 = vadd.f32 %v622_v18, %v3499_v32  ;;  %v653_v28 = vadd.f32 %v642_v57, %v3500_v29 }
 0x3c0   :  { %v1896_v17 = vmul.f32 -1.442695, %v652_v22  ;;  %v1897_v23 = vmul.f32 -1.442695, %v653_v28 }
 0x3c1   :  { %v1965_v34 = vpop.eup %1964 }
 0x3c2   :  { %v1967_v19 = vpop.eup %1966  ;;  %v660_v55 = vadd.f32 1.0, %v1965_v34  ;;  %1968 = vpow2.f32 %v1896_v17 }
 0x3c3   :  { %v661_v36 = vadd.f32 1.0, %v1967_v19  ;;  %1970 = vpow2.f32 %v1897_v23 }
 0x3c4   :  { %1972 = vrcp.f32 %v660_v55  ;;  %vm667_vm14 = vweird.f32 %v660_v55  ;;  %v673_v21 = vand.u32 2147483648, %v660_v55 }
 0x3c5   :  { %1974 = vrcp.f32 %v661_v36  ;;  %v688_v17 = vand.u32 2147483648, %v661_v36  ;;  %v686_v23 = vand.u32 2147483647, %v661_v36  ;;  %vm682_vm12 = vweird.f32 %v661_v36 }
 0x3c7   :  { %v689_v20 = vor.u32 1.1754944e-38, %v688_v17  ;;  %vm687_vm1 = vcmp.eq.f32.partialorder %v686_v23, 8.507059e+37 }
 0x3c8   :  { %v1969_v31 = vpop.eup %1968 }
 0x3c9   :  { %v1971_v0 = vpop.eup %1970  ;;  %v2785_v3 = vadd.f32 1.0, %v1969_v31 }
 0x3ca   :  { %v1973_v4 = vpop.eup %1972  ;;  %v712_v7 = vadd.f32 1.0, %v1971_v0 }
 0x3cb   :  { %v1975_v8 = vpop.eup %1974  ;;  %v663_v11 = vmul.f32 %v1973_v4, %v660_v55  ;;  %1976 = vrcp.f32 %v2785_v3  ;;  %vm668_vm13 = vweird.f32 %v1973_v4  ;;  %vm718_vm8 = vweird.f32 %v2785_v3 }
 0x3cc   :  { %v678_v12 = vmul.f32 %v1975_v8, %v661_v36  ;;  %1978 = vrcp.f32 %v712_v7  ;;  %vm683_vm11 = vweird.f32 %v1975_v8  ;;  %vm669_vm2 = vmor %vm667_vm14, %vm668_vm13  ;;  %v739_v63 = vand.u32 2147483648, %v712_v7 }
 0x3cd   :  { %v664_v18 = vsub.f32 1.0, %v663_v11  ;;  %vm684_vm15 = vmor %vm682_vm12, %vm683_vm11  ;;  %v671_v11 = vand.u32 2147483647, %v660_v55  ;;  %vm733_vm5 = vweird.f32 %v712_v7 }
 0x3ce   :  { %v679_v57 = vsub.f32 1.0, %v678_v12 }
 0x3cf   :  { %v665_v34 = vmul.f32 %v1973_v4, %v664_v18  ;;  %vm672_vm4 = vcmp.eq.f32.partialorder %v671_v11, 8.507059e+37 }
 0x3d0   :  { %v680_v22 = vmul.f32 %v1975_v8, %v679_v57 }
 0x3d1   :  { %v1977_v28 = vpop.eup %1976  ;;  %v666_v25 = vadd.f32 %v1973_v4, %v665_v34  ;;  %v674_v34 = vor.u32 1.1754944e-38, %v673_v21  ;;  %v722_v21 = vand.u32 2147483647, %v2785_v3 }
 0x3d2   :  { %v1979_v19 = vpop.eup %1978  ;;  %v714_v31 = vmul.f32 %v1977_v28, %v2785_v3  ;;  %v681_v0 = vadd.f32 %v1975_v8, %v680_v22  ;;  %v737_v22 = vand.u32 2147483647, %v712_v7  ;;  %vm719_vm6 = vweird.f32 %v1977_v28 }
 0x3d3   :  { %v729_v26 = vmul.f32 %v1979_v19, %v712_v7  ;;  %v670_v32 = vsel %vm669_vm2, %v1973_v4, %v666_v25  ;;  %vm734_vm3 = vweird.f32 %v1979_v19  ;;  %v740_v25 = vor.u32 1.1754944e-38, %v739_v63  ;;  %vm720_vm10 = vmor %vm718_vm8, %vm719_vm6 }
 0x3d4   :  { %v685_v12 = vsel %vm684_vm15, %v1975_v8, %v681_v0  ;;  %v715_v18 = vsub.f32 1.0, %v714_v31  ;;  %v675_v55 = vsel %vm672_vm4, %v674_v34, %v670_v32  ;;  %vm735_vm7 = vmor %vm733_vm5, %vm734_vm3  ;;  %vm738_vm9 = vcmp.eq.f32.partialorder %v737_v22, 8.507059e+37  ;;  %v2808_v22 = vld [vmem:[#allocation8 + $0x1e0] sm:$0xff] }
 0x3d5   :  { %v730_v57 = vsub.f32 1.0, %v729_v26  ;;  %v690_v29 = vsel %vm687_vm1, %v689_v20, %v685_v12  ;;  %v724_v20 = vand.u32 2147483648, %v2785_v3  ;;  %vm723_vm11 = vcmp.eq.f32.partialorder %v722_v21, 8.507059e+37 }
 0x3d6   :  { %v693_v36 = vmul.f32 %v690_v29, %v2310_v47  ;;  %v716_v30 = vmul.f32 %v1977_v28, %v715_v18  ;;  %v696_v63 = vmul.f32 %v675_v55, %v2683_v27 }
 0x3d7   :  { %v731_v24 = vmul.f32 %v1979_v19, %v730_v57  ;;  %v725_v32 = vor.u32 1.1754944e-38, %v724_v20  ;;  %v3519_v20 = vld [vmem:[#allocation12_spill] sm:$0xff] }
 0x3d8   :  { %v695_v58 = vadd.f32 %v693_v36, %v2313_v53  ;;  %v717_v8 = vadd.f32 %v1977_v28, %v716_v30 }
 0x3d9   :  { %v732_v17 = vadd.f32 %v1979_v19, %v731_v24 }
 0x3da   :  { %v697_v26 = vmul.f32 %v695_v58, %v675_v55  ;;  %v721_v7 = vsel %vm720_vm10, %v1977_v28, %v717_v8  ;;  %v2819_v55 = vld [vmem:[#allocation8 + $0x1c8] sm:$0xff]  ;;  %v2824_v8 = vld [vmem:[#allocation8 + $0x1a0] sm:$0xff] }
 0x3db   :  { %v736_v29 = vsel %vm735_vm7, %v1979_v19, %v732_v17  ;;  %v726_v23 = vsel %vm723_vm11, %v725_v32, %v721_v7  ;;  %v2827_v17 = vld [vmem:[#allocation8 + $0x1a8] sm:$0xff] }
 0x3dc   :  { %699 = vrot.lane.b32.xlu2 %v697_v26, %s2245_s2  ;;  %v741_v4 = vsel %vm738_vm9, %v740_v25, %v736_v29  ;;  %v747_v12 = vmul.f32 %v726_v23, %v2693_v33  ;;  %v2816_v33 = vld [vmem:[#allocation8 + $0x1c0] sm:$0xff]  ;;  %v3520_v25 = vld [vmem:[#allocation28_spill] sm:$0xff] }
 0x3dd   :  { %v744_v30 = vmul.f32 %v741_v4, %v2310_v47 }
 0x3df   :  { %v746_v24 = vadd.f32 %v744_v30, %v2313_v53 }
 0x3e1   :  { %v748_v31 = vmul.f32 %v746_v24, %v726_v23  ;;  %v3521_v23 = vld [vmem:[#allocation43_spill] sm:$0xff] }
 0x3e3   :  { %750 = vrot.lane.b32.xlu0 %v748_v31, %s2245_s2  ;;  %v3522_v31 = vld [vmem:[#allocation44_spill] sm:$0xff] }
 0x436   :  { %v700_v3 = vpop.permute.xlu2 %699 }
 0x437   :  { %v2799_v19 = vadd.f32 %v700_v3, %v696_v63 }
 0x439   :  { %1980 = vtanh.f32 %v2799_v19 }
 0x43f   :  { %v1981_v0 = vpop.eup %1980 }
 0x440   :  { %v704_v11 = vmul.f32 %v1981_v0, %v695_v58  ;;  %v2811_v58 = vld [vmem:[#allocation8 + $0x1e8] sm:$0xff] }
 0x442   :  { %757 = vrot.lane.b32.xlu1 %v704_v11, %s2245_s2 }
 0x455   :  { %v751_v28 = vpop.permute.xlu0 %750 }
 0x456   :  { %v2804_v18 = vadd.f32 %v751_v28, %v747_v12 }
 0x458   :  { %1982 = vtanh.f32 %v2804_v18 }
 0x45e   :  { %v1983_v57 = vpop.eup %1982 }
 0x45f   :  { %v755_v36 = vmul.f32 %v1983_v57, %v746_v24 }
 0x4b4   :  { %v758_v34 = vpop.permute.xlu1 %757 }
 0x4b5   :  { %v760_v27 = vsel %vm105_vm0, %v758_v34, %v755_v36 }
 0x4b6   :  { %777 = vmatmul.f32.vlgmr.msra.gmra.mxu0 %v760_v27  ;;  %797 = vmatmul.f32.vlgmr.msra.gmra.mxu1 %v760_v27 }
 0x4b7   :  { %817 = vmatmul.f32.vlgmr.msrb.gmra.mxu2 %v760_v27  ;;  %837 = vmatmul.f32.vlgmr.msrb.gmra.mxu3 %v760_v27 }
 0x4b8   :  { %1153 = vmatpush.msra.mxu0 %v2808_v22  ;;  %1173 = vmatpush.msra.mxu1 %v2811_v58 }
 0x4b9   :  { %1193 = vmatpush.msrb.mxu2 %v2446_v35  ;;  %1213 = vmatpush.msrb.mxu3 %v2449_v37  ;;  %v2832_v35 = vld [vmem:[#allocation8 + $0x180] sm:$0xff]  ;;  %v2835_v37 = vld [vmem:[#allocation8 + $0x188] sm:$0xff] }
 0x4ba   :  { %1154 = vmatpush.msra.mxu0 %v2816_v33  ;;  %1174 = vmatpush.msra.mxu1 %v2819_v55 }
 0x4bb   :  { %1194 = vmatpush.msrb.mxu2 %v2455_v38  ;;  %1214 = vmatpush.msrb.mxu3 %v2459_v39  ;;  %v2840_v38 = vld [vmem:[#allocation8 + $0x160] sm:$0xff]  ;;  %v2843_v39 = vld [vmem:[#allocation8 + $0x168] sm:$0xff] }
 0x4bc   :  { %1155 = vmatpush.msra.mxu0 %v2824_v8  ;;  %1175 = vmatpush.msra.mxu1 %v2827_v17 }
 0x4bd   :  { %1195 = vmatpush.msrb.mxu2 %v2462_v40  ;;  %1215 = vmatpush.msrb.mxu3 %v2466_v41  ;;  %v2848_v40 = vld [vmem:[#allocation8 + $0x140] sm:$0xff]  ;;  %v2851_v41 = vld [vmem:[#allocation8 + $0x148] sm:$0xff] }
 0x4be   :  { %1156 = vmatpush.msra.mxu0 %v2832_v35  ;;  %1176 = vmatpush.msra.mxu1 %v2835_v37 }
 0x4bf   :  { %1196 = vmatpush.msrb.mxu2 %v2470_v42  ;;  %1216 = vmatpush.msrb.mxu3 %v2474_v43  ;;  %v2856_v42 = vld [vmem:[#allocation8 + $0x120] sm:$0xff]  ;;  %v2859_v43 = vld [vmem:[#allocation8 + $0x128] sm:$0xff] }
 0x4c0   :  { %1157 = vmatpush.msra.mxu0 %v2840_v38  ;;  %1177 = vmatpush.msra.mxu1 %v2843_v39 }
 0x4c1   :  { %1197 = vmatpush.msrb.mxu2 %v2478_v44  ;;  %1217 = vmatpush.msrb.mxu3 %v2482_v45  ;;  %v2864_v44 = vld [vmem:[#allocation8 + $0x100] sm:$0xff]  ;;  %v2867_v45 = vld [vmem:[#allocation8 + $0x108] sm:$0xff] }
 0x4c2   :  { %1158 = vmatpush.msra.mxu0 %v2848_v40  ;;  %1178 = vmatpush.msra.mxu1 %v2851_v41 }
 0x4c3   :  { %1198 = vmatpush.msrb.mxu2 %v2486_v46  ;;  %1218 = vmatpush.msrb.mxu3 %v2490_v48  ;;  %v2872_v46 = vld [vmem:[#allocation8 + $0xe0] sm:$0xff]  ;;  %v2875_v48 = vld [vmem:[#allocation8 + $0xe8] sm:$0xff] }
 0x4c4   :  { %1159 = vmatpush.msra.mxu0 %v2856_v42  ;;  %1179 = vmatpush.msra.mxu1 %v2859_v43  ;;  %3501 = vst [vmem:[#allocation17_spill] sm:$0xff] %v2872_v46 }
 0x4c5   :  { %1199 = vmatpush.msrb.mxu2 %v2494_v49  ;;  %1219 = vmatpush.msrb.mxu3 %v2498_v50  ;;  %3502 = vst [vmem:[#allocation18_spill] sm:$0xff] %v2875_v48  ;;  %v2880_v49 = vld [vmem:[#allocation8 + $0xc0] sm:$0xff]  ;;  %v2883_v50 = vld [vmem:[#allocation8 + $0xc8] sm:$0xff] }
 0x4c6   :  { %1160 = vmatpush.msra.mxu0 %v2864_v44  ;;  %1180 = vmatpush.msra.mxu1 %v2867_v45  ;;  %3503 = vst [vmem:[#allocation33_spill] sm:$0xff] %v2880_v49 }
 0x4c7   :  { %1200 = vmatpush.msrb.mxu2 %v2502_v51  ;;  %1220 = vmatpush.msrb.mxu3 %v2506_v52  ;;  %3504 = vst [vmem:[#allocation34_spill] sm:$0xff] %v2883_v50  ;;  %v2888_v51 = vld [vmem:[#allocation8 + $0xa0] sm:$0xff]  ;;  %v2891_v52 = vld [vmem:[#allocation8 + $0xa8] sm:$0xff] }
 0x4c8   :  { %1161 = vmatpush.msra.mxu0 %v2872_v46  ;;  %1181 = vmatpush.msra.mxu1 %v2875_v48  ;;  %3505 = vst [vmem:[#allocation19_spill] sm:$0xff] %v2888_v51 }
 0x4c9   :  { %1201 = vmatpush.msrb.mxu2 %v3457_v61  ;;  %1221 = vmatpush.msrb.mxu3 %v3458_v62  ;;  %3506 = vst [vmem:[#allocation20_spill] sm:$0xff] %v2891_v52  ;;  %v2896_v61 = vld [vmem:[#allocation8 + $0x80] sm:$0xff]  ;;  %v2899_v62 = vld [vmem:[#allocation8 + $0x88] sm:$0xff] }
 0x4ca   :  { %1162 = vmatpush.msra.mxu0 %v2880_v49  ;;  %1182 = vmatpush.msra.mxu1 %v2883_v50  ;;  %3507 = vst [vmem:[#allocation35_spill] sm:$0xff] %v2896_v61 }
 0x4cb   :  { %1202 = vmatpush.msrb.mxu2 %v3461_v1  ;;  %1222 = vmatpush.msrb.mxu3 %v3462_v2  ;;  %3508 = vst [vmem:[#allocation36_spill] sm:$0xff] %v2899_v62  ;;  %v2904_v1 = vld [vmem:[#allocation8 + $0x60] sm:$0xff]  ;;  %v2907_v2 = vld [vmem:[#allocation8 + $0x68] sm:$0xff] }
 0x4cc   :  { %1163 = vmatpush.msra.mxu0 %v2888_v51  ;;  %1183 = vmatpush.msra.mxu1 %v2891_v52  ;;  %3509 = vst [vmem:[#allocation21_spill] sm:$0xff] %v2904_v1 }
 0x4cd   :  { %1203 = vmatpush.msrb.mxu2 %v3465_v5  ;;  %1223 = vmatpush.msrb.mxu3 %v3466_v6  ;;  %3510 = vst [vmem:[#allocation22_spill] sm:$0xff] %v2907_v2  ;;  %v2912_v5 = vld [vmem:[#allocation8 + $0x40] sm:$0xff]  ;;  %v2915_v6 = vld [vmem:[#allocation8 + $0x48] sm:$0xff] }
 0x4ce   :  { %1164 = vmatpush.msra.mxu0 %v2896_v61  ;;  %1184 = vmatpush.msra.mxu1 %v2899_v62  ;;  %3511 = vst [vmem:[#allocation37_spill] sm:$0xff] %v2912_v5 }
 0x4cf   :  { %1204 = vmatpush.msrb.mxu2 %v3469_v9  ;;  %1224 = vmatpush.msrb.mxu3 %v3470_v10  ;;  %3512 = vst [vmem:[#allocation38_spill] sm:$0xff] %v2915_v6  ;;  %v2920_v9 = vld [vmem:[#allocation8 + $0x20] sm:$0xff]  ;;  %v2923_v10 = vld [vmem:[#allocation8 + $0x28] sm:$0xff] }
 0x4d0   :  { %1165 = vmatpush.msra.mxu0 %v2904_v1  ;;  %1185 = vmatpush.msra.mxu1 %v2907_v2  ;;  %3513 = vst [vmem:[#allocation23_spill] sm:$0xff] %v2920_v9 }
 0x4d1   :  { %1205 = vmatpush.msrb.mxu2 %v3473_v13  ;;  %1225 = vmatpush.msrb.mxu3 %v3474_v14  ;;  %3514 = vst [vmem:[#allocation24_spill] sm:$0xff] %v2923_v10  ;;  %v2928_v13 = vld [vmem:[#allocation8] sm:$0xff]  ;;  %v2931_v14 = vld [vmem:[#allocation8 + $0x8] sm:$0xff] }
 0x4d2   :  { %1166 = vmatpush.msra.mxu0 %v2912_v5  ;;  %1186 = vmatpush.msra.mxu1 %v2915_v6  ;;  %3515 = vst [vmem:[#allocation39_spill] sm:$0xff] %v2928_v13 }
 0x4d3   :  { %1206 = vmatpush.msrb.mxu2 %v3477_v16  ;;  %1226 = vmatpush.msrb.mxu3 %v3478_v56  ;;  %3516 = vst [vmem:[#allocation40_spill] sm:$0xff] %v2931_v14  ;;  %v3517_v16 = vld [vmem:[#allocation11_spill] sm:$0xff] }
 0x4d4   :  { %1167 = vmatpush.msra.mxu0 %v2920_v9  ;;  %1187 = vmatpush.msra.mxu1 %v2923_v10  ;;  %v3518_v56 = vld [vmem:[#allocation27_spill] sm:$0xff] }
 0x4d5   :  { %1207 = vmatpush.msrb.mxu2 %v3481_v54  ;;  %1227 = vmatpush.msrb.mxu3 %v3482_v15  ;;  %v157_v26 = vadd.f32 %v3518_v56, %v3517_v16  ;;  %v198_v54 = vadd.f32 %v3520_v25, %v3519_v20 }
 0x4d6   :  { %1168 = vmatpush.msra.mxu0 %v2928_v13  ;;  %1188 = vmatpush.msra.mxu1 %v2931_v14 }
 0x4d7   :  { %1208 = vmatpush.msrb.mxu2 %v3485_v59  ;;  %1228 = vmatpush.msrb.mxu3 %v3486_v60 }
 0x533   :  { %v778_v21 = vpop.f32.mrf.mxu0  ;;  %v798_v15 = vpop.f32.mrf.mxu1 }
 0x534   :  { %v846_v29 = vadd.f32 %v778_v21, %v157_v26  ;;  %v847_v4 = vadd.f32 %v798_v15, %v198_v54 }
 0x536   :  { %v1898_v7 = vmul.f32 -1.442695, %v846_v29  ;;  %v1899_v30 = vmul.f32 -1.442695, %v847_v4 }
 0x538   :  { %1984 = vpow2.f32 %v1898_v7 }
 0x539   :  { %1986 = vpow2.f32 %v1899_v30 }
 0x53a   :  { %v818_v32 = vpop.f32.mrf.mxu2  ;;  %v838_v24 = vpop.f32.mrf.mxu3 }
 0x53b   :  { %v848_v59 = vadd.f32 %v818_v32, %v3521_v23  ;;  %v849_v60 = vadd.f32 %v838_v24, %v3522_v31 }
 0x53d   :  { %v1900_v63 = vmul.f32 -1.442695, %v848_v59  ;;  %v1901_v3 = vmul.f32 -1.442695, %v849_v60 }
 0x53e   :  { %v1985_v0 = vpop.eup %1984 }
 0x53f   :  { %v1987_v11 = vpop.eup %1986  ;;  %v856_v28 = vadd.f32 1.0, %v1985_v0  ;;  %1988 = vpow2.f32 %v1900_v63 }
 0x540   :  { %v857_v12 = vadd.f32 1.0, %v1987_v11  ;;  %1990 = vpow2.f32 %v1901_v3 }
 0x541   :  { %1992 = vrcp.f32 %v856_v28  ;;  %vm863_vm15 = vweird.f32 %v856_v28  ;;  %v869_v0 = vand.u32 2147483648, %v856_v28 }
 0x542   :  { %1994 = vrcp.f32 %v857_v12  ;;  %v884_v4 = vand.u32 2147483648, %v857_v12  ;;  %v882_v30 = vand.u32 2147483647, %v857_v12  ;;  %vm878_vm13 = vweird.f32 %v857_v12 }
 0x544   :  { %v885_v11 = vor.u32 1.1754944e-38, %v884_v4  ;;  %vm883_vm2 = vcmp.eq.f32.partialorder %v882_v30, 8.507059e+37 }
 0x545   :  { %v1989_v57 = vpop.eup %1988 }
 0x546   :  { %v1991_v36 = vpop.eup %1990  ;;  %v2942_v34 = vadd.f32 1.0, %v1989_v57  ;;  %v867_v57 = vand.u32 2147483647, %v856_v28 }
 0x547   :  { %v1993_v27 = vpop.eup %1992  ;;  %v908_v56 = vadd.f32 1.0, %v1991_v36 }
 0x548   :  { %v1995_v26 = vpop.eup %1994  ;;  %v859_v25 = vmul.f32 %v1993_v27, %v856_v28  ;;  %1996 = vrcp.f32 %v2942_v34  ;;  %vm864_vm14 = vweird.f32 %v1993_v27  ;;  %vm868_vm5 = vcmp.eq.f32.partialorder %v867_v57, 8.507059e+37 }
 0x549   :  { %v874_v54 = vmul.f32 %v1995_v26, %v857_v12  ;;  %1998 = vrcp.f32 %v908_v56  ;;  %vm879_vm12 = vweird.f32 %v1995_v26  ;;  %vm865_vm3 = vmor %vm863_vm15, %vm864_vm14  ;;  %v935_v23 = vand.u32 2147483648, %v908_v56 }
 0x54a   :  { %v860_v21 = vsub.f32 1.0, %v859_v25  ;;  %vm880_vm1 = vmor %vm878_vm13, %vm879_vm12  ;;  %vm929_vm6 = vweird.f32 %v908_v56  ;;  %vm914_vm9 = vweird.f32 %v2942_v34 }
 0x54b   :  { %v875_v15 = vsub.f32 1.0, %v874_v54 }
 0x54c   :  { %v861_v29 = vmul.f32 %v1993_v27, %v860_v21 }
 0x54d   :  { %v876_v7 = vmul.f32 %v1995_v26, %v875_v15 }
 0x54e   :  { %v1997_v32 = vpop.eup %1996  ;;  %v862_v60 = vadd.f32 %v1993_v27, %v861_v29  ;;  %v870_v29 = vor.u32 1.1754944e-38, %v869_v0 }
 0x54f   :  { %v1999_v24 = vpop.eup %1998  ;;  %v910_v59 = vmul.f32 %v1997_v32, %v2942_v34  ;;  %v877_v63 = vadd.f32 %v1995_v26, %v876_v7  ;;  %v933_v7 = vand.u32 2147483647, %v908_v56  ;;  %vm915_vm7 = vweird.f32 %v1997_v32 }
 0x550   :  { %v925_v3 = vmul.f32 %v1999_v24, %v908_v56  ;;  %v866_v15 = vsel %vm865_vm3, %v1993_v27, %v862_v60  ;;  %vm930_vm4 = vweird.f32 %v1999_v24  ;;  %v936_v27 = vor.u32 1.1754944e-38, %v935_v23  ;;  %vm916_vm11 = vmor %vm914_vm9, %vm915_vm7 }
 0x551   :  { %v881_v36 = vsel %vm880_vm1, %v1995_v26, %v877_v63  ;;  %v911_v25 = vsub.f32 1.0, %v910_v59  ;;  %v871_v28 = vsel %vm868_vm5, %v870_v29, %v866_v15  ;;  %v920_v59 = vand.u32 2147483648, %v2942_v34  ;;  %vm931_vm8 = vmor %vm929_vm6, %vm930_vm4 }
 0x552   :  { %v926_v54 = vsub.f32 1.0, %v925_v3  ;;  %v886_v21 = vsel %vm883_vm2, %v885_v11, %v881_v36  ;;  %v918_v60 = vand.u32 2147483647, %v2942_v34  ;;  %vm934_vm10 = vcmp.eq.f32.partialorder %v933_v7, 8.507059e+37  ;;  %v2975_v7 = vld [vmem:[#allocation8 + $0x1d0] sm:$0xff] }
 0x553   :  { %v889_v12 = vmul.f32 %v886_v21, %v2310_v47  ;;  %v912_v31 = vmul.f32 %v1997_v32, %v911_v25  ;;  %v921_v0 = vor.u32 1.1754944e-38, %v920_v59  ;;  %v892_v23 = vmul.f32 %v871_v28, %v2799_v19  ;;  %v2994_v59 = vld [vmem:[#allocation8 + $0x198] sm:$0xff] }
 0x554   :  { %v927_v20 = vmul.f32 %v1999_v24, %v926_v54  ;;  %vm919_vm12 = vcmp.eq.f32.partialorder %v918_v60, 8.507059e+37  ;;  %v3002_v60 = vld [vmem:[#allocation8 + $0x178] sm:$0xff] }
 0x555   :  { %v891_v16 = vadd.f32 %v889_v12, %v2313_v53  ;;  %v913_v26 = vadd.f32 %v1997_v32, %v912_v31 }
 0x556   :  { %v928_v4 = vadd.f32 %v1999_v24, %v927_v20 }
 0x557   :  { %v893_v30 = vmul.f32 %v891_v16, %v871_v28  ;;  %v917_v56 = vsel %vm916_vm11, %v1997_v32, %v913_v26  ;;  %v2978_v28 = vld [vmem:[#allocation8 + $0x1d8] sm:$0xff]  ;;  %v2983_v26 = vld [vmem:[#allocation8 + $0x1b0] sm:$0xff] }
 0x558   :  { %v932_v63 = vsel %vm931_vm8, %v1999_v24, %v928_v4  ;;  %v922_v11 = vsel %vm919_vm12, %v921_v0, %v917_v56  ;;  %v2986_v4 = vld [vmem:[#allocation8 + $0x1b8] sm:$0xff]  ;;  %v3015_v56 = vld [vmem:[#allocation8 + $0x130] sm:$0xff] }
 0x559   :  { %895 = vrot.lane.b32.xlu2 %v893_v30, %s2245_s2  ;;  %v937_v3 = vsel %vm934_vm10, %v936_v27, %v932_v63  ;;  %v943_v54 = vmul.f32 %v922_v11, %v2804_v18  ;;  %v2970_v18 = vld [vmem:[#allocation8 + $0x1f8] sm:$0xff]  ;;  %v2991_v30 = vld [vmem:[#allocation8 + $0x190] sm:$0xff] }
 0x55a   :  { %v940_v31 = vmul.f32 %v937_v3, %v2310_v47  ;;  %v2999_v27 = vld [vmem:[#allocation8 + $0x170] sm:$0xff]  ;;  %v3010_v3 = vld [vmem:[#allocation8 + $0x158] sm:$0xff] }
 0x55b   :  { %v3007_v63 = vld [vmem:[#allocation8 + $0x150] sm:$0xff] }
 0x55c   :  { %v942_v20 = vadd.f32 %v940_v31, %v2313_v53  ;;  %v3018_v31 = vld [vmem:[#allocation8 + $0x138] sm:$0xff]  ;;  %v3023_v0 = vld [vmem:[#allocation8 + $0x110] sm:$0xff] }
 0x55e   :  { %v944_v57 = vmul.f32 %v942_v20, %v922_v11  ;;  %v3031_v11 = vld [vmem:[#allocation8 + $0xf0] sm:$0xff] }
 0x55f   :  { %3523 = vst [vmem:[#allocation25_spill] sm:$0xff] %v3031_v11 }
 0x560   :  { %946 = vrot.lane.b32.xlu0 %v944_v57, %s2245_s2  ;;  %v3034_v57 = vld [vmem:[#allocation8 + $0xf8] sm:$0xff] }
 0x561   :  { %3524 = vst [vmem:[#allocation26_spill] sm:$0xff] %v3034_v57 }
 0x5b3   :  { %v896_v34 = vpop.permute.xlu2 %895 }
 0x5b4   :  { %v2956_v24 = vadd.f32 %v896_v34, %v892_v23  ;;  %v3039_v23 = vld [vmem:[#allocation8 + $0xd0] sm:$0xff]  ;;  %v3042_v34 = vld [vmem:[#allocation8 + $0xd8] sm:$0xff] }
 0x5b5   :  { %3525 = vst [vmem:[#allocation41_spill] sm:$0xff] %v3039_v23 }
 0x5b6   :  { %2000 = vtanh.f32 %v2956_v24  ;;  %3526 = vst [vmem:[#allocation42_spill] sm:$0xff] %v3042_v34 }
 0x5bc   :  { %v2001_v36 = vpop.eup %2000 }
 0x5bd   :  { %v900_v25 = vmul.f32 %v2001_v36, %v891_v16  ;;  %v2967_v16 = vld [vmem:[#allocation8 + $0x1f0] sm:$0xff] }
 0x5be   :  { %v3047_v36 = vld [vmem:[#allocation8 + $0xb0] sm:$0xff] }
 0x5bf   :  { %953 = vrot.lane.b32.xlu1 %v900_v25, %s2245_s2  ;;  %3527 = vst [vmem:[#allocation27_spill] sm:$0xff] %v3047_v36  ;;  %v3050_v25 = vld [vmem:[#allocation8 + $0xb8] sm:$0xff] }
 0x5c0   :  { %3528 = vst [vmem:[#allocation28_spill] sm:$0xff] %v3050_v25 }
 0x5d2   :  { %v947_v32 = vpop.permute.xlu0 %946 }
 0x5d3   :  { %v2961_v21 = vadd.f32 %v947_v32, %v943_v54  ;;  %v3055_v32 = vld [vmem:[#allocation8 + $0x90] sm:$0xff]  ;;  %v3058_v54 = vld [vmem:[#allocation8 + $0x98] sm:$0xff] }
 0x5d4   :  { %3529 = vst [vmem:[#allocation45_spill] sm:$0xff] %v3055_v32 }
 0x5d5   :  { %2002 = vtanh.f32 %v2961_v21  ;;  %3530 = vst [vmem:[#allocation46_spill] sm:$0xff] %v3058_v54 }
 0x5db   :  { %v2003_v15 = vpop.eup %2002 }
 0x5dc   :  { %v951_v12 = vmul.f32 %v2003_v15, %v942_v20  ;;  %v3026_v20 = vld [vmem:[#allocation8 + $0x118] sm:$0xff]  ;;  %v3063_v15 = vld [vmem:[#allocation8 + $0x70] sm:$0xff] }
 0x5dd   :  { %3531 = vst [vmem:[#allocation47_spill] sm:$0xff] %v3063_v15 }
 0x631   :  { %v954_v29 = vpop.permute.xlu1 %953 }
 0x632   :  { %v956_v19 = vsel %vm105_vm0, %v954_v29, %v951_v12  ;;  %v3066_v12 = vld [vmem:[#allocation8 + $0x78] sm:$0xff]  ;;  %v3071_v29 = vld [vmem:[#allocation8 + $0x50] sm:$0xff] }
 0x633   :  { %973 = vmatmul.f32.vlgmr.msrb.gmra.mxu0 %v956_v19  ;;  %993 = vmatmul.f32.vlgmr.msrb.gmra.mxu1 %v956_v19  ;;  %3532 = vst [vmem:[#allocation48_spill] sm:$0xff] %v3066_v12 }
 0x634   :  { %1013 = vmatmul.f32.vlgmr.msra.gmra.mxu2 %v956_v19  ;;  %1033 = vmatmul.f32.vlgmr.msra.gmra.mxu3 %v956_v19  ;;  %3533 = vst [vmem:[#allocation49_spill] sm:$0xff] %v3071_v29  ;;  %v3074_v19 = vld [vmem:[#allocation8 + $0x58] sm:$0xff] }
 0x635   :  { %1349 = vmatpush.msrb.mxu0 %v2808_v22  ;;  %1369 = vmatpush.msrb.mxu1 %v2811_v58  ;;  %3534 = vst [vmem:[#allocation50_spill] sm:$0xff] %v3074_v19 }
 0x636   :  { %1389 = vmatpush.msra.mxu2 %v2967_v16  ;;  %1409 = vmatpush.msra.mxu3 %v2970_v18 }
 0x637   :  { %1350 = vmatpush.msrb.mxu0 %v2816_v33  ;;  %1370 = vmatpush.msrb.mxu1 %v2819_v55 }
 0x638   :  { %1390 = vmatpush.msra.mxu2 %v2975_v7  ;;  %1410 = vmatpush.msra.mxu3 %v2978_v28 }
 0x639   :  { %1351 = vmatpush.msrb.mxu0 %v2824_v8  ;;  %1371 = vmatpush.msrb.mxu1 %v2827_v17 }
 0x63a   :  { %1391 = vmatpush.msra.mxu2 %v2983_v26  ;;  %1411 = vmatpush.msra.mxu3 %v2986_v4 }
 0x63b   :  { %1352 = vmatpush.msrb.mxu0 %v2832_v35  ;;  %1372 = vmatpush.msrb.mxu1 %v2835_v37 }
 0x63c   :  { %1392 = vmatpush.msra.mxu2 %v2991_v30  ;;  %1412 = vmatpush.msra.mxu3 %v2994_v59 }
 0x63d   :  { %1353 = vmatpush.msrb.mxu0 %v2840_v38  ;;  %1373 = vmatpush.msrb.mxu1 %v2843_v39 }
 0x63e   :  { %1393 = vmatpush.msra.mxu2 %v2999_v27  ;;  %1413 = vmatpush.msra.mxu3 %v3002_v60 }
 0x63f   :  { %1354 = vmatpush.msrb.mxu0 %v2848_v40  ;;  %1374 = vmatpush.msrb.mxu1 %v2851_v41 }
 0x640   :  { %1394 = vmatpush.msra.mxu2 %v3007_v63  ;;  %1414 = vmatpush.msra.mxu3 %v3010_v3 }
 0x641   :  { %1355 = vmatpush.msrb.mxu0 %v2856_v42  ;;  %1375 = vmatpush.msrb.mxu1 %v2859_v43 }
 0x642   :  { %1395 = vmatpush.msra.mxu2 %v3015_v56  ;;  %1415 = vmatpush.msra.mxu3 %v3018_v31 }
 0x643   :  { %1356 = vmatpush.msrb.mxu0 %v2864_v44  ;;  %1376 = vmatpush.msrb.mxu1 %v2867_v45 }
 0x644   :  { %1396 = vmatpush.msra.mxu2 %v3023_v0  ;;  %1416 = vmatpush.msra.mxu3 %v3026_v20 }
 0x645   :  { %1357 = vmatpush.msrb.mxu0 %v2872_v46  ;;  %1377 = vmatpush.msrb.mxu1 %v2875_v48 }
 0x646   :  { %1397 = vmatpush.msra.mxu2 %v3031_v11  ;;  %1417 = vmatpush.msra.mxu3 %v3034_v57 }
 0x647   :  { %1358 = vmatpush.msrb.mxu0 %v2880_v49  ;;  %1378 = vmatpush.msrb.mxu1 %v2883_v50 }
 0x648   :  { %1398 = vmatpush.msra.mxu2 %v3039_v23  ;;  %1418 = vmatpush.msra.mxu3 %v3042_v34 }
 0x649   :  { %1359 = vmatpush.msrb.mxu0 %v2888_v51  ;;  %1379 = vmatpush.msrb.mxu1 %v2891_v52 }
 0x64a   :  { %1399 = vmatpush.msra.mxu2 %v3047_v36  ;;  %1419 = vmatpush.msra.mxu3 %v3050_v25  ;;  %v3544_v36 = vld [vmem:[#allocation44_spill] sm:$0xff] }
 0x64b   :  { %1360 = vmatpush.msrb.mxu0 %v2896_v61  ;;  %1380 = vmatpush.msrb.mxu1 %v2899_v62  ;;  %v3543_v61 = vld [vmem:[#allocation43_spill] sm:$0xff] }
 0x64c   :  { %1400 = vmatpush.msra.mxu2 %v3055_v32  ;;  %1420 = vmatpush.msra.mxu3 %v3058_v54 }
 0x64d   :  { %1361 = vmatpush.msrb.mxu0 %v2904_v1  ;;  %1381 = vmatpush.msrb.mxu1 %v2907_v2 }
 0x64e   :  { %1401 = vmatpush.msra.mxu2 %v3063_v15  ;;  %1421 = vmatpush.msra.mxu3 %v3066_v12  ;;  %v3079_v15 = vld [vmem:[#allocation8 + $0x30] sm:$0xff]  ;;  %v3082_v12 = vld [vmem:[#allocation8 + $0x38] sm:$0xff] }
 0x64f   :  { %1362 = vmatpush.msrb.mxu0 %v2912_v5  ;;  %1382 = vmatpush.msrb.mxu1 %v2915_v6  ;;  %3535 = vst [vmem:[#allocation51_spill] sm:$0xff] %v3079_v15  ;;  %v3542_v5 = vld [vmem:[#allocation14_spill] sm:$0xff] }
 0x650   :  { %1402 = vmatpush.msra.mxu2 %v3071_v29  ;;  %1422 = vmatpush.msra.mxu3 %v3074_v19  ;;  %3536 = vst [vmem:[#allocation52_spill] sm:$0xff] %v3082_v12  ;;  %v3087_v29 = vld [vmem:[#allocation8 + $0x10] sm:$0xff]  ;;  %v3090_v19 = vld [vmem:[#allocation8 + $0x18] sm:$0xff] }
 0x651   :  { %1363 = vmatpush.msrb.mxu0 %v2920_v9  ;;  %1383 = vmatpush.msrb.mxu1 %v2923_v10  ;;  %3537 = vst [vmem:[#allocation53_spill] sm:$0xff] %v3087_v29  ;;  %v3539_v10 = vld [vmem:[#allocation11_spill] sm:$0xff]  ;;  %v3540_v9 = vld [vmem:[#allocation13_spill] sm:$0xff] }
 0x652   :  { %1403 = vmatpush.msra.mxu2 %v3079_v15  ;;  %1423 = vmatpush.msra.mxu3 %v3082_v12  ;;  %3538 = vst [vmem:[#allocation54_spill] sm:$0xff] %v3090_v19  ;;  %v160_v6 = vadd.f32 %v3540_v9, %v3539_v10  ;;  %v3541_v15 = vld [vmem:[#allocation12_spill] sm:$0xff] }
 0x653   :  { %1364 = vmatpush.msrb.mxu0 %v2928_v13  ;;  %1384 = vmatpush.msrb.mxu1 %v2931_v14  ;;  %v201_v2 = vadd.f32 %v3542_v5, %v3541_v15 }
 0x654   :  { %1404 = vmatpush.msra.mxu2 %v3087_v29  ;;  %1424 = vmatpush.msra.mxu3 %v3090_v19 }
 0x6b0   :  { %v974_v1 = vpop.f32.mrf.mxu0  ;;  %v994_v12 = vpop.f32.mrf.mxu1 }
 0x6b1   :  { %v1042_v54 = vadd.f32 %v974_v1, %v160_v6  ;;  %v1043_v13 = vadd.f32 %v994_v12, %v201_v2 }
 0x6b3   :  { %v1902_v32 = vmul.f32 -1.442695, %v1042_v54  ;;  %v1903_v14 = vmul.f32 -1.442695, %v1043_v13 }
 0x6b5   :  { %2004 = vpow2.f32 %v1902_v32 }
 0x6b6   :  { %2006 = vpow2.f32 %v1903_v14 }
 0x6b7   :  { %v1014_v62 = vpop.f32.mrf.mxu2  ;;  %v1034_v29 = vpop.f32.mrf.mxu3 }
 0x6b8   :  { %v1044_v25 = vadd.f32 %v1014_v62, %v3543_v61  ;;  %v1045_v19 = vadd.f32 %v1034_v29, %v3544_v36 }
 0x6ba   :  { %v1904_v52 = vmul.f32 -1.442695, %v1044_v25  ;;  %v1905_v51 = vmul.f32 -1.442695, %v1045_v19 }
 0x6bb   :  { %v2005_v9 = vpop.eup %2004 }
 0x6bc   :  { %v2007_v10 = vpop.eup %2006  ;;  %v1052_v34 = vadd.f32 1.0, %v2005_v9  ;;  %2008 = vpow2.f32 %v1904_v52 }
 0x6bd   :  { %v1053_v5 = vadd.f32 1.0, %v2007_v10  ;;  %2010 = vpow2.f32 %v1905_v51 }
 0x6be   :  { %2012 = vrcp.f32 %v1052_v34  ;;  %vm1059_vm1 = vweird.f32 %v1052_v34  ;;  %v1065_v15 = vand.u32 2147483648, %v1052_v34 }
 0x6bf   :  { %2014 = vrcp.f32 %v1053_v5  ;;  %v1080_v52 = vand.u32 2147483648, %v1053_v5  ;;  %v1078_v51 = vand.u32 2147483647, %v1053_v5  ;;  %vm1074_vm14 = vweird.f32 %v1053_v5 }
 0x6c1   :  { %v1081_v23 = vor.u32 1.1754944e-38, %v1080_v52  ;;  %vm1079_vm3 = vcmp.eq.f32.partialorder %v1078_v51, 8.507059e+37 }
 0x6c2   :  { %v2009_v1 = vpop.eup %2008 }
 0x6c3   :  { %v2011_v2 = vpop.eup %2010  ;;  %v3099_v6 = vadd.f32 1.0, %v2009_v1 }
 0x6c4   :  { %v2013_v13 = vpop.eup %2012  ;;  %v1104_v14 = vadd.f32 1.0, %v2011_v2 }
 0x6c5   :  { %v2015_v32 = vpop.eup %2014  ;;  %v1055_v62 = vmul.f32 %v2013_v13, %v1052_v34  ;;  %2016 = vrcp.f32 %v3099_v6  ;;  %vm1060_vm15 = vweird.f32 %v2013_v13  ;;  %vm1110_vm10 = vweird.f32 %v3099_v6 }
 0x6c6   :  { %v1070_v25 = vmul.f32 %v2015_v32, %v1053_v5  ;;  %2018 = vrcp.f32 %v1104_v14  ;;  %vm1075_vm13 = vweird.f32 %v2015_v32  ;;  %vm1061_vm4 = vmor %vm1059_vm1, %vm1060_vm15  ;;  %v1131_v11 = vand.u32 2147483648, %v1104_v14 }
 0x6c7   :  { %v1056_v54 = vsub.f32 1.0, %v1055_v62  ;;  %vm1076_vm2 = vmor %vm1074_vm14, %vm1075_vm13  ;;  %v1063_v62 = vand.u32 2147483647, %v1052_v34  ;;  %vm1125_vm7 = vweird.f32 %v1104_v14 }
 0x6c8   :  { %v1071_v12 = vsub.f32 1.0, %v1070_v25 }
 0x6c9   :  { %v1057_v29 = vmul.f32 %v2013_v13, %v1056_v54  ;;  %vm1064_vm6 = vcmp.eq.f32.partialorder %v1063_v62, 8.507059e+37 }
 0x6ca   :  { %v1072_v10 = vmul.f32 %v2015_v32, %v1071_v12 }
 0x6cb   :  { %v2017_v19 = vpop.eup %2016  ;;  %v1058_v36 = vadd.f32 %v2013_v13, %v1057_v29  ;;  %v1066_v29 = vor.u32 1.1754944e-38, %v1065_v15 }
 0x6cc   :  { %v2019_v9 = vpop.eup %2018  ;;  %v1106_v1 = vmul.f32 %v2017_v19, %v3099_v6  ;;  %v1073_v2 = vadd.f32 %v2015_v32, %v1072_v10  ;;  %v1129_v10 = vand.u32 2147483647, %v1104_v14  ;;  %vm1111_vm8 = vweird.f32 %v2017_v19 }
 0x6cd   :  { %v1121_v61 = vmul.f32 %v2019_v9, %v1104_v14  ;;  %v1062_v49 = vsel %vm1061_vm4, %v2013_v13, %v1058_v36  ;;  %vm1126_vm5 = vweird.f32 %v2019_v9  ;;  %v1132_v36 = vor.u32 1.1754944e-38, %v1131_v11  ;;  %vm1112_vm12 = vmor %vm1110_vm10, %vm1111_vm8 }
 0x6ce   :  { %v1077_v25 = vsel %vm1076_vm2, %v2015_v32, %v1073_v2  ;;  %v1107_v54 = vsub.f32 1.0, %v1106_v1  ;;  %v1067_v34 = vsel %vm1064_vm6, %v1066_v29, %v1062_v49  ;;  %vm1127_vm9 = vmor %vm1125_vm7, %vm1126_vm5  ;;  %vm1130_vm11 = vcmp.eq.f32.partialorder %v1129_v10, 8.507059e+37  ;;  %v3563_v10 = vld [vmem:[#allocation47_spill] sm:$0xff] }
 0x6cf   :  { %v1122_v12 = vsub.f32 1.0, %v1121_v61  ;;  %v1082_v50 = vsel %vm1079_vm3, %v1081_v23, %v1077_v25  ;;  %v1116_v23 = vand.u32 2147483648, %v3099_v6  ;;  %v1088_v11 = vmul.f32 %v1067_v34, %v2956_v24 }
 0x6d0   :  { %v1085_v5 = vmul.f32 %v1082_v50, %v2310_v47  ;;  %v1108_v57 = vmul.f32 %v2017_v19, %v1107_v54  ;;  %v1114_v50 = vand.u32 2147483647, %v3099_v6 }
 0x6d1   :  { %v1123_v48 = vmul.f32 %v2019_v9, %v1122_v12 }
 0x6d2   :  { %v1087_v46 = vadd.f32 %v1085_v5, %v2313_v53  ;;  %v1109_v32 = vadd.f32 %v2017_v19, %v1108_v57  ;;  %v1117_v57 = vor.u32 1.1754944e-38, %v1116_v23  ;;  %vm1115_vm13 = vcmp.eq.f32.partialorder %v1114_v50, 8.507059e+37  ;;  %v3568_v23 = vld [vmem:[#allocation50_spill] sm:$0xff]  ;;  %v3570_v50 = vld [vmem:[#allocation24_spill] sm:$0xff] }
 0x6d3   :  { %v1124_v52 = vadd.f32 %v2019_v9, %v1123_v48 }
 0x6d4   :  { %v1089_v61 = vmul.f32 %v1087_v46, %v1067_v34  ;;  %v1113_v14 = vsel %vm1112_vm12, %v2017_v19, %v1109_v32  ;;  %v3564_v34 = vld [vmem:[#allocation48_spill] sm:$0xff]  ;;  %v3565_v32 = vld [vmem:[#allocation37_spill] sm:$0xff] }
 0x6d5   :  { %v1128_v15 = vsel %vm1127_vm9, %v2019_v9, %v1124_v52  ;;  %v1118_v51 = vsel %vm1115_vm13, %v1117_v57, %v1113_v14  ;;  %v3566_v52 = vld [vmem:[#allocation38_spill] sm:$0xff]  ;;  %v3573_v14 = vld [vmem:[#allocation39_spill] sm:$0xff]  ;;  %v3575_v57 = vld [vmem:[#allocation53_spill] sm:$0xff] }
 0x6d6   :  { %1091 = vrot.lane.b32.xlu2 %v1089_v61, %s2245_s2  ;;  %v1133_v13 = vsel %vm1130_vm11, %v1132_v36, %v1128_v15  ;;  %v1139_v25 = vmul.f32 %v1118_v51, %v2961_v21  ;;  %v3562_v21 = vld [vmem:[#allocation22_spill] sm:$0xff]  ;;  %v3567_v61 = vld [vmem:[#allocation49_spill] sm:$0xff]  ;;  %v3569_v36 = vld [vmem:[#allocation23_spill] sm:$0xff] }
 0x6d7   :  { %v1136_v49 = vmul.f32 %v1133_v13, %v2310_v47  ;;  %v3571_v15 = vld [vmem:[#allocation51_spill] sm:$0xff]  ;;  %v3572_v13 = vld [vmem:[#allocation52_spill] sm:$0xff] }
 0x6d9   :  { %v1138_v48 = vadd.f32 %v1136_v49, %v2313_v53  ;;  %v3574_v49 = vld [vmem:[#allocation40_spill] sm:$0xff] }
 0x6db   :  { %v1140_v1 = vmul.f32 %v1138_v48, %v1118_v51  ;;  %v3577_v51 = vld [vmem:[#allocation11_spill] sm:$0xff] }
 0x6dd   :  { %1142 = vrot.lane.b32.xlu0 %v1140_v1, %s2245_s2  ;;  %v3578_v1 = vld [vmem:[#allocation29_spill] sm:$0xff] }
 0x730   :  { %v1092_v6 = vpop.permute.xlu2 %1091 }
 0x731   :  { %v3113_v9 = vadd.f32 %v1092_v6, %v1088_v11  ;;  %v163_v11 = vadd.f32 %v3578_v1, %v3577_v51  ;;  %v3579_v6 = vld [vmem:[#allocation12_spill] sm:$0xff] }
 0x733   :  { %2020 = vtanh.f32 %v3113_v9 }
 0x739   :  { %v2021_v2 = vpop.eup %2020 }
 0x73a   :  { %v1096_v62 = vmul.f32 %v2021_v2, %v1087_v46  ;;  %v3561_v46 = vld [vmem:[#allocation21_spill] sm:$0xff]  ;;  %v3580_v2 = vld [vmem:[#allocation30_spill] sm:$0xff] }
 0x73c   :  { %1149 = vrot.lane.b32.xlu1 %v1096_v62, %s2245_s2  ;;  %v204_v62 = vadd.f32 %v3580_v2, %v3579_v6 }
 0x74f   :  { %v1143_v19 = vpop.permute.xlu0 %1142 }
 0x750   :  { %v3118_v54 = vadd.f32 %v1143_v19, %v1139_v25 }
 0x752   :  { %2022 = vtanh.f32 %v3118_v54 }
 0x758   :  { %v2023_v12 = vpop.eup %2022 }
 0x759   :  { %v1147_v5 = vmul.f32 %v2023_v12, %v1138_v48  ;;  %v3576_v48 = vld [vmem:[#allocation54_spill] sm:$0xff] }
 0x7ae   :  { %v1150_v29 = vpop.permute.xlu1 %1149 }
 0x7af   :  { %v1152_v24 = vsel %vm105_vm0, %v1150_v29, %v1147_v5 }
 0x7b0   :  { %1169 = vmatmul.f32.vlgmr.msra.gmra.mxu0 %v1152_v24  ;;  %1189 = vmatmul.f32.vlgmr.msra.gmra.mxu1 %v1152_v24 }
 0x7b1   :  { %1209 = vmatmul.f32.vlgmr.msrb.gmra.mxu2 %v1152_v24  ;;  %1229 = vmatmul.f32.vlgmr.msrb.gmra.mxu3 %v1152_v24 }
 0x7b2   :  { %1545 = vmatpush.msra.mxu0 %v2808_v22  ;;  %1565 = vmatpush.msra.mxu1 %v2811_v58  ;;  %v3545_v22 = vld [vmem:[#allocation17_spill] sm:$0xff]  ;;  %v3546_v58 = vld [vmem:[#allocation18_spill] sm:$0xff] }
 0x7b3   :  { %1585 = vmatpush.msrb.mxu2 %v2967_v16  ;;  %1605 = vmatpush.msrb.mxu3 %v2970_v18 }
 0x7b4   :  { %1546 = vmatpush.msra.mxu0 %v2816_v33  ;;  %1566 = vmatpush.msra.mxu1 %v2819_v55  ;;  %v3547_v33 = vld [vmem:[#allocation25_spill] sm:$0xff]  ;;  %v3548_v55 = vld [vmem:[#allocation26_spill] sm:$0xff] }
 0x7b5   :  { %1586 = vmatpush.msrb.mxu2 %v2975_v7  ;;  %1606 = vmatpush.msrb.mxu3 %v2978_v28 }
 0x7b6   :  { %1547 = vmatpush.msra.mxu0 %v2824_v8  ;;  %1567 = vmatpush.msra.mxu1 %v2827_v17  ;;  %v3549_v8 = vld [vmem:[#allocation33_spill] sm:$0xff]  ;;  %v3550_v17 = vld [vmem:[#allocation34_spill] sm:$0xff] }
 0x7b7   :  { %1587 = vmatpush.msrb.mxu2 %v2983_v26  ;;  %1607 = vmatpush.msrb.mxu3 %v2986_v4 }
 0x7b8   :  { %1548 = vmatpush.msra.mxu0 %v2832_v35  ;;  %1568 = vmatpush.msra.mxu1 %v2835_v37  ;;  %v3551_v35 = vld [vmem:[#allocation41_spill] sm:$0xff]  ;;  %v3552_v37 = vld [vmem:[#allocation42_spill] sm:$0xff] }
 0x7b9   :  { %1588 = vmatpush.msrb.mxu2 %v2991_v30  ;;  %1608 = vmatpush.msrb.mxu3 %v2994_v59 }
 0x7ba   :  { %1549 = vmatpush.msra.mxu0 %v2840_v38  ;;  %1569 = vmatpush.msra.mxu1 %v2843_v39  ;;  %v3553_v38 = vld [vmem:[#allocation19_spill] sm:$0xff]  ;;  %v3554_v39 = vld [vmem:[#allocation20_spill] sm:$0xff] }
 0x7bb   :  { %1589 = vmatpush.msrb.mxu2 %v2999_v27  ;;  %1609 = vmatpush.msrb.mxu3 %v3002_v60 }
 0x7bc   :  { %1550 = vmatpush.msra.mxu0 %v2848_v40  ;;  %1570 = vmatpush.msra.mxu1 %v2851_v41  ;;  %v3555_v40 = vld [vmem:[#allocation27_spill] sm:$0xff]  ;;  %v3556_v41 = vld [vmem:[#allocation28_spill] sm:$0xff] }
 0x7bd   :  { %1590 = vmatpush.msrb.mxu2 %v3007_v63  ;;  %1610 = vmatpush.msrb.mxu3 %v3010_v3 }
 0x7be   :  { %1551 = vmatpush.msra.mxu0 %v2856_v42  ;;  %1571 = vmatpush.msra.mxu1 %v2859_v43  ;;  %v3557_v42 = vld [vmem:[#allocation35_spill] sm:$0xff]  ;;  %v3558_v43 = vld [vmem:[#allocation36_spill] sm:$0xff] }
 0x7bf   :  { %1591 = vmatpush.msrb.mxu2 %v3015_v56  ;;  %1611 = vmatpush.msrb.mxu3 %v3018_v31 }
 0x7c0   :  { %1552 = vmatpush.msra.mxu0 %v2864_v44  ;;  %1572 = vmatpush.msra.mxu1 %v2867_v45  ;;  %v3559_v44 = vld [vmem:[#allocation45_spill] sm:$0xff]  ;;  %v3560_v45 = vld [vmem:[#allocation46_spill] sm:$0xff] }
 0x7c1   :  { %1592 = vmatpush.msrb.mxu2 %v3023_v0  ;;  %1612 = vmatpush.msrb.mxu3 %v3026_v20 }
 0x7c2   :  { %1553 = vmatpush.msra.mxu0 %v3545_v22  ;;  %1573 = vmatpush.msra.mxu1 %v3546_v58 }
 0x7c3   :  { %1593 = vmatpush.msrb.mxu2 %v3547_v33  ;;  %1613 = vmatpush.msrb.mxu3 %v3548_v55 }
 0x7c4   :  { %1554 = vmatpush.msra.mxu0 %v3549_v8  ;;  %1574 = vmatpush.msra.mxu1 %v3550_v17  ;;  %v3581_v8 = vld [vmem:[#allocation43_spill] sm:$0xff] }
 0x7c5   :  { %1594 = vmatpush.msrb.mxu2 %v3551_v35  ;;  %1614 = vmatpush.msrb.mxu3 %v3552_v37 }
 0x7c6   :  { %1555 = vmatpush.msra.mxu0 %v3553_v38  ;;  %1575 = vmatpush.msra.mxu1 %v3554_v39  ;;  %v3582_v38 = vld [vmem:[#allocation44_spill] sm:$0xff] }
 0x7c7   :  { %1595 = vmatpush.msrb.mxu2 %v3555_v40  ;;  %1615 = vmatpush.msrb.mxu3 %v3556_v41 }
 0x7c8   :  { %1556 = vmatpush.msra.mxu0 %v3557_v42  ;;  %1576 = vmatpush.msra.mxu1 %v3558_v43 }
 0x7c9   :  { %1596 = vmatpush.msrb.mxu2 %v3559_v44  ;;  %1616 = vmatpush.msrb.mxu3 %v3560_v45 }
 0x7ca   :  { %1557 = vmatpush.msra.mxu0 %v3561_v46  ;;  %1577 = vmatpush.msra.mxu1 %v3562_v21 }
 0x7cb   :  { %1597 = vmatpush.msrb.mxu2 %v3563_v10  ;;  %1617 = vmatpush.msrb.mxu3 %v3564_v34 }
 0x7cc   :  { %1558 = vmatpush.msra.mxu0 %v3565_v32  ;;  %1578 = vmatpush.msra.mxu1 %v3566_v52 }
 0x7cd   :  { %1598 = vmatpush.msrb.mxu2 %v3567_v61  ;;  %1618 = vmatpush.msrb.mxu3 %v3568_v23 }
 0x7ce   :  { %1559 = vmatpush.msra.mxu0 %v3569_v36  ;;  %1579 = vmatpush.msra.mxu1 %v3570_v50 }
 0x7cf   :  { %1599 = vmatpush.msrb.mxu2 %v3571_v15  ;;  %1619 = vmatpush.msrb.mxu3 %v3572_v13 }
 0x7d0   :  { %1560 = vmatpush.msra.mxu0 %v3573_v14  ;;  %1580 = vmatpush.msra.mxu1 %v3574_v49 }
 0x7d1   :  { %1600 = vmatpush.msrb.mxu2 %v3575_v57  ;;  %1620 = vmatpush.msrb.mxu3 %v3576_v48 }
 0x82d   :  { %v1170_v19 = vpop.f32.mrf.mxu0  ;;  %v1190_v25 = vpop.f32.mrf.mxu1 }
 0x82e   :  { %v1238_v12 = vadd.f32 %v1170_v19, %v163_v11  ;;  %v1239_v5 = vadd.f32 %v1190_v25, %v204_v62 }
 0x830   :  { %v1906_v29 = vmul.f32 -1.442695, %v1238_v12  ;;  %v1907_v24 = vmul.f32 -1.442695, %v1239_v5 }
 0x832   :  { %2024 = vpow2.f32 %v1906_v29 }
 0x833   :  { %2026 = vpow2.f32 %v1907_v24 }
 0x834   :  { %v1210_v22 = vpop.f32.mrf.mxu2  ;;  %v1230_v58 = vpop.f32.mrf.mxu3 }
 0x835   :  { %v1240_v17 = vadd.f32 %v1210_v22, %v3581_v8  ;;  %v1241_v39 = vadd.f32 %v1230_v58, %v3582_v38 }
 0x837   :  { %v1908_v42 = vmul.f32 -1.442695, %v1240_v17  ;;  %v1909_v43 = vmul.f32 -1.442695, %v1241_v39 }
 0x838   :  { %v2025_v46 = vpop.eup %2024 }
 0x839   :  { %v2027_v21 = vpop.eup %2026  ;;  %v1248_v32 = vadd.f32 1.0, %v2025_v46  ;;  %2028 = vpow2.f32 %v1908_v42 }
 0x83a   :  { %v1249_v52 = vadd.f32 1.0, %v2027_v21  ;;  %2030 = vpow2.f32 %v1909_v43 }
 0x83b   :  { %2032 = vrcp.f32 %v1248_v32  ;;  %vm1255_vm2 = vweird.f32 %v1248_v32  ;;  %v1261_v46 = vand.u32 2147483648, %v1248_v32 }
 0x83c   :  { %2034 = vrcp.f32 %v1249_v52  ;;  %v1276_v5 = vand.u32 2147483648, %v1249_v52  ;;  %v1274_v24 = vand.u32 2147483647, %v1249_v52  ;;  %vm1270_vm15 = vweird.f32 %v1249_v52 }
 0x83e   :  { %v1277_v21 = vor.u32 1.1754944e-38, %v1276_v5  ;;  %vm1275_vm4 = vcmp.eq.f32.partialorder %v1274_v24, 8.507059e+37 }
 0x83f   :  { %v2029_v36 = vpop.eup %2028 }
 0x840   :  { %v2031_v50 = vpop.eup %2030  ;;  %v3192_v14 = vadd.f32 1.0, %v2029_v36  ;;  %v1259_v36 = vand.u32 2147483647, %v1248_v32 }
 0x841   :  { %v2033_v49 = vpop.eup %2032  ;;  %v1300_v1 = vadd.f32 1.0, %v2031_v50 }
 0x842   :  { %v2035_v11 = vpop.eup %2034  ;;  %v1251_v2 = vmul.f32 %v2033_v49, %v1248_v32  ;;  %2036 = vrcp.f32 %v3192_v14  ;;  %vm1256_vm1 = vweird.f32 %v2033_v49  ;;  %vm1260_vm7 = vcmp.eq.f32.partialorder %v1259_v36, 8.507059e+37 }
 0x843   :  { %v1266_v62 = vmul.f32 %v2035_v11, %v1249_v52  ;;  %2038 = vrcp.f32 %v1300_v1  ;;  %vm1271_vm14 = vweird.f32 %v2035_v11  ;;  %vm1257_vm5 = vmor %vm1255_vm2, %vm1256_vm1  ;;  %v1327_v8 = vand.u32 2147483648, %v1300_v1 }
 0x844   :  { %v1252_v19 = vsub.f32 1.0, %v1251_v2  ;;  %vm1272_vm3 = vmor %vm1270_vm15, %vm1271_vm14  ;;  %vm1321_vm8 = vweird.f32 %v1300_v1  ;;  %vm1306_vm11 = vweird.f32 %v3192_v14 }
 0x845   :  { %v1267_v25 = vsub.f32 1.0, %v1266_v62 }
 0x846   :  { %v1253_v12 = vmul.f32 %v2033_v49, %v1252_v19 }
 0x847   :  { %v1268_v29 = vmul.f32 %v2035_v11, %v1267_v25 }
 0x848   :  { %v2037_v22 = vpop.eup %2036  ;;  %v1254_v39 = vadd.f32 %v2033_v49, %v1253_v12  ;;  %v1262_v12 = vor.u32 1.1754944e-38, %v1261_v46 }
 0x849   :  { %v2039_v58 = vpop.eup %2038  ;;  %v1302_v17 = vmul.f32 %v2037_v22, %v3192_v14  ;;  %v1269_v42 = vadd.f32 %v2035_v11, %v1268_v29  ;;  %v1325_v29 = vand.u32 2147483647, %v1300_v1  ;;  %vm1307_vm9 = vweird.f32 %v2037_v22 }
 0x84a   :  { %v1317_v43 = vmul.f32 %v2039_v58, %v1300_v1  ;;  %v1258_v25 = vsel %vm1257_vm5, %v2033_v49, %v1254_v39  ;;  %vm1322_vm6 = vweird.f32 %v2039_v58  ;;  %v1328_v49 = vor.u32 1.1754944e-38, %v1327_v8  ;;  %vm1308_vm13 = vmor %vm1306_vm11, %vm1307_vm9 }
 0x84b   :  { %v1273_v50 = vsel %vm1272_vm3, %v2035_v11, %v1269_v42  ;;  %v1303_v2 = vsub.f32 1.0, %v1302_v17  ;;  %v1263_v32 = vsel %vm1260_vm7, %v1262_v12, %v1258_v25  ;;  %v1312_v17 = vand.u32 2147483648, %v3192_v14  ;;  %vm1323_vm10 = vmor %vm1321_vm8, %vm1322_vm6 }
 0x84c   :  { %v1318_v62 = vsub.f32 1.0, %v1317_v43  ;;  %v1278_v19 = vsel %vm1275_vm4, %v1277_v21, %v1273_v50  ;;  %v1310_v39 = vand.u32 2147483647, %v3192_v14  ;;  %vm1326_vm12 = vcmp.eq.f32.partialorder %v1325_v29, 8.507059e+37 }
 0x84d   :  { %v1281_v52 = vmul.f32 %v1278_v19, %v2310_v47  ;;  %v1304_v38 = vmul.f32 %v2037_v22, %v1303_v2  ;;  %v1313_v46 = vor.u32 1.1754944e-38, %v1312_v17  ;;  %v1284_v8 = vmul.f32 %v1263_v32, %v3113_v9 }
 0x84e   :  { %v1319_v6 = vmul.f32 %v2039_v58, %v1318_v62  ;;  %vm1311_vm14 = vcmp.eq.f32.partialorder %v1310_v39, 8.507059e+37 }
 0x84f   :  { %v1283_v51 = vadd.f32 %v1281_v52, %v2313_v53  ;;  %v1305_v11 = vadd.f32 %v2037_v22, %v1304_v38 }
 0x850   :  { %v1320_v5 = vadd.f32 %v2039_v58, %v1319_v6 }
 0x851   :  { %v1285_v24 = vmul.f32 %v1283_v51, %v1263_v32  ;;  %v1309_v1 = vsel %vm1308_vm13, %v2037_v22, %v1305_v11 }
 0x852   :  { %v1324_v42 = vsel %vm1323_vm10, %v2039_v58, %v1320_v5  ;;  %v1314_v21 = vsel %vm1311_vm14, %v1313_v46, %v1309_v1 }
 0x853   :  { %1287 = vrot.lane.b32.xlu2 %v1285_v24, %s2245_s2  ;;  %v1329_v43 = vsel %vm1326_vm12, %v1328_v49, %v1324_v42  ;;  %v1335_v62 = vmul.f32 %v1314_v21, %v3118_v54  ;;  %v3588_v54 = vld [vmem:[#allocation44_spill] sm:$0xff] }
 0x854   :  { %v1332_v38 = vmul.f32 %v1329_v43, %v2310_v47 }
 0x856   :  { %v1334_v6 = vadd.f32 %v1332_v38, %v2313_v53 }
 0x858   :  { %v1336_v36 = vmul.f32 %v1334_v6, %v1314_v21 }
 0x85a   :  { %1338 = vrot.lane.b32.xlu0 %v1336_v36, %s2245_s2 }
 0x8ad   :  { %v1288_v14 = vpop.permute.xlu2 %1287 }
 0x8ae   :  { %v3206_v58 = vadd.f32 %v1288_v14, %v1284_v8 }
 0x8b0   :  { %2040 = vtanh.f32 %v3206_v58 }
 0x8b6   :  { %v2041_v50 = vpop.eup %2040 }
 0x8b7   :  { %v1292_v2 = vmul.f32 %v2041_v50, %v1283_v51 }
 0x8b9   :  { %1345 = vrot.lane.b32.xlu1 %v1292_v2, %s2245_s2 }
 0x8cc   :  { %v1339_v22 = vpop.permute.xlu0 %1338 }
 0x8cd   :  { %v3211_v19 = vadd.f32 %v1339_v22, %v1335_v62 }
 0x8cf   :  { %2042 = vtanh.f32 %v3211_v19 }
 0x8d5   :  { %v2043_v25 = vpop.eup %2042 }
 0x8d6   :  { %v1343_v52 = vmul.f32 %v2043_v25, %v1334_v6 }
 0x92b   :  { %v1346_v12 = vpop.permute.xlu1 %1345 }
 0x92c   :  { %v1348_v9 = vsel %vm105_vm0, %v1346_v12, %v1343_v52 }
 0x92d   :  { %1365 = vmatmul.f32.vlgmr.msrb.gmra.mxu0 %v1348_v9  ;;  %1385 = vmatmul.f32.vlgmr.msrb.gmra.mxu1 %v1348_v9 }
 0x92e   :  { %1405 = vmatmul.f32.vlgmr.msra.gmra.mxu2 %v1348_v9  ;;  %1425 = vmatmul.f32.vlgmr.msra.gmra.mxu3 %v1348_v9 }
 0x92f   :  { %1741 = vmatpush.msrb.mxu0 %v2967_v16  ;;  %1761 = vmatpush.msrb.mxu1 %v2970_v18  ;;  %v3583_v16 = vld [vmem:[#allocation11_spill] sm:$0xff] }
 0x930   :  { %v3584_v18 = vld [vmem:[#allocation15_spill] sm:$0xff] }
 0x931   :  { %1742 = vmatpush.msrb.mxu0 %v2975_v7  ;;  %1762 = vmatpush.msrb.mxu1 %v2978_v28  ;;  %v166_v7 = vadd.f32 %v3584_v18, %v3583_v16  ;;  %v3585_v28 = vld [vmem:[#allocation12_spill] sm:$0xff] }
 0x933   :  { %1743 = vmatpush.msrb.mxu0 %v2983_v26  ;;  %1763 = vmatpush.msrb.mxu1 %v2986_v4  ;;  %v3586_v26 = vld [vmem:[#allocation16_spill] sm:$0xff] }
 0x934   :  { %v207_v4 = vadd.f32 %v3586_v26, %v3585_v28 }
 0x935   :  { %1744 = vmatpush.msrb.mxu0 %v2991_v30  ;;  %1764 = vmatpush.msrb.mxu1 %v2994_v59 }
 0x937   :  { %1745 = vmatpush.msrb.mxu0 %v2999_v27  ;;  %1765 = vmatpush.msrb.mxu1 %v3002_v60 }
 0x939   :  { %1746 = vmatpush.msrb.mxu0 %v3007_v63  ;;  %1766 = vmatpush.msrb.mxu1 %v3010_v3 }
 0x93b   :  { %1747 = vmatpush.msrb.mxu0 %v3015_v56  ;;  %1767 = vmatpush.msrb.mxu1 %v3018_v31 }
 0x93d   :  { %1748 = vmatpush.msrb.mxu0 %v3023_v0  ;;  %1768 = vmatpush.msrb.mxu1 %v3026_v20  ;;  %v3587_v0 = vld [vmem:[#allocation43_spill] sm:$0xff] }
 0x93f   :  { %1749 = vmatpush.msrb.mxu0 %v3547_v33  ;;  %1769 = vmatpush.msrb.mxu1 %v3548_v55 }
 0x941   :  { %1750 = vmatpush.msrb.mxu0 %v3551_v35  ;;  %1770 = vmatpush.msrb.mxu1 %v3552_v37 }
 0x943   :  { %1751 = vmatpush.msrb.mxu0 %v3555_v40  ;;  %1771 = vmatpush.msrb.mxu1 %v3556_v41 }
 0x945   :  { %1752 = vmatpush.msrb.mxu0 %v3559_v44  ;;  %1772 = vmatpush.msrb.mxu1 %v3560_v45 }
 0x947   :  { %1753 = vmatpush.msrb.mxu0 %v3563_v10  ;;  %1773 = vmatpush.msrb.mxu1 %v3564_v34 }
 0x949   :  { %1754 = vmatpush.msrb.mxu0 %v3567_v61  ;;  %1774 = vmatpush.msrb.mxu1 %v3568_v23 }
 0x94b   :  { %1755 = vmatpush.msrb.mxu0 %v3571_v15  ;;  %1775 = vmatpush.msrb.mxu1 %v3572_v13 }
 0x94d   :  { %1756 = vmatpush.msrb.mxu0 %v3575_v57  ;;  %1776 = vmatpush.msrb.mxu1 %v3576_v48 }
 0x9aa   :  { %v1366_v30 = vpop.f32.mrf.mxu0  ;;  %v1386_v59 = vpop.f32.mrf.mxu1 }
 0x9ab   :  { %v1434_v27 = vadd.f32 %v1366_v30, %v166_v7  ;;  %v1435_v60 = vadd.f32 %v1386_v59, %v207_v4 }
 0x9ad   :  { %v1910_v63 = vmul.f32 -1.442695, %v1434_v27  ;;  %v1911_v3 = vmul.f32 -1.442695, %v1435_v60 }
 0x9af   :  { %2044 = vpow2.f32 %v1910_v63 }
 0x9b0   :  { %2046 = vpow2.f32 %v1911_v3 }
 0x9b1   :  { %v1406_v56 = vpop.f32.mrf.mxu2  ;;  %v1426_v31 = vpop.f32.mrf.mxu3 }
 0x9b2   :  { %v1436_v20 = vadd.f32 %v1406_v56, %v3587_v0  ;;  %v1437_v33 = vadd.f32 %v1426_v31, %v3588_v54 }
 0x9b4   :  { %v1912_v55 = vmul.f32 -1.442695, %v1436_v20  ;;  %v1913_v35 = vmul.f32 -1.442695, %v1437_v33 }
 0x9b5   :  { %v2045_v37 = vpop.eup %2044 }
 0x9b6   :  { %v2047_v40 = vpop.eup %2046  ;;  %v1444_v41 = vadd.f32 1.0, %v2045_v37  ;;  %2048 = vpow2.f32 %v1912_v55 }
 0x9b7   :  { %v1445_v44 = vadd.f32 1.0, %v2047_v40  ;;  %2050 = vpow2.f32 %v1913_v35 }
 0x9b8   :  { %2052 = vrcp.f32 %v1444_v41  ;;  %vm1451_vm3 = vweird.f32 %v1444_v41  ;;  %v1457_v1 = vand.u32 2147483648, %v1444_v41  ;;  %v1455_v46 = vand.u32 2147483647, %v1444_v41 }
 0x9b9   :  { %2054 = vrcp.f32 %v1445_v44  ;;  %v1472_v32 = vand.u32 2147483648, %v1445_v44  ;;  %v1470_v5 = vand.u32 2147483647, %v1445_v44  ;;  %vm1466_vm1 = vweird.f32 %v1445_v44 }
 0x9ba   :  { %v1458_v62 = vor.u32 1.1754944e-38, %v1457_v1  ;;  %vm1456_vm8 = vcmp.eq.f32.partialorder %v1455_v46, 8.507059e+37 }
 0x9bb   :  { %v1473_v38 = vor.u32 1.1754944e-38, %v1472_v32  ;;  %vm1471_vm5 = vcmp.eq.f32.partialorder %v1470_v5, 8.507059e+37 }
 0x9bc   :  { %v2049_v45 = vpop.eup %2048 }
 0x9bd   :  { %v2051_v10 = vpop.eup %2050  ;;  %v3253_v34 = vadd.f32 1.0, %v2049_v45 }
 0x9be   :  { %v2053_v61 = vpop.eup %2052  ;;  %v1496_v23 = vadd.f32 1.0, %v2051_v10 }
 0x9bf   :  { %v2055_v15 = vpop.eup %2054  ;;  %v1447_v13 = vmul.f32 %v2053_v61, %v1444_v41  ;;  %2056 = vrcp.f32 %v3253_v34  ;;  %vm1452_vm2 = vweird.f32 %v2053_v61  ;;  %v1508_v4 = vand.u32 2147483648, %v3253_v34 }
 0x9c0   :  { %v1462_v57 = vmul.f32 %v2055_v15, %v1445_v44  ;;  %2058 = vrcp.f32 %v1496_v23  ;;  %vm1467_vm15 = vweird.f32 %v2055_v15  ;;  %vm1453_vm6 = vmor %vm1451_vm3, %vm1452_vm2  ;;  %v1523_v22 = vand.u32 2147483648, %v1496_v23 }
 0x9c1   :  { %v1448_v48 = vsub.f32 1.0, %v1447_v13  ;;  %vm1468_vm4 = vmor %vm1466_vm1, %vm1467_vm15  ;;  %v1521_v52 = vand.u32 2147483647, %v1496_v23  ;;  %vm1517_vm9 = vweird.f32 %v1496_v23  ;;  %vm1502_vm12 = vweird.f32 %v3253_v34 }
 0x9c2   :  { %v1463_v51 = vsub.f32 1.0, %v1462_v57  ;;  %v1524_v30 = vor.u32 1.1754944e-38, %v1523_v22  ;;  %v1506_v59 = vand.u32 2147483647, %v3253_v34  ;;  %v1509_v56 = vor.u32 1.1754944e-38, %v1508_v4  ;;  %v3590_v57 = vld [vmem:[#allocation32_spill] sm:$0xff] }
 0x9c3   :  { %v1449_v29 = vmul.f32 %v2053_v61, %v1448_v48  ;;  %vm1522_vm13 = vcmp.eq.f32.partialorder %v1521_v52, 8.507059e+37  ;;  %v210_v48 = vadd.f32 %v3590_v57, %v3585_v28 }
 0x9c4   :  { %v1464_v11 = vmul.f32 %v2055_v15, %v1463_v51  ;;  %vm1507_vm15 = vcmp.eq.f32.partialorder %v1506_v59, 8.507059e+37 }
 0x9c5   :  { %v2057_v24 = vpop.eup %2056  ;;  %v1450_v39 = vadd.f32 %v2053_v61, %v1449_v29 }
 0x9c6   :  { %v2059_v17 = vpop.eup %2058  ;;  %v1498_v49 = vmul.f32 %v2057_v24, %v3253_v34  ;;  %v1465_v42 = vadd.f32 %v2055_v15, %v1464_v11  ;;  %vm1503_vm10 = vweird.f32 %v2057_v24 }
 0x9c7   :  { %v1513_v43 = vmul.f32 %v2059_v17, %v1496_v23  ;;  %v1454_v14 = vsel %vm1453_vm6, %v2053_v61, %v1450_v39  ;;  %vm1518_vm7 = vweird.f32 %v2059_v17  ;;  %vm1504_vm14 = vmor %vm1502_vm12, %vm1503_vm10 }
 0x9c8   :  { %v1469_v6 = vsel %vm1468_vm4, %v2055_v15, %v1465_v42  ;;  %v1499_v21 = vsub.f32 1.0, %v1498_v49  ;;  %v1459_v9 = vsel %vm1456_vm8, %v1458_v62, %v1454_v14  ;;  %vm1519_vm11 = vmor %vm1517_vm9, %vm1518_vm7  ;;  %v3589_v15 = vld [vmem:[#allocation31_spill] sm:$0xff] }
 0x9c9   :  { %v1514_v36 = vsub.f32 1.0, %v1513_v43  ;;  %v1474_v8 = vsel %vm1471_vm5, %v1473_v38, %v1469_v6  ;;  %v1480_v55 = vmul.f32 %v1459_v9, %v3206_v58  ;;  %v169_v13 = vadd.f32 %v3589_v15, %v3583_v16 }
 0x9ca   :  { %v1477_v50 = vmul.f32 %v1474_v8, %v2310_v47  ;;  %v1500_v2 = vmul.f32 %v2057_v24, %v1499_v21 }
 0x9cb   :  { %v1515_v25 = vmul.f32 %v2059_v17, %v1514_v36 }
 0x9cc   :  { %v1479_v12 = vadd.f32 %v1477_v50, %v2313_v53  ;;  %v1501_v18 = vadd.f32 %v2057_v24, %v1500_v2 }
 0x9cd   :  { %v1516_v7 = vadd.f32 %v2059_v17, %v1515_v25 }
 0x9ce   :  { %v1481_v26 = vmul.f32 %v1479_v12, %v1459_v9  ;;  %v1505_v63 = vsel %vm1504_vm14, %v2057_v24, %v1501_v18 }
 0x9cf   :  { %v1520_v27 = vsel %vm1519_vm11, %v2059_v17, %v1516_v7  ;;  %v1510_v20 = vsel %vm1507_vm15, %v1509_v56, %v1505_v63 }
 0x9d0   :  { %1483 = vrot.lane.b32.xlu2 %v1481_v26, %s2245_s2  ;;  %v1525_v60 = vsel %vm1522_vm13, %v1524_v30, %v1520_v27  ;;  %v1531_v45 = vmul.f32 %v1510_v20, %v3211_v19 }
 0x9d1   :  { %v1528_v3 = vmul.f32 %v1525_v60, %v2310_v47 }
 0x9d3   :  { %v1530_v31 = vadd.f32 %v1528_v3, %v2313_v53 }
 0x9d5   :  { %v1532_v33 = vmul.f32 %v1530_v31, %v1510_v20 }
 0x9d7   :  { %1534 = vrot.lane.b32.xlu0 %v1532_v33, %s2245_s2 }
 0xa2a   :  { %v1484_v35 = vpop.permute.xlu2 %1483 }
 0xa2b   :  { %v3267_v37 = vadd.f32 %v1484_v35, %v1480_v55 }
 0xa2d   :  { %2060 = vtanh.f32 %v3267_v37 }
 0xa33   :  { %v2061_v40 = vpop.eup %2060 }
 0xa34   :  { %v1488_v41 = vmul.f32 %v2061_v40, %v1479_v12 }
 0xa36   :  { %1541 = vrot.lane.b32.xlu1 %v1488_v41, %s2245_s2 }
 0xa49   :  { %v1535_v44 = vpop.permute.xlu0 %1534 }
 0xa4a   :  { %v3272_v10 = vadd.f32 %v1535_v44, %v1531_v45 }
 0xa4c   :  { %2062 = vtanh.f32 %v3272_v10 }
 0xa52   :  { %v2063_v34 = vpop.eup %2062 }
 0xa53   :  { %v1539_v61 = vmul.f32 %v2063_v34, %v1530_v31 }
 0xaa8   :  { %v1542_v23 = vpop.permute.xlu1 %1541 }
 0xaa9   :  { %v1544_v58 = vsel %vm105_vm0, %v1542_v23, %v1539_v61 }
 0xaaa   :  { %1561 = vmatmul.f32.vlgmr.msra.gmra.mxu0 %v1544_v58  ;;  %1581 = vmatmul.f32.vlgmr.msra.gmra.mxu1 %v1544_v58 }
 0xaab   :  { %1601 = vmatmul.f32.vlgmr.msrb.gmra.mxu2 %v1544_v58  ;;  %1621 = vmatmul.f32.vlgmr.msrb.gmra.mxu3 %v1544_v58 }
 0xb27   :  { %v1562_v19 = vpop.f32.mrf.mxu0  ;;  %v1582_v51 = vpop.f32.mrf.mxu1 }
 0xb28   :  { %v1630_v29 = vadd.f32 %v1562_v19, %v169_v13  ;;  %v1631_v32 = vadd.f32 %v1582_v51, %v210_v48 }
 0xb2a   :  { %v1914_v11 = vmul.f32 -1.442695, %v1630_v29  ;;  %v1915_v5 = vmul.f32 -1.442695, %v1631_v32 }
 0xb2c   :  { %2064 = vpow2.f32 %v1914_v11 }
 0xb2d   :  { %2066 = vpow2.f32 %v1915_v5 }
 0xb2e   :  { %v1602_v24 = vpop.f32.mrf.mxu2  ;;  %v1622_v17 = vpop.f32.mrf.mxu3 }
 0xb2f   :  { %v1632_v49 = vadd.f32 %v1602_v24, %v3587_v0  ;;  %v1633_v39 = vadd.f32 %v1622_v17, %v3588_v54 }
 0xb31   :  { %v1916_v42 = vmul.f32 -1.442695, %v1632_v49  ;;  %v1917_v43 = vmul.f32 -1.442695, %v1633_v39 }
 0xb32   :  { %v2065_v16 = vpop.eup %2064 }
 0xb33   :  { %v2067_v1 = vpop.eup %2066  ;;  %v1640_v38 = vadd.f32 1.0, %v2065_v16  ;;  %2068 = vpow2.f32 %v1916_v42 }
 0xb34   :  { %v1641_v28 = vadd.f32 1.0, %v2067_v1  ;;  %2070 = vpow2.f32 %v1917_v43 }
 0xb35   :  { %2072 = vrcp.f32 %v1640_v38  ;;  %vm1647_vm4 = vweird.f32 %v1640_v38  ;;  %v1653_v27 = vand.u32 2147483648, %v1640_v38  ;;  %v1651_v63 = vand.u32 2147483647, %v1640_v38 }
 0xb36   :  { %2074 = vrcp.f32 %v1641_v28  ;;  %v1668_v52 = vand.u32 2147483648, %v1641_v28  ;;  %v1666_v9 = vand.u32 2147483647, %v1641_v28  ;;  %vm1662_vm2 = vweird.f32 %v1641_v28 }
 0xb37   :  { %v1654_v41 = vor.u32 1.1754944e-38, %v1653_v27  ;;  %vm1652_vm9 = vcmp.eq.f32.partialorder %v1651_v63, 8.507059e+37 }
 0xb38   :  { %v1669_v60 = vor.u32 1.1754944e-38, %v1668_v52  ;;  %vm1667_vm6 = vcmp.eq.f32.partialorder %v1666_v9, 8.507059e+37 }
 0xb39   :  { %v2069_v46 = vpop.eup %2068 }
 0xb3a   :  { %v2071_v6 = vpop.eup %2070  ;;  %v3282_v21 = vadd.f32 1.0, %v2069_v46 }
 0xb3b   :  { %v2073_v36 = vpop.eup %2072  ;;  %v1692_v8 = vadd.f32 1.0, %v2071_v6 }
 0xb3c   :  { %v2075_v14 = vpop.eup %2074  ;;  %v1643_v50 = vmul.f32 %v2073_v36, %v1640_v38  ;;  %2076 = vrcp.f32 %v3282_v21  ;;  %vm1648_vm3 = vweird.f32 %v2073_v36  ;;  %v1704_v13 = vand.u32 2147483648, %v3282_v21 }
 0xb3d   :  { %v1658_v2 = vmul.f32 %v2075_v14, %v1641_v28  ;;  %2078 = vrcp.f32 %v1692_v8  ;;  %vm1663_vm1 = vweird.f32 %v2075_v14  ;;  %vm1649_vm7 = vmor %vm1647_vm4, %vm1648_vm3  ;;  %v1719_v40 = vand.u32 2147483648, %v1692_v8 }
 0xb3e   :  { %v1644_v22 = vsub.f32 1.0, %v1643_v50  ;;  %vm1664_vm5 = vmor %vm1662_vm2, %vm1663_vm1  ;;  %v1717_v45 = vand.u32 2147483647, %v1692_v8  ;;  %vm1713_vm10 = vweird.f32 %v1692_v8  ;;  %vm1698_vm13 = vweird.f32 %v3282_v21 }
 0xb3f   :  { %v1659_v62 = vsub.f32 1.0, %v1658_v2  ;;  %v1720_v57 = vor.u32 1.1754944e-38, %v1719_v40  ;;  %v1702_v48 = vand.u32 2147483647, %v3282_v21  ;;  %v1705_v11 = vor.u32 1.1754944e-38, %v1704_v13 }
 0xb40   :  { %v1645_v25 = vmul.f32 %v2073_v36, %v1644_v22  ;;  %vm1718_vm14 = vcmp.eq.f32.partialorder %v1717_v45, 8.507059e+37 }
 0xb41   :  { %v1660_v12 = vmul.f32 %v2075_v14, %v1659_v62  ;;  %vm1703_vm1 = vcmp.eq.f32.partialorder %v1702_v48, 8.507059e+37 }
 0xb42   :  { %v2077_v18 = vpop.eup %2076  ;;  %v1646_v4 = vadd.f32 %v2073_v36, %v1645_v25 }
 0xb43   :  { %v2079_v7 = vpop.eup %2078  ;;  %v1694_v26 = vmul.f32 %v2077_v18, %v3282_v21  ;;  %v1661_v30 = vadd.f32 %v2075_v14, %v1660_v12  ;;  %vm1699_vm11 = vweird.f32 %v2077_v18 }
 0xb44   :  { %v1709_v59 = vmul.f32 %v2079_v7, %v1692_v8  ;;  %v1650_v33 = vsel %vm1649_vm7, %v2073_v36, %v1646_v4  ;;  %vm1714_vm8 = vweird.f32 %v2079_v7  ;;  %vm1700_vm15 = vmor %vm1698_vm13, %vm1699_vm11 }
 0xb45   :  { %v1665_v3 = vsel %vm1664_vm5, %v2075_v14, %v1661_v30  ;;  %v1695_v56 = vsub.f32 1.0, %v1694_v26  ;;  %v1655_v61 = vsel %vm1652_vm9, %v1654_v41, %v1650_v33  ;;  %vm1715_vm12 = vmor %vm1713_vm10, %vm1714_vm8  ;;  %vm1853_vm10 = vcmask 7168  }
 0xb46   :  { %v1710_v31 = vsub.f32 1.0, %v1709_v59  ;;  %v1670_v20 = vsel %vm1667_vm6, %v1669_v60, %v1665_v3  ;;  %v1676_v49 = vmul.f32 %v1655_v61, %v3267_v37  ;;  %v1932_v37 = vld [vmem:[%s3318_s5] ss:$0 sm:$0xff] }
 0xb47   :  { %v1673_v55 = vmul.f32 %v1670_v20, %v2310_v47  ;;  %v1696_v35 = vmul.f32 %v2077_v18, %v1695_v56 }
 0xb48   :  { %v1711_v44 = vmul.f32 %v2079_v7, %v1710_v31 }
 0xb49   :  { %v1675_v34 = vadd.f32 %v1673_v55, %v2313_v53  ;;  %v1697_v23 = vadd.f32 %v2077_v18, %v1696_v35 }
 0xb4a   :  { %v1712_v58 = vadd.f32 %v2079_v7, %v1711_v44 }
 0xb4b   :  { %v1677_v15 = vmul.f32 %v1675_v34, %v1655_v61  ;;  %v1701_v29 = vsel %vm1700_vm15, %v2077_v18, %v1697_v23 }
 0xb4c   :  { %v1716_v19 = vsel %vm1715_vm12, %v2079_v7, %v1712_v58  ;;  %v1706_v24 = vsel %vm1703_vm1, %v1705_v11, %v1701_v29 }
 0xb4d   :  { %1679 = vrot.lane.b32.xlu2 %v1677_v15, %s2245_s2  ;;  %v1721_v51 = vsel %vm1718_vm14, %v1720_v57, %v1716_v19  ;;  %v1727_v38 = vmul.f32 %v1706_v24, %v3272_v10  ;;  %v1933_v19 = vld [vmem:[#allocation3] ss:$0 sm:$0xff] }
 0xb4e   :  { %v1724_v32 = vmul.f32 %v1721_v51, %v2310_v47 }
 0xb50   :  { %v1726_v5 = vadd.f32 %v1724_v32, %v2313_v53 }
 0xb52   :  { %v1728_v17 = vmul.f32 %v1726_v5, %v1706_v24 }
 0xb54   :  { %1730 = vrot.lane.b32.xlu0 %v1728_v17, %s2245_s2 }
 0xb5c   :  { %1837 = vrot.lane.b32.xlu0 %v1932_v37, %s2245_s2 }
 0xba7   :  { %v1680_v39 = vpop.permute.xlu2 %1679 }
 0xba8   :  { %v1682_v42 = vadd.f32 %v1680_v39, %v1676_v49 }
 0xbaa   :  { %2080 = vtanh.f32 %v1682_v42 }
 0xbb0   :  { %v2081_v43 = vpop.eup %2080 }
 0xbb1   :  { %v1684_v16 = vmul.f32 %v2081_v43, %v1675_v34 }
 0xbb3   :  { %1737 = vrot.lane.b32.xlu1 %v1684_v16, %s2245_s2 }
 0xbc6   :  { %v1731_v1 = vpop.permute.xlu0 %1730 }
 0xbc7   :  { %v1733_v28 = vadd.f32 %v1731_v1, %v1727_v38 }
 0xbc9   :  { %2082 = vtanh.f32 %v1733_v28 }
 0xbce   :  { %v1838_v15 = vpop.permute.xlu0 %1837 }
 0xbcf   :  { %v2083_v46 = vpop.eup %2082 }
 0xbd0   :  { %v1735_v6 = vmul.f32 %v2083_v46, %v1726_v5 }
 0xc25   :  { %v1738_v21 = vpop.permute.xlu1 %1737 }
 0xc26   :  { %v1740_v36 = vsel %vm105_vm0, %v1738_v21, %v1735_v6 }
 0xc27   :  { %1757 = vmatmul.f32.vlgmr.msrb.gmra.mxu0 %v1740_v36  ;;  %1777 = vmatmul.f32.vlgmr.msrb.gmra.mxu1 %v1740_v36 }
 0xca4   :  { %v1758_v8 = vpop.f32.mrf.mxu0  ;;  %v1778_v14 = vpop.f32.mrf.mxu1 }
 0xca5   :  { %v1781_v50 = vadd.f32 %v1758_v8, %v3587_v0  ;;  %v1782_v10 = vadd.f32 %v1778_v14, %v3588_v54 }
 0xca7   :  { %v1918_v2 = vmul.f32 -1.442695, %v1781_v50  ;;  %v1919_v22 = vmul.f32 -1.442695, %v1782_v10 }
 0xca9   :  { %2084 = vpow2.f32 %v1918_v2 }
 0xcaa   :  { %2086 = vpow2.f32 %v1919_v22 }
 0xcaf   :  { %v2085_v62 = vpop.eup %2084 }
 0xcb0   :  { %v2087_v25 = vpop.eup %2086  ;;  %v1789_v52 = vadd.f32 1.0, %v2085_v62 }
 0xcb1   :  { %v1790_v12 = vadd.f32 1.0, %v2087_v25 }
 0xcb2   :  { %2088 = vrcp.f32 %v1789_v52  ;;  %v1802_v3 = vand.u32 2147483648, %v1789_v52  ;;  %vm1796_vm6 = vweird.f32 %v1789_v52  ;;  %v1800_v31 = vand.u32 2147483647, %v1789_v52 }
 0xcb3   :  { %2090 = vrcp.f32 %v1790_v12  ;;  %v1817_v0 = vand.u32 2147483648, %v1790_v12  ;;  %v1815_v54 = vand.u32 2147483647, %v1790_v12  ;;  %vm1811_vm4 = vweird.f32 %v1790_v12 }
 0xcb4   :  { %v1803_v40 = vor.u32 1.1754944e-38, %v1802_v3  ;;  %vm1801_vm9 = vcmp.eq.f32.partialorder %v1800_v31, 8.507059e+37 }
 0xcb5   :  { %v1818_v56 = vor.u32 1.1754944e-38, %v1817_v0  ;;  %vm1816_vm7 = vcmp.eq.f32.partialorder %v1815_v54, 8.507059e+37 }
 0xcb8   :  { %v2089_v9 = vpop.eup %2088 }
 0xcb9   :  { %v2091_v18 = vpop.eup %2090  ;;  %v1792_v7 = vmul.f32 %v2089_v9, %v1789_v52  ;;  %vm1797_vm3 = vweird.f32 %v2089_v9 }
 0xcba   :  { %v1807_v26 = vmul.f32 %v2091_v18, %v1790_v12  ;;  %vm1812_vm2 = vweird.f32 %v2091_v18  ;;  %vm1798_vm8 = vmor %vm1796_vm6, %vm1797_vm3 }
 0xcbb   :  { %v1793_v4 = vsub.f32 1.0, %v1792_v7  ;;  %vm1813_vm5 = vmor %vm1811_vm4, %vm1812_vm2 }
 0xcbc   :  { %v1808_v30 = vsub.f32 1.0, %v1807_v26 }
 0xcbd   :  { %v1794_v59 = vmul.f32 %v2089_v9, %v1793_v4 }
 0xcbe   :  { %v1809_v27 = vmul.f32 %v2091_v18, %v1808_v30 }
 0xcbf   :  { %v1795_v60 = vadd.f32 %v2089_v9, %v1794_v59 }
 0xcc0   :  { %v1810_v63 = vadd.f32 %v2091_v18, %v1809_v27 }
 0xcc1   :  { %v1799_v55 = vsel %vm1798_vm8, %v2089_v9, %v1795_v60 }
 0xcc2   :  { %v1814_v20 = vsel %vm1813_vm5, %v2091_v18, %v1810_v63  ;;  %v1804_v44 = vsel %vm1801_vm9, %v1803_v40, %v1799_v55 }
 0xcc3   :  { %v1819_v33 = vsel %vm1816_vm7, %v1818_v56, %v1814_v20  ;;  %v1825_v34 = vmul.f32 %v1804_v44, %v1733_v28 }
 0xcc4   :  { %v1822_v35 = vmul.f32 %v1819_v33, %v2310_v47 }
 0xcc6   :  { %v1824_v41 = vadd.f32 %v1822_v35, %v2313_v53 }
 0xcc8   :  { %v1826_v45 = vmul.f32 %v1824_v41, %v1804_v44 }
 0xcca   :  { %1828 = vrot.lane.b32.xlu2 %v1826_v45, %s2245_s2 }
 0xd24   :  { %v1829_v61 = vpop.permute.xlu2 %1828 }
 0xd25   :  { %v1831_v23 = vadd.f32 %v1829_v61, %v1825_v34 }
 0xd27   :  { %2092 = vtanh.f32 %v1831_v23 }
 0xd2d   :  { %v2093_v58 = vpop.eup %2092 }
 0xd2e   :  { %v1833_v13 = vmul.f32 %v2093_v58, %v1824_v41 }
 0xd30   :  { %v1840_v57 = vmul.f32 %v1838_v15, %v1833_v13 }
 0xd32   :  { %1842 = vrot.lane.b32.xlu1 %v1840_v57, %s2245_s2 }
 0xda4   :  { %v1843_v48 = vpop.permute.xlu1 %1842 }
 0xda5   :  { %v1845_v47 = vsel %vm105_vm0, %v1843_v48, 0.0 }
 0xda6   :  { %1846 = vadd.xlane.f32.xlu2 %v1845_v47 }
 0xe19   :  { %v1847_v53 = vpop.xlane.xlu2 %1846 }
 0xe1a   :  { %v1852_v51 = vadd.f32 %v1933_v19, %v1847_v53 }
 0xe1c   :  { %1854 = vst.msk [vmem:[%s3320_s7] sm:$0xff] %vm1853_vm10, %v1852_v51 }
 0xe1d   :  { %1859 = vsyncpa [#allocation5], 1 }
 0xe1e   :  { %1860 = vsyncpa [#allocation7], 1 }

</bundles_post_ra>
